<compile_context>
chip_gen: v7x
topology: tpu7x:2x2x1
jax: 0.10.0
libtpu: 0.0.40
codegen_flags: <defaults>
</compile_context>

<pallas_src>
import functools
import math

import jax
import jax.numpy as jnp
from jax.experimental import pallas as pl
from jax.experimental.pallas import tpu as pltpu

D_MODEL = 256
N_HEADS = 8
D_FF = 1024
LN_EPS = 1e-5


def _self_att_kernel(x_ref,                 # (M, E)   f32, M = N*L (batch fused into rows)
                     wqkv_ref,              # (E, 3E)  bf16, [Wq^T*scale | Wk^T | Wv^T]
                     bqkv_ref,              # (1, 3E)  f32,  [bq*scale, bk, bv]
                     wo_ref,                # (E, E)   bf16, out_proj.weight^T
                     bo_ref,                # (1, E)   f32
                     gamma_ref, beta_ref,   # (1, E)   f32, shared LayerNorm
                     b1_ref,                # (1, D_FF) f32
                     b2_ref,                # (1, E)   f32
                     w1_hbm,                # (E, D_FF) bf16, HBM (manual DMA)
                     w2_hbm,                # (D_FF, E) bf16, HBM (manual DMA)
                     y_ref,                 # (M, E)   f32 out
                     wsum_ref,              # (N, L)   f32 out  (sum_heads_and_queries / H)
                     w1_vmem, w2_vmem,      # VMEM scratch for the streamed FFN weights
                     dma_sem,               # DMA semaphores (2,)
                     *, n_batch, seq_len, n_heads):
    N, L, H = n_batch, seq_len, n_heads
    E = x_ref.shape[-1]
    hd = E // H
    M = N * L

    # Kick off the FFN weight DMAs immediately so they stream under the attention compute.
    w1_cp = pltpu.make_async_copy(w1_hbm, w1_vmem, dma_sem.at[0])
    w2_cp = pltpu.make_async_copy(w2_hbm, w2_vmem, dma_sem.at[1])
    w1_cp.start()
    w2_cp.start()

    xb = x_ref[...]                                   # (M, E) f32
    xb16 = xb.astype(jnp.bfloat16)

    # ---- single packed QKV projection (lane-dense weights, one big MXU matmul) ----
    qkv = jnp.dot(xb16, wqkv_ref[...],
                  preferred_element_type=jnp.float32) + bqkv_ref[...]      # (M, 3E)

    # ---- per-head attention; heads are static 32-lane slices of the activation ----
    o_heads = []
    wsum = jnp.zeros((N, L), jnp.float32)
    for h in range(H):                                # static unroll, H = 8
        q_h = qkv[:, h * hd:(h + 1) * hd]             # (M, hd), scale already folded in
        k_h = qkv[:, E + h * hd:E + (h + 1) * hd]
        v_h = qkv[:, 2 * E + h * hd:2 * E + (h + 1) * hd]
        # (M, hd) -> (N, L, hd): splits only the major (row) axis, layout-cheap.
        q3 = q_h.reshape(N, L, hd).astype(jnp.bfloat16)
        k3 = k_h.reshape(N, L, hd).astype(jnp.bfloat16)
        v3 = v_h.reshape(N, L, hd).astype(jnp.bfloat16)

        s = jnp.einsum('bqd,bkd->bqk', q3, k3,
                       preferred_element_type=jnp.float32)                 # (N, L, L)
        s = s - jnp.max(s, axis=-1, keepdims=True)
        e = jnp.exp(s)
        p = e / jnp.sum(e, axis=-1, keepdims=True)    # exact division (argmax parity)
        wsum = wsum + jnp.sum(p, axis=1)              # sum over query positions -> (N, L)

        o3 = jnp.einsum('bqk,bkd->bqd', p.astype(jnp.bfloat16), v3,
                        preferred_element_type=jnp.float32)                # (N, L, hd)
        o_heads.append(o3.astype(jnp.bfloat16).reshape(M, hd))

    wsum_ref[...] = (wsum * (1.0 / H)).astype(wsum_ref.dtype)

    # ---- single out-projection on the lane-concatenated head outputs ----
    o_all = jnp.concatenate(o_heads, axis=-1)         # (M, E) bf16
    att = jnp.dot(o_all, wo_ref[...],
                  preferred_element_type=jnp.float32) + bo_ref[...]        # (M, E)

    gamma = gamma_ref[...]
    beta = beta_ref[...]

    def layer_norm(z):                                # shared LayerNorm (applied twice)
        mu = jnp.mean(z, axis=-1, keepdims=True)
        var = jnp.mean((z - mu) ** 2, axis=-1, keepdims=True)
        return (z - mu) * jax.lax.rsqrt(var + LN_EPS) * gamma + beta

    x1 = layer_norm(att + xb)                         # (M, E)

    # ---- FFN: wait on each streamed weight slab just before it is needed ----
    w1_cp.wait()
    h1 = jnp.dot(x1.astype(jnp.bfloat16), w1_vmem[...],
                 preferred_element_type=jnp.float32) + b1_ref[...]         # (M, D_FF)
    h1 = jnp.maximum(h1, 0.0)
    w2_cp.wait()
    ff = jnp.dot(h1.astype(jnp.bfloat16), w2_vmem[...],
                 preferred_element_type=jnp.float32) + b2_ref[...]         # (M, E)

    y_ref[...] = layer_norm(ff + x1).astype(y_ref.dtype)


def prepare_params(params, n_heads=N_HEADS):
    """One-time (offline) weight formatting: split / transpose / bf16-cast / scale-fold.

    Call once at parameter-load time, NOT per forward call."""
    w_in = params["in_proj_weight"]                   # (3E, E), rows = [Wq; Wk; Wv]
    b_in = params["in_proj_bias"]                     # (3E,)
    E = w_in.shape[1]
    hd = E // n_heads
    scale = 1.0 / math.sqrt(hd)

    wq = w_in[0 * E:1 * E] * scale                    # fold softmax scale into q projection
    bq = b_in[0 * E:1 * E] * scale
    wk = w_in[1 * E:2 * E]
    bk = b_in[1 * E:2 * E]
    wv = w_in[2 * E:3 * E]
    bv = b_in[2 * E:3 * E]

    wqkv = jnp.concatenate([wq.T, wk.T, wv.T], axis=1).astype(jnp.bfloat16)   # (E, 3E)
    bqkv = jnp.concatenate([bq, bk, bv]).reshape(1, 3 * E).astype(jnp.float32)

    wo = params["out_proj_weight"].T.astype(jnp.bfloat16)                     # (E, E)
    bo = params["out_proj_bias"].reshape(1, E).astype(jnp.float32)

    gamma = params["ln_weight"].reshape(1, E).astype(jnp.float32)
    beta = params["ln_bias"].reshape(1, E).astype(jnp.float32)

    dff = params["w1"].shape[0]
    w1 = params["w1"].T.astype(jnp.bfloat16)                                  # (E, D_FF)
    b1 = params["b1"].reshape(1, dff).astype(jnp.float32)
    w2 = params["w2"].T.astype(jnp.bfloat16)                                  # (D_FF, E)
    b2 = params["b2"].reshape(1, E).astype(jnp.float32)

    return {"wqkv": wqkv, "bqkv": bqkv, "wo": wo, "bo": bo, "gamma": gamma,
            "beta": beta, "b1": b1, "b2": b2, "w1": w1, "w2": w2}


@jax.jit
def self_att_forward(x_lne, p):
    """x_lne: (L, N, E) float32, seq-first like the PyTorch module. p: prepare_params() output."""
    L, N, E = x_lne.shape
    H = N_HEADS
    hd = E // H
    dff = p["w1"].shape[1]
    M = N * L

    # batch-first, fuse batch into the matmul M dimension
    x = jnp.transpose(x_lne, (1, 0, 2)).reshape(M, E)

    kernel = functools.partial(_self_att_kernel, n_batch=N, seq_len=L, n_heads=H)

    flops = (2 * M * E * 3 * E            # QKV
             + 2 * N * H * L * L * hd * 2  # scores + PV
             + 2 * M * E * E               # out-proj
             + 2 * M * E * dff * 2)        # FFN
    bytes_accessed = (M * E * 4                                   # x
                      + (3 * E * E + E * E + 2 * E * dff) * 2     # bf16 weights
                      + (3 * E + E + 2 * E + dff + E) * 4         # biases / LN
                      + M * E * 4 + N * L * 4)                    # outputs
    transcendentals = N * H * L * L + 2 * M

    y, wsum = pl.pallas_call(
        kernel,
        grid=(1,),                                   # whole batch in one step (M = N*L rows)
        in_specs=[
            pl.BlockSpec((M, E), lambda i: (0, 0)),          # x
            pl.BlockSpec((E, 3 * E), lambda i: (0, 0)),      # packed QKV weight (bf16)
            pl.BlockSpec((1, 3 * E), lambda i: (0, 0)),      # packed QKV bias
            pl.BlockSpec((E, E), lambda i: (0, 0)),          # out_proj weight^T (bf16)
            pl.BlockSpec((1, E), lambda i: (0, 0)),          # out_proj bias
            pl.BlockSpec((1, E), lambda i: (0, 0)),          # ln gamma
            pl.BlockSpec((1, E), lambda i: (0, 0)),          # ln beta
            pl.BlockSpec((1, dff), lambda i: (0, 0)),        # ff_1 bias
            pl.BlockSpec((1, E), lambda i: (0, 0)),          # ff_2 bias
            pl.BlockSpec(memory_space=pl.ANY),               # ff_1 weight^T (HBM, manual DMA)
            pl.BlockSpec(memory_space=pl.ANY),               # ff_2 weight^T (HBM, manual DMA)
        ],
        out_specs=[
            pl.BlockSpec((M, E), lambda i: (0, 0)),          # y (tokens, E)
            pl.BlockSpec((N, L), lambda i: (0, 0)),          # reduced attention marginal
        ],
        out_shape=[
            jax.ShapeDtypeStruct((M, E), jnp.float32),
            jax.ShapeDtypeStruct((N, L), jnp.float32),
        ],
        scratch_shapes=[
            pltpu.VMEM((E, dff), jnp.bfloat16),              # w1 landing buffer
            pltpu.VMEM((dff, E), jnp.bfloat16),              # w2 landing buffer
            pltpu.SemaphoreType.DMA((2,)),
        ],
        compiler_params=pltpu.CompilerParams(
            dimension_semantics=("arbitrary",),
        ),
        cost_estimate=pl.CostEstimate(
            flops=flops, transcendentals=transcendentals, bytes_accessed=bytes_accessed),
    )(x, p["wqkv"], p["bqkv"], p["wo"], p["bo"], p["gamma"], p["beta"],
      p["b1"], p["b2"], p["w1"], p["w2"])

    y_lne = jnp.transpose(y.reshape(N, L, E), (1, 0, 2))     # back to (L, N, E)

    # torch.max(torch.sum(w, dim=1), dim=-1).indices[0]: the kernel already produced the
    # head+query summed (N, L) marginal; only a scalar argmax is left as XLA glue.
    idx = jnp.argmax(wsum[0], axis=-1)
    return y_lne, idx


def init_params(key, d_model=D_MODEL, d_ff=D_FF):
    ks = jax.random.split(key, 8)
    n = lambda k, shape: (0.02 * jax.random.normal(k, shape, jnp.float32))
    return {
        "in_proj_weight": n(ks[0], (3 * d_model, d_model)),
        "in_proj_bias": n(ks[1], (3 * d_model,)),
        "out_proj_weight": n(ks[2], (d_model, d_model)),
        "out_proj_bias": n(ks[3], (d_model,)),
        "ln_weight": jnp.ones((d_model,), jnp.float32),      # PyTorch LayerNorm defaults
        "ln_bias": jnp.zeros((d_model,), jnp.float32),
        "w1": n(ks[4], (d_ff, d_model)),                     # ff_1.weight (out, in)
        "b1": n(ks[5], (d_ff,)),
        "w2": n(ks[6], (d_model, d_ff)),                     # ff_2.weight (out, in)
        "b2": n(ks[7], (d_model,)),
    }


if __name__ == "__main__":
    key = jax.random.PRNGKey(0)
    k_param, k_x = jax.random.split(key)

    L, N = 8, 2                                              # seq len, batch
    params = init_params(k_param)
    prepped = prepare_params(params)                         # one-time weight formatting
    jax.block_until_ready(prepped)

    x = jax.random.normal(k_x, (L, N, D_MODEL), jnp.float32)  # (L, N, E) seq-first

    y, idx = self_att_forward(x, prepped)
    jax.block_until_ready((y, idx))

    assert y.shape == (L, N, D_MODEL)
    assert idx.shape == ()
    # TODO(synk): attention/FFN dropout not modeled (PyTorch module uses dropout=0 / eval mode).
    print("KERNEL_OK")
</pallas_src>

<mosaic_0001>
module attributes {stable_mosaic.version = 11 : i64} {
  func.func @_self_att_kernel(%arg0: i32, %arg1: memref<16x256xf32, #tpu.memory_space<vmem>>, %arg2: memref<256x768xbf16, #tpu.memory_space<vmem>>, %arg3: memref<1x768xf32, #tpu.memory_space<vmem>>, %arg4: memref<256x256xbf16, #tpu.memory_space<vmem>>, %arg5: memref<1x256xf32, #tpu.memory_space<vmem>>, %arg6: memref<1x256xf32, #tpu.memory_space<vmem>>, %arg7: memref<1x256xf32, #tpu.memory_space<vmem>>, %arg8: memref<1x1024xf32, #tpu.memory_space<vmem>>, %arg9: memref<1x256xf32, #tpu.memory_space<vmem>>, %arg10: memref<256x1024xbf16, #tpu.memory_space<any>>, %arg11: memref<1024x256xbf16, #tpu.memory_space<any>>, %arg12: memref<16x256xf32, #tpu.memory_space<vmem>>, %arg13: memref<2x8xf32, #tpu.memory_space<vmem>>, %arg14: memref<256x1024xbf16, #tpu.memory_space<vmem>>, %arg15: memref<1024x256xbf16, #tpu.memory_space<vmem>>, %arg16: memref<2x!tpu.dma_semaphore, #tpu.memory_space<semaphore_mem>>) attributes {dimension_semantics = [#tpu.dimension_semantics<arbitrary>], iteration_bounds = array<i64: 1>, scalar_prefetch = 0 : i64, scratch_operands = 3 : i64, tpu.core_type = #tpu.core_type<tc>, window_params = [{pipeline_mode = #tpu.pipeline_mode<synchronous>, transform_indices = @transform_0, window_bounds = array<i64: 16, 256>}, {pipeline_mode = #tpu.pipeline_mode<synchronous>, transform_indices = @transform_1, window_bounds = array<i64: 256, 768>}, {pipeline_mode = #tpu.pipeline_mode<synchronous>, transform_indices = @transform_2, window_bounds = array<i64: 1, 768>}, {pipeline_mode = #tpu.pipeline_mode<synchronous>, transform_indices = @transform_3, window_bounds = array<i64: 256, 256>}, {pipeline_mode = #tpu.pipeline_mode<synchronous>, transform_indices = @transform_4, window_bounds = array<i64: 1, 256>}, {pipeline_mode = #tpu.pipeline_mode<synchronous>, transform_indices = @transform_5, window_bounds = array<i64: 1, 256>}, {pipeline_mode = #tpu.pipeline_mode<synchronous>, transform_indices = @transform_6, window_bounds = array<i64: 1, 256>}, {pipeline_mode = #tpu.pipeline_mode<synchronous>, transform_indices = @transform_7, window_bounds = array<i64: 1, 1024>}, {pipeline_mode = #tpu.pipeline_mode<synchronous>, transform_indices = @transform_8, window_bounds = array<i64: 1, 256>}, {}, {}, {pipeline_mode = #tpu.pipeline_mode<synchronous>, transform_indices = @transform_11, window_bounds = array<i64: 16, 256>}, {pipeline_mode = #tpu.pipeline_mode<synchronous>, transform_indices = @transform_12, window_bounds = array<i64: 2, 8>}]} {
    %c0_i32 = arith.constant 0 : i32
    %0 = tpu.memref_slice %arg16[%c0_i32] : memref<2x!tpu.dma_semaphore, #tpu.memory_space<semaphore_mem>> -> memref<1x!tpu.dma_semaphore, #tpu.memory_space<semaphore_mem>>
    %1 = tpu.memref_squeeze %0 : memref<1x!tpu.dma_semaphore, #tpu.memory_space<semaphore_mem>> -> memref<!tpu.dma_semaphore, #tpu.memory_space<semaphore_mem>>
    tpu.enqueue_dma source(%arg10 : memref<256x1024xbf16, #tpu.memory_space<any>>) target(%arg14 : memref<256x1024xbf16, #tpu.memory_space<vmem>>) target_semaphore(%1 : memref<!tpu.dma_semaphore, #tpu.memory_space<semaphore_mem>>)
    %c1_i32 = arith.constant 1 : i32
    %2 = tpu.memref_slice %arg16[%c1_i32] : memref<2x!tpu.dma_semaphore, #tpu.memory_space<semaphore_mem>> -> memref<1x!tpu.dma_semaphore, #tpu.memory_space<semaphore_mem>>
    %3 = tpu.memref_squeeze %2 : memref<1x!tpu.dma_semaphore, #tpu.memory_space<semaphore_mem>> -> memref<!tpu.dma_semaphore, #tpu.memory_space<semaphore_mem>>
    tpu.enqueue_dma source(%arg11 : memref<1024x256xbf16, #tpu.memory_space<any>>) target(%arg15 : memref<1024x256xbf16, #tpu.memory_space<vmem>>) target_semaphore(%3 : memref<!tpu.dma_semaphore, #tpu.memory_space<semaphore_mem>>)
    %c0 = arith.constant 0 : index
    %c0_0 = arith.constant 0 : index
    %4 = vector.load %arg1[%c0, %c0_0] : memref<16x256xf32, #tpu.memory_space<vmem>>, vector<16x256xf32>
    %5 = arith.truncf %4 : vector<16x256xf32> to vector<16x256xbf16>
    %c0_1 = arith.constant 0 : index
    %c0_2 = arith.constant 0 : index
    %6 = vector.load %arg2[%c0_1, %c0_2] : memref<256x768xbf16, #tpu.memory_space<vmem>>, vector<256x768xbf16>
    %cst = arith.constant dense<0.000000e+00> : vector<16x768xf32>
    %7 = tpu.matmul %5, %6, %cst {dimension_numbers = #tpu.dot_dimension_numbers<[1], [0], [0], [1], [0, 0, 1, 1], [], []>} : vector<16x256xbf16>, vector<256x768xbf16>, vector<16x768xf32> -> vector<16x768xf32>
    %c0_3 = arith.constant 0 : index
    %c0_4 = arith.constant 0 : index
    %8 = vector.load %arg3[%c0_3, %c0_4] : memref<1x768xf32, #tpu.memory_space<vmem>>, vector<1x768xf32>
    %9 = vector.broadcast %8 : vector<1x768xf32> to vector<16x768xf32>
    %10 = arith.addf %7, %9 : vector<16x768xf32>
    %cst_5 = arith.constant 0.000000e+00 : f32
    %11 = vector.broadcast %cst_5 : f32 to vector<2x8xf32>
    %12 = vector.extract_strided_slice %10 {offsets = [0, 0], sizes = [16, 32], strides = [1, 1]} : vector<16x768xf32> to vector<16x32xf32>
    %13 = vector.extract_strided_slice %10 {offsets = [0, 256], sizes = [16, 32], strides = [1, 1]} : vector<16x768xf32> to vector<16x32xf32>
    %14 = vector.extract_strided_slice %10 {offsets = [0, 512], sizes = [16, 32], strides = [1, 1]} : vector<16x768xf32> to vector<16x32xf32>
    %15 = vector.shape_cast %12 : vector<16x32xf32> to vector<2x8x32xf32>
    %16 = arith.truncf %15 : vector<2x8x32xf32> to vector<2x8x32xbf16>
    %17 = vector.shape_cast %13 : vector<16x32xf32> to vector<2x8x32xf32>
    %18 = arith.truncf %17 : vector<2x8x32xf32> to vector<2x8x32xbf16>
    %19 = vector.shape_cast %14 : vector<16x32xf32> to vector<2x8x32xf32>
    %20 = arith.truncf %19 : vector<2x8x32xf32> to vector<2x8x32xbf16>
    "tpu.trace_start"() <{level = 10 : i32, message = "bqd,bkd->bqk"}> : () -> ()
    %cst_6 = arith.constant dense<0.000000e+00> : vector<2x8x8xf32>
    %21 = tpu.matmul %16, %18, %cst_6 {dimension_numbers = #tpu.dot_dimension_numbers<[2], [2], [1], [1], [0, 0, 0, 1, 1, 1], [0], [0]>} : vector<2x8x32xbf16>, vector<2x8x32xbf16>, vector<2x8x8xf32> -> vector<2x8x8xf32>
    "tpu.trace_stop"() : () -> ()
    %cst_7 = arith.constant dense<0xFF800000> : vector<2x8xf32>
    %22 = vector.multi_reduction <maximumf>, %21, %cst_7 [2] : vector<2x8x8xf32> to vector<2x8xf32>
    %23 = vector.shape_cast %22 : vector<2x8xf32> to vector<2x8x1xf32>
    %24 = vector.broadcast %23 : vector<2x8x1xf32> to vector<2x8x8xf32>
    %25 = arith.subf %21, %24 : vector<2x8x8xf32>
    %26 = math.exp %25 : vector<2x8x8xf32>
    %cst_8 = arith.constant dense<0.000000e+00> : vector<2x8xf32>
    %27 = vector.multi_reduction <add>, %26, %cst_8 [2] : vector<2x8x8xf32> to vector<2x8xf32>
    %28 = vector.shape_cast %27 : vector<2x8xf32> to vector<2x8x1xf32>
    %29 = vector.broadcast %28 : vector<2x8x1xf32> to vector<2x8x8xf32>
    %30 = arith.divf %26, %29 : vector<2x8x8xf32>
    %cst_9 = arith.constant dense<0.000000e+00> : vector<2x8xf32>
    %31 = vector.multi_reduction <add>, %30, %cst_9 [1] : vector<2x8x8xf32> to vector<2x8xf32>
    %32 = arith.addf %11, %31 : vector<2x8xf32>
    %33 = arith.truncf %30 : vector<2x8x8xf32> to vector<2x8x8xbf16>
    "tpu.trace_start"() <{level = 10 : i32, message = "bqk,bkd->bqd"}> : () -> ()
    %cst_10 = arith.constant dense<0.000000e+00> : vector<2x8x32xf32>
    %34 = tpu.matmul %33, %20, %cst_10 {dimension_numbers = #tpu.dot_dimension_numbers<[2], [1], [1], [2], [0, 0, 0, 1, 1, 2], [0], [0]>} : vector<2x8x8xbf16>, vector<2x8x32xbf16>, vector<2x8x32xf32> -> vector<2x8x32xf32>
    "tpu.trace_stop"() : () -> ()
    %35 = arith.truncf %34 : vector<2x8x32xf32> to vector<2x8x32xbf16>
    %36 = vector.shape_cast %35 : vector<2x8x32xbf16> to vector<16x32xbf16>
    %37 = vector.extract_strided_slice %10 {offsets = [0, 32], sizes = [16, 32], strides = [1, 1]} : vector<16x768xf32> to vector<16x32xf32>
    %38 = vector.extract_strided_slice %10 {offsets = [0, 288], sizes = [16, 32], strides = [1, 1]} : vector<16x768xf32> to vector<16x32xf32>
    %39 = vector.extract_strided_slice %10 {offsets = [0, 544], sizes = [16, 32], strides = [1, 1]} : vector<16x768xf32> to vector<16x32xf32>
    %40 = vector.shape_cast %37 : vector<16x32xf32> to vector<2x8x32xf32>
    %41 = arith.truncf %40 : vector<2x8x32xf32> to vector<2x8x32xbf16>
    %42 = vector.shape_cast %38 : vector<16x32xf32> to vector<2x8x32xf32>
    %43 = arith.truncf %42 : vector<2x8x32xf32> to vector<2x8x32xbf16>
    %44 = vector.shape_cast %39 : vector<16x32xf32> to vector<2x8x32xf32>
    %45 = arith.truncf %44 : vector<2x8x32xf32> to vector<2x8x32xbf16>
    "tpu.trace_start"() <{level = 10 : i32, message = "bqd,bkd->bqk"}> : () -> ()
    %cst_11 = arith.constant dense<0.000000e+00> : vector<2x8x8xf32>
    %46 = tpu.matmul %41, %43, %cst_11 {dimension_numbers = #tpu.dot_dimension_numbers<[2], [2], [1], [1], [0, 0, 0, 1, 1, 1], [0], [0]>} : vector<2x8x32xbf16>, vector<2x8x32xbf16>, vector<2x8x8xf32> -> vector<2x8x8xf32>
    "tpu.trace_stop"() : () -> ()
    %cst_12 = arith.constant dense<0xFF800000> : vector<2x8xf32>
    %47 = vector.multi_reduction <maximumf>, %46, %cst_12 [2] : vector<2x8x8xf32> to vector<2x8xf32>
    %48 = vector.shape_cast %47 : vector<2x8xf32> to vector<2x8x1xf32>
    %49 = vector.broadcast %48 : vector<2x8x1xf32> to vector<2x8x8xf32>
    %50 = arith.subf %46, %49 : vector<2x8x8xf32>
    %51 = math.exp %50 : vector<2x8x8xf32>
    %cst_13 = arith.constant dense<0.000000e+00> : vector<2x8xf32>
    %52 = vector.multi_reduction <add>, %51, %cst_13 [2] : vector<2x8x8xf32> to vector<2x8xf32>
    %53 = vector.shape_cast %52 : vector<2x8xf32> to vector<2x8x1xf32>
    %54 = vector.broadcast %53 : vector<2x8x1xf32> to vector<2x8x8xf32>
    %55 = arith.divf %51, %54 : vector<2x8x8xf32>
    %cst_14 = arith.constant dense<0.000000e+00> : vector<2x8xf32>
    %56 = vector.multi_reduction <add>, %55, %cst_14 [1] : vector<2x8x8xf32> to vector<2x8xf32>
    %57 = arith.addf %32, %56 : vector<2x8xf32>
    %58 = arith.truncf %55 : vector<2x8x8xf32> to vector<2x8x8xbf16>
    "tpu.trace_start"() <{level = 10 : i32, message = "bqk,bkd->bqd"}> : () -> ()
    %cst_15 = arith.constant dense<0.000000e+00> : vector<2x8x32xf32>
    %59 = tpu.matmul %58, %45, %cst_15 {dimension_numbers = #tpu.dot_dimension_numbers<[2], [1], [1], [2], [0, 0, 0, 1, 1, 2], [0], [0]>} : vector<2x8x8xbf16>, vector<2x8x32xbf16>, vector<2x8x32xf32> -> vector<2x8x32xf32>
    "tpu.trace_stop"() : () -> ()
    %60 = arith.truncf %59 : vector<2x8x32xf32> to vector<2x8x32xbf16>
    %61 = vector.shape_cast %60 : vector<2x8x32xbf16> to vector<16x32xbf16>
    %62 = vector.extract_strided_slice %10 {offsets = [0, 64], sizes = [16, 32], strides = [1, 1]} : vector<16x768xf32> to vector<16x32xf32>
    %63 = vector.extract_strided_slice %10 {offsets = [0, 320], sizes = [16, 32], strides = [1, 1]} : vector<16x768xf32> to vector<16x32xf32>
    %64 = vector.extract_strided_slice %10 {offsets = [0, 576], sizes = [16, 32], strides = [1, 1]} : vector<16x768xf32> to vector<16x32xf32>
    %65 = vector.shape_cast %62 : vector<16x32xf32> to vector<2x8x32xf32>
    %66 = arith.truncf %65 : vector<2x8x32xf32> to vector<2x8x32xbf16>
    %67 = vector.shape_cast %63 : vector<16x32xf32> to vector<2x8x32xf32>
    %68 = arith.truncf %67 : vector<2x8x32xf32> to vector<2x8x32xbf16>
    %69 = vector.shape_cast %64 : vector<16x32xf32> to vector<2x8x32xf32>
    %70 = arith.truncf %69 : vector<2x8x32xf32> to vector<2x8x32xbf16>
    "tpu.trace_start"() <{level = 10 : i32, message = "bqd,bkd->bqk"}> : () -> ()
    %cst_16 = arith.constant dense<0.000000e+00> : vector<2x8x8xf32>
    %71 = tpu.matmul %66, %68, %cst_16 {dimension_numbers = #tpu.dot_dimension_numbers<[2], [2], [1], [1], [0, 0, 0, 1, 1, 1], [0], [0]>} : vector<2x8x32xbf16>, vector<2x8x32xbf16>, vector<2x8x8xf32> -> vector<2x8x8xf32>
    "tpu.trace_stop"() : () -> ()
    %cst_17 = arith.constant dense<0xFF800000> : vector<2x8xf32>
    %72 = vector.multi_reduction <maximumf>, %71, %cst_17 [2] : vector<2x8x8xf32> to vector<2x8xf32>
    %73 = vector.shape_cast %72 : vector<2x8xf32> to vector<2x8x1xf32>
    %74 = vector.broadcast %73 : vector<2x8x1xf32> to vector<2x8x8xf32>
    %75 = arith.subf %71, %74 : vector<2x8x8xf32>
    %76 = math.exp %75 : vector<2x8x8xf32>
    %cst_18 = arith.constant dense<0.000000e+00> : vector<2x8xf32>
    %77 = vector.multi_reduction <add>, %76, %cst_18 [2] : vector<2x8x8xf32> to vector<2x8xf32>
    %78 = vector.shape_cast %77 : vector<2x8xf32> to vector<2x8x1xf32>
    %79 = vector.broadcast %78 : vector<2x8x1xf32> to vector<2x8x8xf32>
    %80 = arith.divf %76, %79 : vector<2x8x8xf32>
    %cst_19 = arith.constant dense<0.000000e+00> : vector<2x8xf32>
    %81 = vector.multi_reduction <add>, %80, %cst_19 [1] : vector<2x8x8xf32> to vector<2x8xf32>
    %82 = arith.addf %57, %81 : vector<2x8xf32>
    %83 = arith.truncf %80 : vector<2x8x8xf32> to vector<2x8x8xbf16>
    "tpu.trace_start"() <{level = 10 : i32, message = "bqk,bkd->bqd"}> : () -> ()
    %cst_20 = arith.constant dense<0.000000e+00> : vector<2x8x32xf32>
    %84 = tpu.matmul %83, %70, %cst_20 {dimension_numbers = #tpu.dot_dimension_numbers<[2], [1], [1], [2], [0, 0, 0, 1, 1, 2], [0], [0]>} : vector<2x8x8xbf16>, vector<2x8x32xbf16>, vector<2x8x32xf32> -> vector<2x8x32xf32>
    "tpu.trace_stop"() : () -> ()
    %85 = arith.truncf %84 : vector<2x8x32xf32> to vector<2x8x32xbf16>
    %86 = vector.shape_cast %85 : vector<2x8x32xbf16> to vector<16x32xbf16>
    %87 = vector.extract_strided_slice %10 {offsets = [0, 96], sizes = [16, 32], strides = [1, 1]} : vector<16x768xf32> to vector<16x32xf32>
    %88 = vector.extract_strided_slice %10 {offsets = [0, 352], sizes = [16, 32], strides = [1, 1]} : vector<16x768xf32> to vector<16x32xf32>
    %89 = vector.extract_strided_slice %10 {offsets = [0, 608], sizes = [16, 32], strides = [1, 1]} : vector<16x768xf32> to vector<16x32xf32>
    %90 = vector.shape_cast %87 : vector<16x32xf32> to vector<2x8x32xf32>
    %91 = arith.truncf %90 : vector<2x8x32xf32> to vector<2x8x32xbf16>
    %92 = vector.shape_cast %88 : vector<16x32xf32> to vector<2x8x32xf32>
    %93 = arith.truncf %92 : vector<2x8x32xf32> to vector<2x8x32xbf16>
    %94 = vector.shape_cast %89 : vector<16x32xf32> to vector<2x8x32xf32>
    %95 = arith.truncf %94 : vector<2x8x32xf32> to vector<2x8x32xbf16>
    "tpu.trace_start"() <{level = 10 : i32, message = "bqd,bkd->bqk"}> : () -> ()
    %cst_21 = arith.constant dense<0.000000e+00> : vector<2x8x8xf32>
    %96 = tpu.matmul %91, %93, %cst_21 {dimension_numbers = #tpu.dot_dimension_numbers<[2], [2], [1], [1], [0, 0, 0, 1, 1, 1], [0], [0]>} : vector<2x8x32xbf16>, vector<2x8x32xbf16>, vector<2x8x8xf32> -> vector<2x8x8xf32>
    "tpu.trace_stop"() : () -> ()
    %cst_22 = arith.constant dense<0xFF800000> : vector<2x8xf32>
    %97 = vector.multi_reduction <maximumf>, %96, %cst_22 [2] : vector<2x8x8xf32> to vector<2x8xf32>
    %98 = vector.shape_cast %97 : vector<2x8xf32> to vector<2x8x1xf32>
    %99 = vector.broadcast %98 : vector<2x8x1xf32> to vector<2x8x8xf32>
    %100 = arith.subf %96, %99 : vector<2x8x8xf32>
    %101 = math.exp %100 : vector<2x8x8xf32>
    %cst_23 = arith.constant dense<0.000000e+00> : vector<2x8xf32>
    %102 = vector.multi_reduction <add>, %101, %cst_23 [2] : vector<2x8x8xf32> to vector<2x8xf32>
    %103 = vector.shape_cast %102 : vector<2x8xf32> to vector<2x8x1xf32>
    %104 = vector.broadcast %103 : vector<2x8x1xf32> to vector<2x8x8xf32>
    %105 = arith.divf %101, %104 : vector<2x8x8xf32>
    %cst_24 = arith.constant dense<0.000000e+00> : vector<2x8xf32>
    %106 = vector.multi_reduction <add>, %105, %cst_24 [1] : vector<2x8x8xf32> to vector<2x8xf32>
    %107 = arith.addf %82, %106 : vector<2x8xf32>
    %108 = arith.truncf %105 : vector<2x8x8xf32> to vector<2x8x8xbf16>
    "tpu.trace_start"() <{level = 10 : i32, message = "bqk,bkd->bqd"}> : () -> ()
    %cst_25 = arith.constant dense<0.000000e+00> : vector<2x8x32xf32>
    %109 = tpu.matmul %108, %95, %cst_25 {dimension_numbers = #tpu.dot_dimension_numbers<[2], [1], [1], [2], [0, 0, 0, 1, 1, 2], [0], [0]>} : vector<2x8x8xbf16>, vector<2x8x32xbf16>, vector<2x8x32xf32> -> vector<2x8x32xf32>
    "tpu.trace_stop"() : () -> ()
    %110 = arith.truncf %109 : vector<2x8x32xf32> to vector<2x8x32xbf16>
    %111 = vector.shape_cast %110 : vector<2x8x32xbf16> to vector<16x32xbf16>
    %112 = vector.extract_strided_slice %10 {offsets = [0, 128], sizes = [16, 32], strides = [1, 1]} : vector<16x768xf32> to vector<16x32xf32>
    %113 = vector.extract_strided_slice %10 {offsets = [0, 384], sizes = [16, 32], strides = [1, 1]} : vector<16x768xf32> to vector<16x32xf32>
    %114 = vector.extract_strided_slice %10 {offsets = [0, 640], sizes = [16, 32], strides = [1, 1]} : vector<16x768xf32> to vector<16x32xf32>
    %115 = vector.shape_cast %112 : vector<16x32xf32> to vector<2x8x32xf32>
    %116 = arith.truncf %115 : vector<2x8x32xf32> to vector<2x8x32xbf16>
    %117 = vector.shape_cast %113 : vector<16x32xf32> to vector<2x8x32xf32>
    %118 = arith.truncf %117 : vector<2x8x32xf32> to vector<2x8x32xbf16>
    %119 = vector.shape_cast %114 : vector<16x32xf32> to vector<2x8x32xf32>
    %120 = arith.truncf %119 : vector<2x8x32xf32> to vector<2x8x32xbf16>
    "tpu.trace_start"() <{level = 10 : i32, message = "bqd,bkd->bqk"}> : () -> ()
    %cst_26 = arith.constant dense<0.000000e+00> : vector<2x8x8xf32>
    %121 = tpu.matmul %116, %118, %cst_26 {dimension_numbers = #tpu.dot_dimension_numbers<[2], [2], [1], [1], [0, 0, 0, 1, 1, 1], [0], [0]>} : vector<2x8x32xbf16>, vector<2x8x32xbf16>, vector<2x8x8xf32> -> vector<2x8x8xf32>
    "tpu.trace_stop"() : () -> ()
    %cst_27 = arith.constant dense<0xFF800000> : vector<2x8xf32>
    %122 = vector.multi_reduction <maximumf>, %121, %cst_27 [2] : vector<2x8x8xf32> to vector<2x8xf32>
    %123 = vector.shape_cast %122 : vector<2x8xf32> to vector<2x8x1xf32>
    %124 = vector.broadcast %123 : vector<2x8x1xf32> to vector<2x8x8xf32>
    %125 = arith.subf %121, %124 : vector<2x8x8xf32>
    %126 = math.exp %125 : vector<2x8x8xf32>
    %cst_28 = arith.constant dense<0.000000e+00> : vector<2x8xf32>
    %127 = vector.multi_reduction <add>, %126, %cst_28 [2] : vector<2x8x8xf32> to vector<2x8xf32>
    %128 = vector.shape_cast %127 : vector<2x8xf32> to vector<2x8x1xf32>
    %129 = vector.broadcast %128 : vector<2x8x1xf32> to vector<2x8x8xf32>
    %130 = arith.divf %126, %129 : vector<2x8x8xf32>
    %cst_29 = arith.constant dense<0.000000e+00> : vector<2x8xf32>
    %131 = vector.multi_reduction <add>, %130, %cst_29 [1] : vector<2x8x8xf32> to vector<2x8xf32>
    %132 = arith.addf %107, %131 : vector<2x8xf32>
    %133 = arith.truncf %130 : vector<2x8x8xf32> to vector<2x8x8xbf16>
    "tpu.trace_start"() <{level = 10 : i32, message = "bqk,bkd->bqd"}> : () -> ()
    %cst_30 = arith.constant dense<0.000000e+00> : vector<2x8x32xf32>
    %134 = tpu.matmul %133, %120, %cst_30 {dimension_numbers = #tpu.dot_dimension_numbers<[2], [1], [1], [2], [0, 0, 0, 1, 1, 2], [0], [0]>} : vector<2x8x8xbf16>, vector<2x8x32xbf16>, vector<2x8x32xf32> -> vector<2x8x32xf32>
    "tpu.trace_stop"() : () -> ()
    %135 = arith.truncf %134 : vector<2x8x32xf32> to vector<2x8x32xbf16>
    %136 = vector.shape_cast %135 : vector<2x8x32xbf16> to vector<16x32xbf16>
    %137 = vector.extract_strided_slice %10 {offsets = [0, 160], sizes = [16, 32], strides = [1, 1]} : vector<16x768xf32> to vector<16x32xf32>
    %138 = vector.extract_strided_slice %10 {offsets = [0, 416], sizes = [16, 32], strides = [1, 1]} : vector<16x768xf32> to vector<16x32xf32>
    %139 = vector.extract_strided_slice %10 {offsets = [0, 672], sizes = [16, 32], strides = [1, 1]} : vector<16x768xf32> to vector<16x32xf32>
    %140 = vector.shape_cast %137 : vector<16x32xf32> to vector<2x8x32xf32>
    %141 = arith.truncf %140 : vector<2x8x32xf32> to vector<2x8x32xbf16>
    %142 = vector.shape_cast %138 : vector<16x32xf32> to vector<2x8x32xf32>
    %143 = arith.truncf %142 : vector<2x8x32xf32> to vector<2x8x32xbf16>
    %144 = vector.shape_cast %139 : vector<16x32xf32> to vector<2x8x32xf32>
    %145 = arith.truncf %144 : vector<2x8x32xf32> to vector<2x8x32xbf16>
    "tpu.trace_start"() <{level = 10 : i32, message = "bqd,bkd->bqk"}> : () -> ()
    %cst_31 = arith.constant dense<0.000000e+00> : vector<2x8x8xf32>
    %146 = tpu.matmul %141, %143, %cst_31 {dimension_numbers = #tpu.dot_dimension_numbers<[2], [2], [1], [1], [0, 0, 0, 1, 1, 1], [0], [0]>} : vector<2x8x32xbf16>, vector<2x8x32xbf16>, vector<2x8x8xf32> -> vector<2x8x8xf32>
    "tpu.trace_stop"() : () -> ()
    %cst_32 = arith.constant dense<0xFF800000> : vector<2x8xf32>
    %147 = vector.multi_reduction <maximumf>, %146, %cst_32 [2] : vector<2x8x8xf32> to vector<2x8xf32>
    %148 = vector.shape_cast %147 : vector<2x8xf32> to vector<2x8x1xf32>
    %149 = vector.broadcast %148 : vector<2x8x1xf32> to vector<2x8x8xf32>
    %150 = arith.subf %146, %149 : vector<2x8x8xf32>
    %151 = math.exp %150 : vector<2x8x8xf32>
    %cst_33 = arith.constant dense<0.000000e+00> : vector<2x8xf32>
    %152 = vector.multi_reduction <add>, %151, %cst_33 [2] : vector<2x8x8xf32> to vector<2x8xf32>
    %153 = vector.shape_cast %152 : vector<2x8xf32> to vector<2x8x1xf32>
    %154 = vector.broadcast %153 : vector<2x8x1xf32> to vector<2x8x8xf32>
    %155 = arith.divf %151, %154 : vector<2x8x8xf32>
    %cst_34 = arith.constant dense<0.000000e+00> : vector<2x8xf32>
    %156 = vector.multi_reduction <add>, %155, %cst_34 [1] : vector<2x8x8xf32> to vector<2x8xf32>
    %157 = arith.addf %132, %156 : vector<2x8xf32>
    %158 = arith.truncf %155 : vector<2x8x8xf32> to vector<2x8x8xbf16>
    "tpu.trace_start"() <{level = 10 : i32, message = "bqk,bkd->bqd"}> : () -> ()
    %cst_35 = arith.constant dense<0.000000e+00> : vector<2x8x32xf32>
    %159 = tpu.matmul %158, %145, %cst_35 {dimension_numbers = #tpu.dot_dimension_numbers<[2], [1], [1], [2], [0, 0, 0, 1, 1, 2], [0], [0]>} : vector<2x8x8xbf16>, vector<2x8x32xbf16>, vector<2x8x32xf32> -> vector<2x8x32xf32>
    "tpu.trace_stop"() : () -> ()
    %160 = arith.truncf %159 : vector<2x8x32xf32> to vector<2x8x32xbf16>
    %161 = vector.shape_cast %160 : vector<2x8x32xbf16> to vector<16x32xbf16>
    %162 = vector.extract_strided_slice %10 {offsets = [0, 192], sizes = [16, 32], strides = [1, 1]} : vector<16x768xf32> to vector<16x32xf32>
    %163 = vector.extract_strided_slice %10 {offsets = [0, 448], sizes = [16, 32], strides = [1, 1]} : vector<16x768xf32> to vector<16x32xf32>
    %164 = vector.extract_strided_slice %10 {offsets = [0, 704], sizes = [16, 32], strides = [1, 1]} : vector<16x768xf32> to vector<16x32xf32>
    %165 = vector.shape_cast %162 : vector<16x32xf32> to vector<2x8x32xf32>
    %166 = arith.truncf %165 : vector<2x8x32xf32> to vector<2x8x32xbf16>
    %167 = vector.shape_cast %163 : vector<16x32xf32> to vector<2x8x32xf32>
    %168 = arith.truncf %167 : vector<2x8x32xf32> to vector<2x8x32xbf16>
    %169 = vector.shape_cast %164 : vector<16x32xf32> to vector<2x8x32xf32>
    %170 = arith.truncf %169 : vector<2x8x32xf32> to vector<2x8x32xbf16>
    "tpu.trace_start"() <{level = 10 : i32, message = "bqd,bkd->bqk"}> : () -> ()
    %cst_36 = arith.constant dense<0.000000e+00> : vector<2x8x8xf32>
    %171 = tpu.matmul %166, %168, %cst_36 {dimension_numbers = #tpu.dot_dimension_numbers<[2], [2], [1], [1], [0, 0, 0, 1, 1, 1], [0], [0]>} : vector<2x8x32xbf16>, vector<2x8x32xbf16>, vector<2x8x8xf32> -> vector<2x8x8xf32>
    "tpu.trace_stop"() : () -> ()
    %cst_37 = arith.constant dense<0xFF800000> : vector<2x8xf32>
    %172 = vector.multi_reduction <maximumf>, %171, %cst_37 [2] : vector<2x8x8xf32> to vector<2x8xf32>
    %173 = vector.shape_cast %172 : vector<2x8xf32> to vector<2x8x1xf32>
    %174 = vector.broadcast %173 : vector<2x8x1xf32> to vector<2x8x8xf32>
    %175 = arith.subf %171, %174 : vector<2x8x8xf32>
    %176 = math.exp %175 : vector<2x8x8xf32>
    %cst_38 = arith.constant dense<0.000000e+00> : vector<2x8xf32>
    %177 = vector.multi_reduction <add>, %176, %cst_38 [2] : vector<2x8x8xf32> to vector<2x8xf32>
    %178 = vector.shape_cast %177 : vector<2x8xf32> to vector<2x8x1xf32>
    %179 = vector.broadcast %178 : vector<2x8x1xf32> to vector<2x8x8xf32>
    %180 = arith.divf %176, %179 : vector<2x8x8xf32>
    %cst_39 = arith.constant dense<0.000000e+00> : vector<2x8xf32>
    %181 = vector.multi_reduction <add>, %180, %cst_39 [1] : vector<2x8x8xf32> to vector<2x8xf32>
    %182 = arith.addf %157, %181 : vector<2x8xf32>
    %183 = arith.truncf %180 : vector<2x8x8xf32> to vector<2x8x8xbf16>
    "tpu.trace_start"() <{level = 10 : i32, message = "bqk,bkd->bqd"}> : () -> ()
    %cst_40 = arith.constant dense<0.000000e+00> : vector<2x8x32xf32>
    %184 = tpu.matmul %183, %170, %cst_40 {dimension_numbers = #tpu.dot_dimension_numbers<[2], [1], [1], [2], [0, 0, 0, 1, 1, 2], [0], [0]>} : vector<2x8x8xbf16>, vector<2x8x32xbf16>, vector<2x8x32xf32> -> vector<2x8x32xf32>
    "tpu.trace_stop"() : () -> ()
    %185 = arith.truncf %184 : vector<2x8x32xf32> to vector<2x8x32xbf16>
    %186 = vector.shape_cast %185 : vector<2x8x32xbf16> to vector<16x32xbf16>
    %187 = vector.extract_strided_slice %10 {offsets = [0, 224], sizes = [16, 32], strides = [1, 1]} : vector<16x768xf32> to vector<16x32xf32>
    %188 = vector.extract_strided_slice %10 {offsets = [0, 480], sizes = [16, 32], strides = [1, 1]} : vector<16x768xf32> to vector<16x32xf32>
    %189 = vector.extract_strided_slice %10 {offsets = [0, 736], sizes = [16, 32], strides = [1, 1]} : vector<16x768xf32> to vector<16x32xf32>
    %190 = vector.shape_cast %187 : vector<16x32xf32> to vector<2x8x32xf32>
    %191 = arith.truncf %190 : vector<2x8x32xf32> to vector<2x8x32xbf16>
    %192 = vector.shape_cast %188 : vector<16x32xf32> to vector<2x8x32xf32>
    %193 = arith.truncf %192 : vector<2x8x32xf32> to vector<2x8x32xbf16>
    %194 = vector.shape_cast %189 : vector<16x32xf32> to vector<2x8x32xf32>
    %195 = arith.truncf %194 : vector<2x8x32xf32> to vector<2x8x32xbf16>
    "tpu.trace_start"() <{level = 10 : i32, message = "bqd,bkd->bqk"}> : () -> ()
    %cst_41 = arith.constant dense<0.000000e+00> : vector<2x8x8xf32>
    %196 = tpu.matmul %191, %193, %cst_41 {dimension_numbers = #tpu.dot_dimension_numbers<[2], [2], [1], [1], [0, 0, 0, 1, 1, 1], [0], [0]>} : vector<2x8x32xbf16>, vector<2x8x32xbf16>, vector<2x8x8xf32> -> vector<2x8x8xf32>
    "tpu.trace_stop"() : () -> ()
    %cst_42 = arith.constant dense<0xFF800000> : vector<2x8xf32>
    %197 = vector.multi_reduction <maximumf>, %196, %cst_42 [2] : vector<2x8x8xf32> to vector<2x8xf32>
    %198 = vector.shape_cast %197 : vector<2x8xf32> to vector<2x8x1xf32>
    %199 = vector.broadcast %198 : vector<2x8x1xf32> to vector<2x8x8xf32>
    %200 = arith.subf %196, %199 : vector<2x8x8xf32>
    %201 = math.exp %200 : vector<2x8x8xf32>
    %cst_43 = arith.constant dense<0.000000e+00> : vector<2x8xf32>
    %202 = vector.multi_reduction <add>, %201, %cst_43 [2] : vector<2x8x8xf32> to vector<2x8xf32>
    %203 = vector.shape_cast %202 : vector<2x8xf32> to vector<2x8x1xf32>
    %204 = vector.broadcast %203 : vector<2x8x1xf32> to vector<2x8x8xf32>
    %205 = arith.divf %201, %204 : vector<2x8x8xf32>
    %cst_44 = arith.constant dense<0.000000e+00> : vector<2x8xf32>
    %206 = vector.multi_reduction <add>, %205, %cst_44 [1] : vector<2x8x8xf32> to vector<2x8xf32>
    %207 = arith.addf %182, %206 : vector<2x8xf32>
    %208 = arith.truncf %205 : vector<2x8x8xf32> to vector<2x8x8xbf16>
    "tpu.trace_start"() <{level = 10 : i32, message = "bqk,bkd->bqd"}> : () -> ()
    %cst_45 = arith.constant dense<0.000000e+00> : vector<2x8x32xf32>
    %209 = tpu.matmul %208, %195, %cst_45 {dimension_numbers = #tpu.dot_dimension_numbers<[2], [1], [1], [2], [0, 0, 0, 1, 1, 2], [0], [0]>} : vector<2x8x8xbf16>, vector<2x8x32xbf16>, vector<2x8x32xf32> -> vector<2x8x32xf32>
    "tpu.trace_stop"() : () -> ()
    %210 = arith.truncf %209 : vector<2x8x32xf32> to vector<2x8x32xbf16>
    %211 = vector.shape_cast %210 : vector<2x8x32xbf16> to vector<16x32xbf16>
    %cst_46 = arith.constant 1.250000e-01 : f32
    %212 = vector.broadcast %cst_46 : f32 to vector<2x8xf32>
    %213 = arith.mulf %207, %212 : vector<2x8xf32>
    %c0_47 = arith.constant 0 : index
    %c0_48 = arith.constant 0 : index
    %214 = vector.load %arg13[%c0_47, %c0_48] : memref<2x8xf32, #tpu.memory_space<vmem>>, vector<2x8xf32>
    tpu.vector_store %arg13[%c0_47, %c0_48], %213 {strides = array<i32>} : memref<2x8xf32, #tpu.memory_space<vmem>>, vector<2x8xf32>,
    %215 = tpu.concatenate %36, %61, %86, %111, %136, %161, %186, %211 in 1 : vector<16x32xbf16>, vector<16x32xbf16>, vector<16x32xbf16>, vector<16x32xbf16>, vector<16x32xbf16>, vector<16x32xbf16>, vector<16x32xbf16>, vector<16x32xbf16> -> vector<16x256xbf16>
    %c0_49 = arith.constant 0 : index
    %c0_50 = arith.constant 0 : index
    %216 = vector.load %arg4[%c0_49, %c0_50] : memref<256x256xbf16, #tpu.memory_space<vmem>>, vector<256x256xbf16>
    %cst_51 = arith.constant dense<0.000000e+00> : vector<16x256xf32>
    %217 = tpu.matmul %215, %216, %cst_51 {dimension_numbers = #tpu.dot_dimension_numbers<[1], [0], [0], [1], [0, 0, 1, 1], [], []>} : vector<16x256xbf16>, vector<256x256xbf16>, vector<16x256xf32> -> vector<16x256xf32>
    %c0_52 = arith.constant 0 : index
    %c0_53 = arith.constant 0 : index
    %218 = vector.load %arg5[%c0_52, %c0_53] : memref<1x256xf32, #tpu.memory_space<vmem>>, vector<1x256xf32>
    %219 = vector.broadcast %218 : vector<1x256xf32> to vector<16x256xf32>
    %220 = arith.addf %217, %219 : vector<16x256xf32>
    %c0_54 = arith.constant 0 : index
    %c0_55 = arith.constant 0 : index
    %221 = vector.load %arg6[%c0_54, %c0_55] : memref<1x256xf32, #tpu.memory_space<vmem>>, vector<1x256xf32>
    %c0_56 = arith.constant 0 : index
    %c0_57 = arith.constant 0 : index
    %222 = vector.load %arg7[%c0_56, %c0_57] : memref<1x256xf32, #tpu.memory_space<vmem>>, vector<1x256xf32>
    %223 = arith.addf %220, %4 : vector<16x256xf32>
    %cst_58 = arith.constant dense<0.000000e+00> : vector<16xf32>
    %224 = vector.multi_reduction <add>, %223, %cst_58 [1] : vector<16x256xf32> to vector<16xf32>
    %225 = vector.shape_cast %224 : vector<16xf32> to vector<16x1xf32>
    %cst_59 = arith.constant 2.560000e+02 : f32
    %226 = vector.broadcast %cst_59 : f32 to vector<16x1xf32>
    %227 = arith.divf %225, %226 : vector<16x1xf32>
    %228 = vector.broadcast %227 : vector<16x1xf32> to vector<16x256xf32>
    %229 = arith.subf %223, %228 : vector<16x256xf32>
    %230 = arith.mulf %229, %229 : vector<16x256xf32>
    %cst_60 = arith.constant dense<0.000000e+00> : vector<16xf32>
    %231 = vector.multi_reduction <add>, %230, %cst_60 [1] : vector<16x256xf32> to vector<16xf32>
    %232 = vector.shape_cast %231 : vector<16xf32> to vector<16x1xf32>
    %cst_61 = arith.constant 2.560000e+02 : f32
    %233 = vector.broadcast %cst_61 : f32 to vector<16x1xf32>
    %234 = arith.divf %232, %233 : vector<16x1xf32>
    %235 = vector.broadcast %227 : vector<16x1xf32> to vector<16x256xf32>
    %236 = arith.subf %223, %235 : vector<16x256xf32>
    %cst_62 = arith.constant 9.99999974E-6 : f32
    %237 = vector.broadcast %cst_62 : f32 to vector<16x1xf32>
    %238 = arith.addf %234, %237 : vector<16x1xf32>
    %239 = math.rsqrt %238 : vector<16x1xf32>
    %240 = vector.broadcast %239 : vector<16x1xf32> to vector<16x256xf32>
    %241 = arith.mulf %236, %240 : vector<16x256xf32>
    %242 = vector.broadcast %221 : vector<1x256xf32> to vector<16x256xf32>
    %243 = arith.mulf %241, %242 : vector<16x256xf32>
    %244 = vector.broadcast %222 : vector<1x256xf32> to vector<16x256xf32>
    %245 = arith.addf %243, %244 : vector<16x256xf32>
    %c0_i32_63 = arith.constant 0 : i32
    %246 = tpu.memref_slice %arg16[%c0_i32_63] : memref<2x!tpu.dma_semaphore, #tpu.memory_space<semaphore_mem>> -> memref<1x!tpu.dma_semaphore, #tpu.memory_space<semaphore_mem>>
    %247 = tpu.memref_squeeze %246 : memref<1x!tpu.dma_semaphore, #tpu.memory_space<semaphore_mem>> -> memref<!tpu.dma_semaphore, #tpu.memory_space<semaphore_mem>>
    tpu.wait_dma2 semaphore(%247 : memref<!tpu.dma_semaphore, #tpu.memory_space<semaphore_mem>>) src(%arg10 : memref<256x1024xbf16, #tpu.memory_space<any>>) dst(%arg14 : memref<256x1024xbf16, #tpu.memory_space<vmem>>)
    %248 = arith.truncf %245 : vector<16x256xf32> to vector<16x256xbf16>
    %c0_64 = arith.constant 0 : index
    %c0_65 = arith.constant 0 : index
    %249 = vector.load %arg14[%c0_64, %c0_65] : memref<256x1024xbf16, #tpu.memory_space<vmem>>, vector<256x1024xbf16>
    %cst_66 = arith.constant dense<0.000000e+00> : vector<16x1024xf32>
    %250 = tpu.matmul %248, %249, %cst_66 {dimension_numbers = #tpu.dot_dimension_numbers<[1], [0], [0], [1], [0, 0, 1, 1], [], []>} : vector<16x256xbf16>, vector<256x1024xbf16>, vector<16x1024xf32> -> vector<16x1024xf32>
    %c0_67 = arith.constant 0 : index
    %c0_68 = arith.constant 0 : index
    %251 = vector.load %arg8[%c0_67, %c0_68] : memref<1x1024xf32, #tpu.memory_space<vmem>>, vector<1x1024xf32>
    %252 = vector.broadcast %251 : vector<1x1024xf32> to vector<16x1024xf32>
    %253 = arith.addf %250, %252 : vector<16x1024xf32>
    %cst_69 = arith.constant 0.000000e+00 : f32
    %254 = vector.broadcast %cst_69 : f32 to vector<16x1024xf32>
    %255 = arith.maximumf %253, %254 : vector<16x1024xf32>
    %c1_i32_70 = arith.constant 1 : i32
    %256 = tpu.memref_slice %arg16[%c1_i32_70] : memref<2x!tpu.dma_semaphore, #tpu.memory_space<semaphore_mem>> -> memref<1x!tpu.dma_semaphore, #tpu.memory_space<semaphore_mem>>
    %257 = tpu.memref_squeeze %256 : memref<1x!tpu.dma_semaphore, #tpu.memory_space<semaphore_mem>> -> memref<!tpu.dma_semaphore, #tpu.memory_space<semaphore_mem>>
    tpu.wait_dma2 semaphore(%257 : memref<!tpu.dma_semaphore, #tpu.memory_space<semaphore_mem>>) src(%arg11 : memref<1024x256xbf16, #tpu.memory_space<any>>) dst(%arg15 : memref<1024x256xbf16, #tpu.memory_space<vmem>>)
    %258 = arith.truncf %255 : vector<16x1024xf32> to vector<16x1024xbf16>
    %c0_71 = arith.constant 0 : index
    %c0_72 = arith.constant 0 : index
    %259 = vector.load %arg15[%c0_71, %c0_72] : memref<1024x256xbf16, #tpu.memory_space<vmem>>, vector<1024x256xbf16>
    %cst_73 = arith.constant dense<0.000000e+00> : vector<16x256xf32>
    %260 = tpu.matmul %258, %259, %cst_73 {dimension_numbers = #tpu.dot_dimension_numbers<[1], [0], [0], [1], [0, 0, 1, 1], [], []>} : vector<16x1024xbf16>, vector<1024x256xbf16>, vector<16x256xf32> -> vector<16x256xf32>
    %c0_74 = arith.constant 0 : index
    %c0_75 = arith.constant 0 : index
    %261 = vector.load %arg9[%c0_74, %c0_75] : memref<1x256xf32, #tpu.memory_space<vmem>>, vector<1x256xf32>
    %262 = vector.broadcast %261 : vector<1x256xf32> to vector<16x256xf32>
    %263 = arith.addf %260, %262 : vector<16x256xf32>
    %264 = arith.addf %263, %245 : vector<16x256xf32>
    %cst_76 = arith.constant dense<0.000000e+00> : vector<16xf32>
    %265 = vector.multi_reduction <add>, %264, %cst_76 [1] : vector<16x256xf32> to vector<16xf32>
    %266 = vector.shape_cast %265 : vector<16xf32> to vector<16x1xf32>
    %cst_77 = arith.constant 2.560000e+02 : f32
    %267 = vector.broadcast %cst_77 : f32 to vector<16x1xf32>
    %268 = arith.divf %266, %267 : vector<16x1xf32>
    %269 = vector.broadcast %268 : vector<16x1xf32> to vector<16x256xf32>
    %270 = arith.subf %264, %269 : vector<16x256xf32>
    %271 = arith.mulf %270, %270 : vector<16x256xf32>
    %cst_78 = arith.constant dense<0.000000e+00> : vector<16xf32>
    %272 = vector.multi_reduction <add>, %271, %cst_78 [1] : vector<16x256xf32> to vector<16xf32>
    %273 = vector.shape_cast %272 : vector<16xf32> to vector<16x1xf32>
    %cst_79 = arith.constant 2.560000e+02 : f32
    %274 = vector.broadcast %cst_79 : f32 to vector<16x1xf32>
    %275 = arith.divf %273, %274 : vector<16x1xf32>
    %276 = vector.broadcast %268 : vector<16x1xf32> to vector<16x256xf32>
    %277 = arith.subf %264, %276 : vector<16x256xf32>
    %cst_80 = arith.constant 9.99999974E-6 : f32
    %278 = vector.broadcast %cst_80 : f32 to vector<16x1xf32>
    %279 = arith.addf %275, %278 : vector<16x1xf32>
    %280 = math.rsqrt %279 : vector<16x1xf32>
    %281 = vector.broadcast %280 : vector<16x1xf32> to vector<16x256xf32>
    %282 = arith.mulf %277, %281 : vector<16x256xf32>
    %283 = vector.broadcast %221 : vector<1x256xf32> to vector<16x256xf32>
    %284 = arith.mulf %282, %283 : vector<16x256xf32>
    %285 = vector.broadcast %222 : vector<1x256xf32> to vector<16x256xf32>
    %286 = arith.addf %284, %285 : vector<16x256xf32>
    %c0_81 = arith.constant 0 : index
    %c0_82 = arith.constant 0 : index
    %287 = vector.load %arg12[%c0_81, %c0_82] : memref<16x256xf32, #tpu.memory_space<vmem>>, vector<16x256xf32>
    tpu.vector_store %arg12[%c0_81, %c0_82], %286 {strides = array<i32>} : memref<16x256xf32, #tpu.memory_space<vmem>>, vector<16x256xf32>,
    return
  }
  func.func @transform_0(%arg0: i32) -> (i32, i32) {
    %c0_i32 = arith.constant 0 : i32
    %c0_i32_0 = arith.constant 0 : i32
    %c0_i32_1 = arith.constant 0 : i32
    return %c0_i32, %c0_i32_0 : i32, i32
  }
  func.func @transform_1(%arg0: i32) -> (i32, i32) {
    %c0_i32 = arith.constant 0 : i32
    %c0_i32_0 = arith.constant 0 : i32
    %c0_i32_1 = arith.constant 0 : i32
    return %c0_i32, %c0_i32_0 : i32, i32
  }
  func.func @transform_2(%arg0: i32) -> (i32, i32) {
    %c0_i32 = arith.constant 0 : i32
    %c0_i32_0 = arith.constant 0 : i32
    %c0_i32_1 = arith.constant 0 : i32
    return %c0_i32, %c0_i32_0 : i32, i32
  }
  func.func @transform_3(%arg0: i32) -> (i32, i32) {
    %c0_i32 = arith.constant 0 : i32
    %c0_i32_0 = arith.constant 0 : i32
    %c0_i32_1 = arith.constant 0 : i32
    return %c0_i32, %c0_i32_0 : i32, i32
  }
  func.func @transform_4(%arg0: i32) -> (i32, i32) {
    %c0_i32 = arith.constant 0 : i32
    %c0_i32_0 = arith.constant 0 : i32
    %c0_i32_1 = arith.constant 0 : i32
    return %c0_i32, %c0_i32_0 : i32, i32
  }
  func.func @transform_5(%arg0: i32) -> (i32, i32) {
    %c0_i32 = arith.constant 0 : i32
    %c0_i32_0 = arith.constant 0 : i32
    %c0_i32_1 = arith.constant 0 : i32
    return %c0_i32, %c0_i32_0 : i32, i32
  }
  func.func @transform_6(%arg0: i32) -> (i32, i32) {
    %c0_i32 = arith.constant 0 : i32
    %c0_i32_0 = arith.constant 0 : i32
    %c0_i32_1 = arith.constant 0 : i32
    return %c0_i32, %c0_i32_0 : i32, i32
  }
  func.func @transform_7(%arg0: i32) -> (i32, i32) {
    %c0_i32 = arith.constant 0 : i32
    %c0_i32_0 = arith.constant 0 : i32
    %c0_i32_1 = arith.constant 0 : i32
    return %c0_i32, %c0_i32_0 : i32, i32
  }
  func.func @transform_8(%arg0: i32) -> (i32, i32) {
    %c0_i32 = arith.constant 0 : i32
    %c0_i32_0 = arith.constant 0 : i32
    %c0_i32_1 = arith.constant 0 : i32
    return %c0_i32, %c0_i32_0 : i32, i32
  }
  func.func @transform_11(%arg0: i32) -> (i32, i32) {
    %c0_i32 = arith.constant 0 : i32
    %c0_i32_0 = arith.constant 0 : i32
    %c0_i32_1 = arith.constant 0 : i32
    return %c0_i32, %c0_i32_0 : i32, i32
  }
  func.func @transform_12(%arg0: i32) -> (i32, i32) {
    %c0_i32 = arith.constant 0 : i32
    %c0_i32_0 = arith.constant 0 : i32
    %c0_i32_1 = arith.constant 0 : i32
    return %c0_i32, %c0_i32_0 : i32, i32
  }
}

</mosaic_0001>

<bundles_post_ra>
// kernel: self_att_forward.1
= control target key start
LH: loop header
LB: loop body
LE: loop exit
PB: predicated region body
PF: predicated region fallthrough
CT: control target
= control target key end

     0   :  { %18 = vsyncpa [#allocation6], 0  ;;  %s5536_s0 = inlined_call_operand.vmem [shape: f32[16,256], index: 0, kind: input, shape index: {}]   ;;  %s5537_s1 = inlined_call_operand.hbm [shape: bf16[256,768], index: 1, kind: input, shape index: {}]   ;;  %s5538_s2 = inlined_call_operand.vmem [shape: f32[1,768], index: 2, kind: input, shape index: {}]   ;;  %s5539_s3 = inlined_call_operand.hbm [shape: bf16[256,256], index: 3, kind: input, shape index: {}]   ;;  %s5540_s4 = inlined_call_operand.vmem [shape: f32[1,256], index: 4, kind: input, shape index: {}]   ;;  %s5541_s5 = inlined_call_operand.vmem [shape: f32[1,256], index: 5, kind: input, shape index: {}]   ;;  %s5542_s6 = inlined_call_operand.vmem [shape: f32[1,256], index: 6, kind: input, shape index: {}]   ;;  %s5543_s7 = inlined_call_operand.vmem [shape: f32[1,1024], index: 7, kind: input, shape index: {}]   ;;  %s5544_s8 = inlined_call_operand.vmem [shape: f32[1,256], index: 8, kind: input, shape index: {}]   ;;  %s5545_s9 = inlined_call_operand.hbm [shape: bf16[256,1024], index: 9, kind: input, shape index: {}]   ;;  %s5546_s10 = inlined_call_operand.hbm [shape: bf16[1024,256], index: 10, kind: input, shape index: {}]   ;;  %s5547_s11 = inlined_call_operand.vmem [shape: f32[16,256], index: 11, kind: output, shape index: {0}]   ;;  %s5548_s12 = inlined_call_operand.vmem [shape: f32[2,8], index: 12, kind: output, shape index: {1}]  }
   0x1   :  { %19 = vsyncpa [#allocation8], 0  ;;  %s4735_s21 = smov [#allocation5]   ;;  %s4683_s25 = scalar_lea.hbm %s5537_s1, 12288 }
   0x2   :  { %s27_s22 = sshll.u32 %s4735_s21, 4  ;;  %p4684_p0 = scmp.ne.s32.totalorder %s5537_s1, %s4683_s25  ;;  %s28_s22 = int_to_ptr.vmem [resolvable:$true] %s27_s22 }
   0x3   :  { %p4687_p1 = scmp.lt.u32.totalorder %s4683_s25, %s5537_s1 }
   0x5   :  { %p4689_p2 = pnand %p4687_p1, %p4684_p0 }
   0x7   :  { %4692 = shalt.err (!%p4689_p2)
}
   0x8   :  { %s4693_s30 = scalar_lea.vmem %s28_s22, 12288  ;;  %p4698_p4 = scmp.lt.s32.totalorder %s28_s22, %s28_s22 }
   0x9   :  { %p4694_p3 = scmp.ne.s32.totalorder %s28_s22, %s4693_s30  ;;  %p4699_p5 = scmp.lt.s32.totalorder %s4693_s30, %s4693_s30 }
   0xb   :  { %p4700_p6 = por %p4699_p5, %p4698_p4 }
   0xd   :  { %p4701_p7 = pnand %p4700_p6, %p4694_p3 }
   0xf   :  { %4704 = shalt.err (!%p4701_p7)
}
  0x10   :  { %s4736_s13 = smov 384   ;;  %s4737_s14 = smov 24  }
  0x11   :  { %33 = dma.hbm_to_vmem [thread:$0]  %s5537_s1, 12288, %s28_s22, [#allocation6], %s4736_s13, %s4736_s13, %s4737_s14  }
  0x12   :  { %s4738_s17 = smov [#allocation7]   ;;  %s4705_s21 = scalar_lea.hbm %s5539_s3, 4096 }
  0x13   :  { %s41_s18 = sshll.u32 %s4738_s17, 4  ;;  %p4706_p8 = scmp.ne.s32.totalorder %s5539_s3, %s4705_s21  ;;  %s42_s18 = int_to_ptr.vmem [resolvable:$true] %s41_s18 }
  0x14   :  { %p4709_p9 = scmp.lt.u32.totalorder %s4705_s21, %s5539_s3 }
  0x16   :  { %p4711_p10 = pnand %p4709_p9, %p4706_p8 }
  0x18   :  { %4714 = shalt.err (!%p4711_p10)
}
  0x19   :  { %s4715_s27 = scalar_lea.vmem %s42_s18, 4096  ;;  %p4720_p12 = scmp.lt.s32.totalorder %s42_s18, %s42_s18 }
  0x1a   :  { %p4716_p11 = scmp.ne.s32.totalorder %s42_s18, %s4715_s27  ;;  %p4721_p13 = scmp.lt.s32.totalorder %s4715_s27, %s4715_s27 }
  0x1c   :  { %p4722_p0 = por %p4721_p13, %p4720_p12 }
  0x1e   :  { %p4723_p1 = pnand %p4722_p0, %p4716_p11 }
  0x20   :  { %4726 = shalt.err (!%p4723_p1)
}
  0x21   :  { %s4739_s1 = smov 128   ;;  %s4740_s22 = smov 8  }
  0x22   :  { %47 = dma.hbm_to_vmem [thread:$0]  %s5539_s3, 4096, %s42_s18, [#allocation8], %s4739_s1, %s4739_s1, %s4740_s22  }
  0x23   :  { %4727 = dma.done.wait [#allocation6], 12288  }
  0x24   :  { %4728 = vsyncadd [#allocation6], 4294955008 }
  0x25   :  { %4729 = dma.done.wait [#allocation8], 4096  }
  0x26   :  { %4730 = vsyncadd [#allocation8], 4294963200  ;;  %s69_s30 = sld [smem:[#allocation0]]   ;;  %s4741_s13 = smov 1024   ;;  %vm4754_vm0 = vmmov 0   ;;  %vm884_vm1 = vcmask 261120  }
  0x27   :  { %81 = sst [smem:[#allocation10]] %s4741_s13  ;;  %s4742_s14 = smov 64   ;;  %vm1021_vm2 = vcmask 1043456   ;;  %vm977_vm3 = vcmask 64512   ;;  %vm2789_vm4 = vcmask 1041409   ;;  %vm2792_vm5 = vcmask 58368  }
  0x28   :  { %83 = sst [smem:[#allocation10 + $0x1]] %s4741_s13  ;;  %s4743_s15 = smov [#allocation2]   ;;  %vm2849_vm6 = vcmask 523264   ;;  %vm2852_vm7 = vcmask 785408  }
  0x29   :  { %85 = sst [smem:[#allocation10 + $0x2]] %s4740_s22  ;;  %s77_s16 = sshll.u32 %s4743_s15, 4  ;;  %s78_s16 = int_to_ptr.vmem [resolvable:$true] %s77_s16 }
  0x2a   :  { %87 = sst [smem:[#allocation10 + $0x3]] %s4742_s14  ;;  %s4744_s17 = smov 512  }
  0x2b   :  { %89 = sst [smem:[#allocation10 + $0x4]] %s4739_s1  ;;  %s4745_s19 = smov 2  }
  0x2c   :  { %93 = sst [smem:[#allocation10 + $0x6]] %s4744_s17  ;;  %s3939_s3 = sshll.u32 %s69_s30, 26 }
  0x2d   :  { %95 = sst [smem:[#allocation10 + $0x7]] %s4742_s14  ;;  %s3940_s18 = sadd.s32 134217728, %s3939_s3 }
  0x2e   :  { %91 = sst [smem:[#allocation10 + $0x5]] %s4745_s19  ;;  %s4746_s20 = smov 4  }
  0x2f   :  { %97 = sst [smem:[#allocation10 + $0x8]] %s4746_s20  ;;  %s4747_s21 = smov [#allocation4]  }
  0x30   :  { %s4748_s23 = smov [#allocation9]   ;;  %s4749_s26 = smov 256  }
  0x31   :  { %99 = dma.general %s5545_s9, 16384, %s78_s16, %s4747_s21, %s4748_s23, [#allocation10], %s3940_s18, 0  }
  0x32   :  { %120 = sst [smem:[#allocation12 + $0x2]] %s4745_s19  ;;  %s4750_s27 = smov [#allocation3]  }
  0x33   :  { %116 = sst [smem:[#allocation12]] %s4749_s26  ;;  %s112_s22 = sshll.u32 %s4750_s27, 4  ;;  %s113_s22 = int_to_ptr.vmem [resolvable:$true] %s112_s22 }
  0x34   :  { %118 = sst [smem:[#allocation12 + $0x1]] %s4749_s26  ;;  %s4751_s28 = smov [#allocation4 + $0x1]  }
  0x35   :  { %122 = sst [smem:[#allocation12 + $0x3]] %s4742_s14  ;;  %s4752_s29 = smov [#allocation11]  }
  0x36   :  { %124 = sst [smem:[#allocation12 + $0x4]] %s4739_s1  ;;  %s4756_s21 = smov 32  }
  0x37   :  { %126 = sst [smem:[#allocation12 + $0x5]] %s4745_s19 }
  0x38   :  { %128 = sst [smem:[#allocation12 + $0x6]] %s4739_s1 }
  0x39   :  { %130 = sst [smem:[#allocation12 + $0x7]] %s4742_s14 }
  0x3a   :  { %132 = sst [smem:[#allocation12 + $0x8]] %s4746_s20 }
  0x3b   :  { %134 = dma.general %s5546_s10, 16384, %s113_s22, %s4751_s28, %s4752_s29, [#allocation12], %s3940_s18, 0  }
  0x3c   :  { %v4415_v0 = vld [vmem:[#allocation5 + $0x4] ss:$24 sps:$4 sm:$0xff]   ;;  %v4417_v1 = vld [vmem:[#allocation5] ss:$24 sps:$4 sm:$0xff]   ;;  %v4418_v2 = vld [vmem:[#allocation5 + $0x34] ss:$24 sps:$4 sm:$0xff]  }
  0x3d   :  { %749 = vmatprep.subr.bf16.mxu0 %v4415_v0  ;;  %v4420_v3 = vld [vmem:[#allocation5 + $0x30] ss:$24 sps:$4 sm:$0xff]   ;;  %v4421_v4 = vld [vmem:[#allocation5 + $0x64] ss:$24 sps:$4 sm:$0xff]   ;;  %v4423_v5 = vld [vmem:[#allocation5 + $0x60] ss:$24 sps:$4 sm:$0xff]  }
  0x3e   :  { %750 = vmatpush1.bf16.msra.mxu0 %v4417_v1  ;;  %v4424_v6 = vld [vmem:[#allocation5 + $0x94] ss:$24 sps:$4 sm:$0xff]   ;;  %v4426_v7 = vld [vmem:[#allocation5 + $0x90] ss:$24 sps:$4 sm:$0xff]   ;;  %v4427_v8 = vld [vmem:[#allocation5 + $0xc4] ss:$24 sps:$4 sm:$0xff]  }
  0x3f   :  { %751 = vmatprep.subr.bf16.mxu0 %v4418_v2  ;;  %v4429_v9 = vld [vmem:[#allocation5 + $0xc0] ss:$24 sps:$4 sm:$0xff]   ;;  %v4430_v10 = vld [vmem:[#allocation5 + $0xf4] ss:$24 sps:$4 sm:$0xff]   ;;  %v4432_v11 = vld [vmem:[#allocation5 + $0xf0] ss:$24 sps:$4 sm:$0xff]  }
  0x40   :  { %v4433_v12 = vld [vmem:[#allocation5 + $0x124] ss:$24 sps:$4 sm:$0xff]   ;;  %v136_v13 = vld [vmem:[%s5536_s0 + $0x8] sm:$0xff]  ;;  %v4435_v16 = vld [vmem:[#allocation5 + $0x120] ss:$24 sps:$4 sm:$0xff]  }
  0x41   :  { %v138_v14 = vld [vmem:[%s5536_s0 + $0x18] sm:$0xff]  ;;  %v4436_v17 = vld [vmem:[#allocation5 + $0x154] ss:$24 sps:$4 sm:$0xff]   ;;  %v4438_v18 = vld [vmem:[#allocation5 + $0x150] ss:$24 sps:$4 sm:$0xff]  }
  0x42   :  { %752 = vmatpush1.bf16.msra.mxu0 %v4420_v3  ;;  %v4867_v15 = vpack.c.bf16 %v138_v14, %v136_v13  ;;  %v4439_v19 = vld [vmem:[#allocation5 + $0x184] ss:$24 sps:$4 sm:$0xff]   ;;  %v4441_v20 = vld [vmem:[#allocation5 + $0x180] ss:$24 sps:$4 sm:$0xff]   ;;  %v4442_v21 = vld [vmem:[#allocation5 + $0x1b4] ss:$24 sps:$4 sm:$0xff]  }
  0x43   :  { %753 = vmatprep.subr.bf16.mxu0 %v4421_v4  ;;  %v4444_v22 = vld [vmem:[#allocation5 + $0x1b0] ss:$24 sps:$4 sm:$0xff]   ;;  %v4445_v23 = vld [vmem:[#allocation5 + $0x1e4] ss:$24 sps:$4 sm:$0xff]   ;;  %v4447_v24 = vld [vmem:[#allocation5 + $0x1e0] ss:$24 sps:$4 sm:$0xff]  }
  0x44   :  { %781 = vmatprep.mubr.bf16.mxu0 %v4867_v15  ;;  %v4448_v25 = vld [vmem:[#allocation5 + $0x214] ss:$24 sps:$4 sm:$0xff]   ;;  %v4450_v26 = vld [vmem:[#allocation5 + $0x210] ss:$24 sps:$4 sm:$0xff]   ;;  %v4451_v27 = vld [vmem:[#allocation5 + $0x244] ss:$24 sps:$4 sm:$0xff]  }
  0x45   :  { %v4453_v28 = vld [vmem:[#allocation5 + $0x240] ss:$24 sps:$4 sm:$0xff]   ;;  %v4454_v29 = vld [vmem:[#allocation5 + $0x274] ss:$24 sps:$4 sm:$0xff]   ;;  %v4456_v30 = vld [vmem:[#allocation5 + $0x270] ss:$24 sps:$4 sm:$0xff]  }
  0x46   :  { %754 = vmatpush1.bf16.msra.mxu0 %v4423_v5  ;;  %v4457_v31 = vld [vmem:[#allocation5 + $0x2a4] ss:$24 sps:$4 sm:$0xff]   ;;  %v4459_v32 = vld [vmem:[#allocation5 + $0x2a0] ss:$24 sps:$4 sm:$0xff]   ;;  %v4460_v33 = vld [vmem:[#allocation5 + $0x2d4] ss:$24 sps:$4 sm:$0xff]  }
  0x47   :  { %755 = vmatprep.subr.bf16.mxu0 %v4424_v6  ;;  %v4462_v34 = vld [vmem:[#allocation5 + $0x2d0] ss:$24 sps:$4 sm:$0xff]   ;;  %v135_v35 = vld [vmem:[%s5536_s0] sm:$0xff]  ;;  %v4468_v40 = vld [vmem:[#allocation5 + $0x3c] ss:$24 sps:$4 sm:$0xff]  }
  0x48   :  { %v137_v36 = vld [vmem:[%s5536_s0 + $0x10] sm:$0xff]  ;;  %v4465_v37 = vld [vmem:[#allocation5 + $0xc] ss:$24 sps:$4 sm:$0xff]   ;;  %v4463_v38 = vld [vmem:[#allocation5 + $0x8] ss:$24 sps:$4 sm:$0xff]  }
  0x49   :  { %v4876_v39 = vpack.c.bf16 %v137_v36, %v135_v35  ;;  %v4466_v41 = vld [vmem:[#allocation5 + $0x38] ss:$24 sps:$4 sm:$0xff]   ;;  %v4471_v42 = vld [vmem:[#allocation5 + $0x6c] ss:$24 sps:$4 sm:$0xff]   ;;  %v4469_v43 = vld [vmem:[#allocation5 + $0x68] ss:$24 sps:$4 sm:$0xff]  }
  0x4a   :  { %756 = vmatpush1.bf16.msra.mxu0 %v4426_v7  ;;  %v4474_v44 = vld [vmem:[#allocation5 + $0x9c] ss:$24 sps:$4 sm:$0xff]   ;;  %v4472_v45 = vld [vmem:[#allocation5 + $0x98] ss:$24 sps:$4 sm:$0xff]   ;;  %v4477_v46 = vld [vmem:[#allocation5 + $0xcc] ss:$24 sps:$4 sm:$0xff]  }
  0x4b   :  { %757 = vmatprep.subr.bf16.mxu0 %v4427_v8  ;;  %v4475_v47 = vld [vmem:[#allocation5 + $0xc8] ss:$24 sps:$4 sm:$0xff]   ;;  %v4480_v48 = vld [vmem:[#allocation5 + $0xfc] ss:$24 sps:$4 sm:$0xff]   ;;  %v4478_v49 = vld [vmem:[#allocation5 + $0xf8] ss:$24 sps:$4 sm:$0xff]  }
  0x4c   :  { %v4483_v50 = vld [vmem:[#allocation5 + $0x12c] ss:$24 sps:$4 sm:$0xff]   ;;  %v4481_v51 = vld [vmem:[#allocation5 + $0x128] ss:$24 sps:$4 sm:$0xff]   ;;  %v4486_v52 = vld [vmem:[#allocation5 + $0x15c] ss:$24 sps:$4 sm:$0xff]  }
  0x4d   :  { %v4484_v53 = vld [vmem:[#allocation5 + $0x158] ss:$24 sps:$4 sm:$0xff]   ;;  %v4489_v54 = vld [vmem:[#allocation5 + $0x18c] ss:$24 sps:$4 sm:$0xff]   ;;  %v4487_v55 = vld [vmem:[#allocation5 + $0x188] ss:$24 sps:$4 sm:$0xff]  }
  0x4e   :  { %758 = vmatpush1.bf16.msra.mxu0 %v4429_v9  ;;  %v4492_v56 = vld [vmem:[#allocation5 + $0x1bc] ss:$24 sps:$4 sm:$0xff]   ;;  %v4490_v57 = vld [vmem:[#allocation5 + $0x1b8] ss:$24 sps:$4 sm:$0xff]   ;;  %v4495_v58 = vld [vmem:[#allocation5 + $0x1ec] ss:$24 sps:$4 sm:$0xff]  }
  0x4f   :  { %759 = vmatprep.subr.bf16.mxu0 %v4430_v10  ;;  %v4493_v59 = vld [vmem:[#allocation5 + $0x1e8] ss:$24 sps:$4 sm:$0xff]   ;;  %v4498_v60 = vld [vmem:[#allocation5 + $0x21c] ss:$24 sps:$4 sm:$0xff]   ;;  %v4496_v61 = vld [vmem:[#allocation5 + $0x218] ss:$24 sps:$4 sm:$0xff]  }
  0x50   :  { %v4501_v62 = vld [vmem:[#allocation5 + $0x24c] ss:$24 sps:$4 sm:$0xff]   ;;  %v4499_v63 = vld [vmem:[#allocation5 + $0x248] ss:$24 sps:$4 sm:$0xff]   ;;  %v4504_v0 = vld [vmem:[#allocation5 + $0x27c] ss:$24 sps:$4 sm:$0xff]  }
  0x51   :  { %v4502_v1 = vld [vmem:[#allocation5 + $0x278] ss:$24 sps:$4 sm:$0xff]   ;;  %v4507_v2 = vld [vmem:[#allocation5 + $0x2ac] ss:$24 sps:$4 sm:$0xff]   ;;  %v4505_v3 = vld [vmem:[#allocation5 + $0x2a8] ss:$24 sps:$4 sm:$0xff]  }
  0x52   :  { %760 = vmatpush1.bf16.msra.mxu0 %v4432_v11  ;;  %v4510_v4 = vld [vmem:[#allocation5 + $0x2dc] ss:$24 sps:$4 sm:$0xff]   ;;  %v4508_v5 = vld [vmem:[#allocation5 + $0x2d8] ss:$24 sps:$4 sm:$0xff]  }
  0x53   :  { %761 = vmatprep.subr.bf16.mxu0 %v4433_v12  ;;  %v4513_v6 = vld [vmem:[#allocation5 + $0x14] ss:$24 sps:$4 sm:$0xff]   ;;  %v4511_v7 = vld [vmem:[#allocation5 + $0x10] ss:$24 sps:$4 sm:$0xff]   ;;  %v4516_v8 = vld [vmem:[#allocation5 + $0x44] ss:$24 sps:$4 sm:$0xff]  }
  0x54   :  { %v4514_v9 = vld [vmem:[#allocation5 + $0x40] ss:$24 sps:$4 sm:$0xff]   ;;  %v4517_v10 = vld [vmem:[#allocation5 + $0x70] ss:$24 sps:$4 sm:$0xff]   ;;  %v4519_v11 = vld [vmem:[#allocation5 + $0x74] ss:$24 sps:$4 sm:$0xff]  }
  0x55   :  { %v4522_v12 = vld [vmem:[#allocation5 + $0xa4] ss:$24 sps:$4 sm:$0xff]   ;;  %v4520_v13 = vld [vmem:[#allocation5 + $0xa0] ss:$24 sps:$4 sm:$0xff]   ;;  %v4525_v14 = vld [vmem:[#allocation5 + $0xd4] ss:$24 sps:$4 sm:$0xff]  }
  0x56   :  { %762 = vmatpush1.bf16.msra.mxu0 %v4435_v16  ;;  %v4523_v16 = vld [vmem:[#allocation5 + $0xd0] ss:$24 sps:$4 sm:$0xff]   ;;  %v4558_v36 = vld [vmem:[#allocation5 + $0x2e4] ss:$24 sps:$4 sm:$0xff]  }
  0x57   :  { %763 = vmatprep.subr.bf16.mxu0 %v4436_v17  ;;  %v4526_v17 = vld [vmem:[#allocation5 + $0x100] ss:$24 sps:$4 sm:$0xff]   ;;  %v4553_v35 = vld [vmem:[#allocation5 + $0x2b0] ss:$24 sps:$4 sm:$0xff]  }
  0x5a   :  { %764 = vmatpush1.bf16.msra.mxu0 %v4438_v18  ;;  %v4531_v18 = vld [vmem:[#allocation5 + $0x134] ss:$24 sps:$4 sm:$0xff]  }
  0x5b   :  { %765 = vmatprep.subr.bf16.mxu0 %v4439_v19  ;;  %v4529_v19 = vld [vmem:[#allocation5 + $0x130] ss:$24 sps:$4 sm:$0xff]  }
  0x5e   :  { %766 = vmatpush1.bf16.msra.mxu0 %v4441_v20  ;;  %v4534_v20 = vld [vmem:[#allocation5 + $0x164] ss:$24 sps:$4 sm:$0xff]  }
  0x5f   :  { %767 = vmatprep.subr.bf16.mxu0 %v4442_v21  ;;  %v4532_v21 = vld [vmem:[#allocation5 + $0x160] ss:$24 sps:$4 sm:$0xff]  }
  0x62   :  { %768 = vmatpush1.bf16.msra.mxu0 %v4444_v22  ;;  %v4537_v22 = vld [vmem:[#allocation5 + $0x194] ss:$24 sps:$4 sm:$0xff]  }
  0x63   :  { %769 = vmatprep.subr.bf16.mxu0 %v4445_v23  ;;  %v4535_v23 = vld [vmem:[#allocation5 + $0x190] ss:$24 sps:$4 sm:$0xff]  }
  0x66   :  { %770 = vmatpush1.bf16.msra.mxu0 %v4447_v24  ;;  %v4540_v24 = vld [vmem:[#allocation5 + $0x1c4] ss:$24 sps:$4 sm:$0xff]  }
  0x67   :  { %771 = vmatprep.subr.bf16.mxu0 %v4448_v25  ;;  %v4538_v25 = vld [vmem:[#allocation5 + $0x1c0] ss:$24 sps:$4 sm:$0xff]  }
  0x6a   :  { %772 = vmatpush1.bf16.msra.mxu0 %v4450_v26  ;;  %v4543_v26 = vld [vmem:[#allocation5 + $0x1f4] ss:$24 sps:$4 sm:$0xff]  }
  0x6b   :  { %773 = vmatprep.subr.bf16.mxu0 %v4451_v27  ;;  %v4541_v27 = vld [vmem:[#allocation5 + $0x1f0] ss:$24 sps:$4 sm:$0xff]  }
  0x6e   :  { %774 = vmatpush1.bf16.msra.mxu0 %v4453_v28  ;;  %v4546_v28 = vld [vmem:[#allocation5 + $0x224] ss:$24 sps:$4 sm:$0xff]  }
  0x6f   :  { %775 = vmatprep.subr.bf16.mxu0 %v4454_v29  ;;  %v4544_v29 = vld [vmem:[#allocation5 + $0x220] ss:$24 sps:$4 sm:$0xff]  }
  0x72   :  { %776 = vmatpush1.bf16.msra.mxu0 %v4456_v30  ;;  %v4549_v30 = vld [vmem:[#allocation5 + $0x254] ss:$24 sps:$4 sm:$0xff]  }
  0x73   :  { %777 = vmatprep.subr.bf16.mxu0 %v4457_v31  ;;  %v4547_v31 = vld [vmem:[#allocation5 + $0x250] ss:$24 sps:$4 sm:$0xff]  }
  0x76   :  { %778 = vmatpush1.bf16.msra.mxu0 %v4459_v32  ;;  %v4552_v32 = vld [vmem:[#allocation5 + $0x284] ss:$24 sps:$4 sm:$0xff]  }
  0x77   :  { %779 = vmatprep.subr.bf16.mxu0 %v4460_v33  ;;  %v4550_v33 = vld [vmem:[#allocation5 + $0x280] ss:$24 sps:$4 sm:$0xff]  }
  0x7a   :  { %780 = vmatpush1.bf16.msra.mxu0 %v4462_v34  ;;  %v4555_v34 = vld [vmem:[#allocation5 + $0x2b4] ss:$24 sps:$4 sm:$0xff]  }
  0x7b   :  { %792 = vmatprep.subr.bf16.mxu0 %v4465_v37  ;;  %v4556_v37 = vld [vmem:[#allocation5 + $0x2e0] ss:$24 sps:$4 sm:$0xff]  }
  0x7d   :  { %782 = vmatmul.mubr.bf16.vlgmr.msra.gmra.mrb[0].mxu0 %v4876_v39 }
  0x7e   :  { %793 = vmatpush1.bf16.msra.mxu0 %v4463_v38  ;;  %824 = vmatprep.mubr.bf16.mxu0 %v4867_v15  ;;  %v4753_v38 = vmov 0.0  }
  0x7f   :  { %794 = vmatprep.subr.bf16.mxu0 %v4468_v40  ;;  %4209 = vmatprep.subr.bf16.mxu1 %v4753_v38 }
  0x80   :  { %4211 = vmatprep.mubr.msk.bf16.mxu1 %vm4754_vm0, %v4753_v38 }
  0x82   :  { %795 = vmatpush1.bf16.msra.mxu0 %v4466_v41 }
  0x83   :  { %796 = vmatprep.subr.bf16.mxu0 %v4471_v42 }
  0x86   :  { %797 = vmatpush1.bf16.msra.mxu0 %v4469_v43 }
  0x87   :  { %798 = vmatprep.subr.bf16.mxu0 %v4474_v44  ;;  %v239_v44 = vlaneseq }
  0x8a   :  { %799 = vmatpush1.bf16.msra.mxu0 %v4472_v45 }
  0x8b   :  { %800 = vmatprep.subr.bf16.mxu0 %v4477_v46 }
  0x8e   :  { %801 = vmatpush1.bf16.msra.mxu0 %v4475_v47  ;;  %v4902_v47 = vld [vmem:[%s5538_s2] sm:$0x3f]  ;;  %s4755_s2 = smov 96  }
  0x8f   :  { %802 = vmatprep.subr.bf16.mxu0 %v4480_v48 }
  0x92   :  { %803 = vmatpush1.bf16.msra.mxu0 %v4478_v49 }
  0x93   :  { %804 = vmatprep.subr.bf16.mxu0 %v4483_v50 }
  0x96   :  { %805 = vmatpush1.bf16.msra.mxu0 %v4481_v51 }
  0x97   :  { %806 = vmatprep.subr.bf16.mxu0 %v4486_v52 }
  0x9a   :  { %807 = vmatpush1.bf16.msra.mxu0 %v4484_v53 }
  0x9b   :  { %808 = vmatprep.subr.bf16.mxu0 %v4489_v54 }
  0x9e   :  { %809 = vmatpush1.bf16.msra.mxu0 %v4487_v55 }
  0x9f   :  { %810 = vmatprep.subr.bf16.mxu0 %v4492_v56 }
  0xa2   :  { %811 = vmatpush1.bf16.msra.mxu0 %v4490_v57 }
  0xa3   :  { %812 = vmatprep.subr.bf16.mxu0 %v4495_v58 }
  0xa6   :  { %813 = vmatpush1.bf16.msra.mxu0 %v4493_v59 }
  0xa7   :  { %814 = vmatprep.subr.bf16.mxu0 %v4498_v60 }
  0xaa   :  { %815 = vmatpush1.bf16.msra.mxu0 %v4496_v61 }
  0xab   :  { %816 = vmatprep.subr.bf16.mxu0 %v4501_v62 }
  0xae   :  { %817 = vmatpush1.bf16.msra.mxu0 %v4499_v63 }
  0xaf   :  { %818 = vmatprep.subr.bf16.mxu0 %v4504_v0 }
  0xb2   :  { %819 = vmatpush1.bf16.msra.mxu0 %v4502_v1 }
  0xb3   :  { %820 = vmatprep.subr.bf16.mxu0 %v4507_v2 }
  0xb6   :  { %821 = vmatpush1.bf16.msra.mxu0 %v4505_v3 }
  0xb7   :  { %822 = vmatprep.subr.bf16.mxu0 %v4510_v4 }
  0xba   :  { %823 = vmatpush1.bf16.msra.mxu0 %v4508_v5 }
  0xbb   :  { %835 = vmatprep.subr.bf16.mxu0 %v4513_v6 }
  0xbd   :  { %825 = vmatmul.mubr.bf16.vlgmr.msra.gmra.mrb[4].mxu0 %v4876_v39 }
  0xbe   :  { %867 = vmatprep.mubr.bf16.mxu0 %v4867_v15  ;;  %836 = vmatpush1.bf16.msra.mxu0 %v4511_v7  ;;  %v4528_v15 = vld [vmem:[#allocation5 + $0x104] ss:$24 sps:$4 sm:$0xff]  }
  0xbf   :  { %837 = vmatprep.subr.bf16.mxu0 %v4516_v8 }
  0xc2   :  { %838 = vmatpush1.bf16.msra.mxu0 %v4514_v9 }
  0xc3   :  { %839 = vmatprep.subr.bf16.mxu0 %v4519_v11 }
  0xc6   :  { %840 = vmatpush1.bf16.msra.mxu0 %v4517_v10 }
  0xc7   :  { %841 = vmatprep.subr.bf16.mxu0 %v4522_v12 }
  0xca   :  { %842 = vmatpush1.bf16.msra.mxu0 %v4520_v13 }
  0xcb   :  { %843 = vmatprep.subr.bf16.mxu0 %v4525_v14 }
  0xce   :  { %844 = vmatpush1.bf16.msra.mxu0 %v4523_v16 }
  0xcf   :  { %845 = vmatprep.subr.bf16.mxu0 %v4528_v15 }
  0xd2   :  { %846 = vmatpush1.bf16.msra.mxu0 %v4526_v17 }
  0xd3   :  { %847 = vmatprep.subr.bf16.mxu0 %v4531_v18 }
  0xd6   :  { %848 = vmatpush1.bf16.msra.mxu0 %v4529_v19 }
  0xd7   :  { %849 = vmatprep.subr.bf16.mxu0 %v4534_v20 }
  0xda   :  { %850 = vmatpush1.bf16.msra.mxu0 %v4532_v21 }
  0xdb   :  { %851 = vmatprep.subr.bf16.mxu0 %v4537_v22 }
  0xde   :  { %852 = vmatpush1.bf16.msra.mxu0 %v4535_v23 }
  0xdf   :  { %853 = vmatprep.subr.bf16.mxu0 %v4540_v24 }
  0xe2   :  { %854 = vmatpush1.bf16.msra.mxu0 %v4538_v25 }
  0xe3   :  { %855 = vmatprep.subr.bf16.mxu0 %v4543_v26 }
  0xe6   :  { %856 = vmatpush1.bf16.msra.mxu0 %v4541_v27 }
  0xe7   :  { %857 = vmatprep.subr.bf16.mxu0 %v4546_v28 }
  0xea   :  { %858 = vmatpush1.bf16.msra.mxu0 %v4544_v29 }
  0xeb   :  { %859 = vmatprep.subr.bf16.mxu0 %v4549_v30 }
  0xee   :  { %860 = vmatpush1.bf16.msra.mxu0 %v4547_v31 }
  0xef   :  { %861 = vmatprep.subr.bf16.mxu0 %v4552_v32 }
  0xf2   :  { %862 = vmatpush1.bf16.msra.mxu0 %v4550_v33 }
  0xf3   :  { %863 = vmatprep.subr.bf16.mxu0 %v4555_v34 }
  0xf6   :  { %864 = vmatpush1.bf16.msra.mxu0 %v4553_v35 }
  0xf7   :  { %865 = vmatprep.subr.bf16.mxu0 %v4558_v36 }
  0xfa   :  { %866 = vmatpush1.bf16.msra.mxu0 %v4556_v37 }
  0xfb   :  { %4185 = vmatprep.subr.bf16.mxu0 %v4753_v38 }
  0xfd   :  { %868 = vmatmul.mubr.bf16.vlgmr.msra.gmra.mrb[8].mxu0 %v4876_v39  ;;  %v4893_v39 = vshrl.u32 %v239_v44, 7 }
  0xfe   :  { %4187 = vmatprep.mubr.msk.bf16.mxu0 %vm4754_vm0, %v4753_v38 }
  0xff   :  { %v249_v45 = vsub.s32 2, %v4893_v39  ;;  %v4897_v46 = vsub.s32 0, %v4893_v39  ;;  %v257_v0 = vsub.s32 4, %v4893_v39 }
 0x101   :  { %v250_v48 = vrot.slane %v4902_v47, %v249_v45  ;;  %v242_v49 = vrot.slane %v4902_v47, %v4897_v46  ;;  %v258_v1 = vrot.slane %v4902_v47, %v257_v0 }
 0x150   :  { %v783_v40 = vpop.f32.mrb[0].mxu0 }
 0x151   :  { %v4889_v41 = vpop.f32.mrb[1].mxu0  ;;  %v784_v54 = vadd.f32 %v783_v40, %v242_v49 }
 0x152   :  { %v787_v42 = vpop.f32.mrb[2].mxu0 }
 0x153   :  { %v4891_v43 = vpop.f32.mrb[3].mxu0  ;;  %v788_v58 = vadd.f32 %v787_v42, %v242_v49  ;;  %v4921_v61 = vpack.c.bf16 %v784_v54, %v784_v54 }
 0x155   :  { %v4926_v62 = vpack.c.bf16 %v788_v58, %v788_v58 }
 0x190   :  { %v826_v50 = vpop.f32.mrb[4].mxu0 }
 0x191   :  { %v827_v51 = vadd.f32 %v826_v50, %v250_v48  ;;  %v4909_v52 = vpop.f32.mrb[5].mxu0 }
 0x192   :  { %v830_v53 = vpop.f32.mrb[6].mxu0 }
 0x193   :  { %v4911_v55 = vpack.c.bf16 %v827_v51, %v827_v51  ;;  %v831_v56 = vadd.f32 %v830_v53, %v250_v48  ;;  %v4913_v57 = vpop.f32.mrb[7].mxu0 }
 0x195   :  { %v4915_v59 = vpack.c.bf16 %v831_v56, %v831_v56  ;;  %1117 = vrot.lane.b32.xlu0 %v4911_v55, %s4755_s2  ;;  %v889_v60 = vsel %vm884_vm1, %v4911_v55, 0 }
 0x196   :  { %4186 = vmatpush3.bf16.xpose.msra.mxu0 %v889_v60 }
 0x197   :  { %1169 = vrot.lane.b32.xlu1 %v4915_v59, %s4755_s2  ;;  %4191 = vmatprep.subr.bf16.mxu0 %v4753_v38  ;;  %v935_v63 = vsel %vm884_vm1, %v4915_v59, 0 }
 0x199   :  { %1114 = vrot.lane.b32.xlu0 %v4921_v61, %s4755_s2 }
 0x19b   :  { %1166 = vrot.lane.b32.xlu1 %v4926_v62, %s4755_s2 }
 0x19d   :  { %4188 = vmatmul.mubr.msk.bf16.vlgmr.msra.gmra.mrb[12].mxu0 %vm884_vm1, %v4921_v61 }
 0x19e   :  { %4192 = vmatpush3.bf16.xpose.msra.mxu0 %v935_v63  ;;  %4193 = vmatprep.mubr.msk.bf16.mxu0 %vm4754_vm0, %v4753_v38 }
 0x19f   :  { %4197 = vmatprep.subr.bf16.mxu0 %v4753_v38 }
 0x1a5   :  { %4194 = vmatmul.mubr.msk.bf16.vlgmr.msra.gmra.mrb[16].mxu0 %vm884_vm1, %v4926_v62 }
 0x1a6   :  { %4199 = vmatprep.mubr.msk.bf16.mxu0 %vm4754_vm0, %v4753_v38 }
 0x1d0   :  { %v869_v2 = vpop.f32.mrb[8].mxu0 }
 0x1d1   :  { %v4947_v3 = vpop.f32.mrb[9].mxu0  ;;  %v870_v7 = vadd.f32 %v869_v2, %v258_v1 }
 0x1d2   :  { %v873_v4 = vpop.f32.mrb[10].mxu0 }
 0x1d3   :  { %v4949_v5 = vadd.f32 %v873_v4, %v258_v1  ;;  %v4951_v6 = vpop.f32.mrb[11].mxu0  ;;  %v4953_v8 = vpack.c.bf16 %v870_v7, %v870_v7 }
 0x1d5   :  { %v1023_v9 = vsel %vm1021_vm2, %v4953_v8, 0 }
 0x1d6   :  { %4198 = vmatpush3.bf16.msra.mxu0 %v1023_v9 }
 0x1d7   :  { %4203 = vmatprep.subr.bf16.mxu0 %v4753_v38 }
 0x207   :  { %v1118_v10 = vpop.permute.xlu0 %1117 }
 0x208   :  { %v1123_v11 = vsel %vm884_vm1, %v1118_v10, 0 }
 0x209   :  { %4210 = vmatpush3.bf16.xpose.msra.mxu1 %v1123_v11  ;;  %v1170_v12 = vpop.permute.xlu1 %1169 }
 0x20a   :  { %4215 = vmatprep.subr.bf16.mxu1 %v4753_v38  ;;  %v1175_v14 = vsel %vm884_vm1, %v1170_v12, 0  ;;  %v4988_v12 = vpack.c.bf16 %v4949_v5, %v4949_v5 }
 0x20b   :  { %v1115_v13 = vpop.permute.xlu0 %1114 }
 0x20c   :  { %v1069_v5 = vsel %vm1021_vm2, %v4988_v12, 0 }
 0x20d   :  { %v1167_v16 = vpop.permute.xlu1 %1166 }
 0x210   :  { %4212 = vmatmul.mubr.msk.bf16.vlgmr.msra.gmra.mrb[0].mxu1 %vm884_vm1, %v1115_v13 }
 0x211   :  { %4216 = vmatpush3.bf16.xpose.msra.mxu1 %v1175_v14  ;;  %4217 = vmatprep.mubr.msk.bf16.mxu1 %vm4754_vm0, %v4753_v38 }
 0x212   :  { %4221 = vmatprep.subr.bf16.mxu1 %v4753_v38 }
 0x218   :  { %4218 = vmatmul.mubr.msk.bf16.vlgmr.msra.gmra.mrb[4].mxu1 %vm884_vm1, %v1167_v16 }
 0x219   :  { %4223 = vmatprep.mubr.msk.bf16.mxu1 %vm4754_vm0, %v4753_v38 }
 0x270   :  { %v925_v15 = vpop.f32.mrb[12].mxu0 }
 0x271   :  { %v4189_v17 = vpop.f32.mrb[13].mxu0  ;;  %v978_v18 = vsel %vm977_vm3, %v925_v15, -inf }
 0x272   :  { %979 = vmax.xlane.f32.xlu0 %v978_v18  ;;  %v928_v19 = vpop.f32.mrb[14].mxu0 }
 0x273   :  { %v4190_v20 = vpop.f32.mrb[15].mxu0 }
 0x278   :  { %v971_v21 = vpop.f32.mrb[16].mxu0 }
 0x279   :  { %v4195_v22 = vpop.f32.mrb[17].mxu0  ;;  %v981_v23 = vsel %vm977_vm3, %v971_v21, -inf }
 0x27a   :  { %982 = vmax.xlane.f32.xlu0 %v981_v23  ;;  %v974_v24 = vpop.f32.mrb[18].mxu0 }
 0x27b   :  { %v4196_v25 = vpop.f32.mrb[19].mxu0 }
 0x2e3   :  { %v1159_v26 = vpop.f32.mrb[0].mxu1 }
 0x2e4   :  { %v4213_v27 = vpop.f32.mrb[1].mxu1  ;;  %v1217_v28 = vsel %vm977_vm3, %v1159_v26, -inf }
 0x2e5   :  { %1218 = vmax.xlane.f32.xlu1 %v1217_v28  ;;  %v1162_v29 = vpop.f32.mrb[2].mxu1 }
 0x2e6   :  { %v4214_v30 = vpop.f32.mrb[3].mxu1 }
 0x2eb   :  { %v1211_v31 = vpop.f32.mrb[4].mxu1 }
 0x2ec   :  { %v4219_v32 = vpop.f32.mrb[5].mxu1  ;;  %v1220_v33 = vsel %vm977_vm3, %v1211_v31, -inf }
 0x2ed   :  { %v1214_v34 = vpop.f32.mrb[6].mxu1  ;;  %1221 = vmax.xlane.f32.xlu0 %v1220_v33 }
 0x2ee   :  { %v4220_v35 = vpop.f32.mrb[7].mxu1 }
 0x2f6   :  { %1258 = vrot.lane.b32.xlu1 %v4953_v8, %s4755_s2 }
 0x2ff   :  { %v980_v36 = vpop.xlane.xlu0 %979 }
 0x300   :  { %v984_v37 = vsub.f32 %v925_v15, %v980_v36 }
 0x302   :  { %v986_v42 = vmul.f32 1.442695, %v984_v37 }
 0x304   :  { %4607 = vpow2.f32 %v986_v42 }
 0x307   :  { %v983_v40 = vpop.xlane.xlu0 %982 }
 0x308   :  { %v985_v44 = vsub.f32 %v971_v21, %v983_v40 }
 0x30a   :  { %v988_v48 = vmul.f32 1.442695, %v985_v44 }
 0x30c   :  { %4609 = vpow2.f32 %v988_v48 }
 0x30e   :  { %v4608_v49 = vpop.eup %4607 }
 0x30f   :  { %v990_v50 = vsel %vm977_vm3, %v4608_v49, 0.0 }
 0x316   :  { %v4610_v51 = vpop.eup %4609 }
 0x317   :  { %v993_v53 = vsel %vm977_vm3, %v4610_v51, 0.0 }
 0x31a   :  { %991 = vadd.xlane.f32.xlu1 %v990_v50 }
 0x31e   :  { %994 = vadd.xlane.f32.xlu1 %v993_v53 }
 0x32f   :  { %1359 = vrot.lane.b32.xlu1 %v4911_v55, %s4742_s14 }
 0x333   :  { %1409 = vrot.lane.b32.xlu1 %v4915_v59, %s4742_s14 }
 0x337   :  { %1407 = vrot.lane.b32.xlu1 %v4926_v62, %s4742_s14 }
 0x372   :  { %v1219_v54 = vpop.xlane.xlu1 %1218 }
 0x373   :  { %v1223_v56 = vsub.f32 %v1159_v26, %v1219_v54 }
 0x375   :  { %v1225_v58 = vmul.f32 1.442695, %v1223_v56 }
 0x376   :  { %v1259_v60 = vpop.permute.xlu1 %1258 }
 0x377   :  { %4611 = vpow2.f32 %v1225_v58  ;;  %v1264_v63 = vsel %vm1021_vm2, %v1259_v60, 0 }
 0x378   :  { %4222 = vmatpush3.bf16.msra.mxu1 %v1264_v63 }
 0x379   :  { %4227 = vmatprep.subr.bf16.mxu1 %v4753_v38 }
 0x37a   :  { %v1222_v1 = vpop.xlane.xlu0 %1221 }
 0x37b   :  { %v1224_v2 = vsub.f32 %v1211_v31, %v1222_v1 }
 0x37d   :  { %v1227_v4 = vmul.f32 1.442695, %v1224_v2 }
 0x37f   :  { %4613 = vpow2.f32 %v1227_v4 }
 0x381   :  { %v4612_v7 = vpop.eup %4611 }
 0x382   :  { %v1229_v9 = vsel %vm977_vm3, %v4612_v7, 0.0 }
 0x383   :  { %1230 = vadd.xlane.f32.xlu0 %v1229_v9 }
 0x389   :  { %v4614_v10 = vpop.eup %4613 }
 0x38a   :  { %v1232_v11 = vsel %vm977_vm3, %v4614_v10, 0.0 }
 0x38b   :  { %1233 = vadd.xlane.f32.xlu0 %v1232_v11 }
 0x3a1   :  { %1307 = vrot.lane.b32.xlu0 %v4988_v12, %s4755_s2 }
 0x3a5   :  { %1357 = vrot.lane.b32.xlu0 %v4921_v61, %s4742_s14 }
 0x3a7   :  { %v992_v13 = vpop.xlane.xlu1 %991 }
 0x3a8   :  { %4615 = vrcp.f32 %v992_v13 }
 0x3ab   :  { %v995_v14 = vpop.xlane.xlu1 %994 }
 0x3ac   :  { %4617 = vrcp.f32 %v995_v14 }
 0x3af   :  { %v1360_v20 = vpop.permute.xlu1 %1359 }
 0x3b0   :  { %v1365_v22 = vsel %vm884_vm1, %v1360_v20, 0 }
 0x3b2   :  { %v4616_v16 = vpop.eup %4615 }
 0x3b3   :  { %v997_v15 = vmul.f32 %v4616_v16, %v4608_v49  ;;  %v1410_v56 = vpop.permute.xlu1 %1409 }
 0x3b4   :  { %v1415_v4 = vsel %vm884_vm1, %v1410_v56, 0 }
 0x3b5   :  { %v1016_v17 = vpack.c.bf16 %v997_v15, %v997_v15  ;;  %v1000_v24 = vsel %vm977_vm3, %v997_v15, 0.0 }
 0x3b6   :  { %v4618_v18 = vpop.eup %4617  ;;  %v1001_v25 = vrot.slane %v1000_v24, 4 }
 0x3b7   :  { %4200 = vmatmul.mubr.msk.bf16.vlgmr.msra.gmra.mrb[20].mxu0 %vm977_vm3, %v1016_v17  ;;  %v999_v19 = vmul.f32 %v4618_v18, %v4610_v51  ;;  %v1408_v18 = vpop.permute.xlu1 %1407 }
 0x3b8   :  { %4204 = vmatpush3.bf16.msra.mxu0 %v1069_v5  ;;  %4205 = vmatprep.mubr.msk.bf16.mxu0 %vm4754_vm0, %v4753_v38  ;;  %v1002_v27 = vadd.f32 %v1001_v25, %v1000_v24 }
 0x3b9   :  { %4233 = vmatprep.subr.bf16.mxu0 %v4753_v38  ;;  %v1017_v21 = vpack.c.bf16 %v999_v19, %v999_v19  ;;  %v1007_v28 = vsel %vm977_vm3, %v999_v19, 0.0 }
 0x3ba   :  { %v1003_v32 = vrot.slane %v1002_v27, 2  ;;  %v1008_v33 = vrot.slane %v1007_v28, 4 }
 0x3bc   :  { %v1004_v42 = vadd.f32 %v1003_v32, %v1002_v27  ;;  %v1009_v44 = vadd.f32 %v1008_v33, %v1007_v28 }
 0x3be   :  { %v1005_v53 = vrot.slane %v1004_v42, 1  ;;  %v1010_v54 = vrot.slane %v1009_v44, 2 }
 0x3bf   :  { %4206 = vmatmul.mubr.msk.bf16.vlgmr.msra.gmra.mrb[24].mxu0 %vm977_vm3, %v1017_v21 }
 0x3c0   :  { %4235 = vmatprep.mubr.msk.bf16.mxu0 %vm4754_vm0, %v4753_v38  ;;  %v1011_v9 = vadd.f32 %v1010_v54, %v1009_v44 }
 0x3c1   :  { %4234 = vmatpush3.bf16.xpose.msra.mxu0 %v1365_v22 }
 0x3c2   :  { %4245 = vmatprep.subr.bf16.mxu0 %v4753_v38  ;;  %v1012_v16 = vrot.slane %v1011_v9, 1 }
 0x3c4   :  { %v1013_v5 = vadd.f32 %v1012_v16, %v1011_v9 }
 0x410   :  { %v1231_v23 = vpop.xlane.xlu0 %1230 }
 0x411   :  { %4619 = vrcp.f32 %v1231_v23 }
 0x418   :  { %v1234_v26 = vpop.xlane.xlu0 %1233 }
 0x419   :  { %4621 = vrcp.f32 %v1234_v26 }
 0x41b   :  { %v4620_v29 = vpop.eup %4619 }
 0x41c   :  { %v1236_v30 = vmul.f32 %v4620_v29, %v4612_v7  ;;  %v1308_v31 = vpop.permute.xlu0 %1307  ;;  %v1006_v7 = vadd.f32 %v1005_v53, %v1004_v42 }
 0x41d   :  { %v1313_v37 = vsel %vm1021_vm2, %v1308_v31, 0 }
 0x41e   :  { %v1239_v34 = vsel %vm977_vm3, %v1236_v30, 0.0  ;;  %v1255_v35 = vpack.c.bf16 %v1236_v30, %v1236_v30 }
 0x41f   :  { %v1240_v36 = vrot.slane %v1239_v34, 4 }
 0x420   :  { %4224 = vmatmul.mubr.msk.bf16.vlgmr.msra.gmra.mrb[8].mxu1 %vm977_vm3, %v1255_v35  ;;  %v1358_v40 = vpop.permute.xlu0 %1357 }
 0x421   :  { %v1241_v48 = vadd.f32 %v1240_v36, %v1239_v34  ;;  %4228 = vmatpush3.bf16.msra.mxu1 %v1313_v37  ;;  %4236 = vmatmul.mubr.msk.bf16.vlgmr.msra.gmra.mrb[28].mxu0 %vm884_vm1, %v1358_v40 }
 0x422   :  { %4229 = vmatprep.mubr.msk.bf16.mxu1 %vm4754_vm0, %v4753_v38  ;;  %4239 = vmatprep.subr.bf16.mxu1 %v4753_v38 }
 0x423   :  { %v4622_v49 = vpop.eup %4621  ;;  %v1242_v50 = vrot.slane %v1241_v48, 2  ;;  %4247 = vmatprep.mubr.msk.bf16.mxu0 %vm4754_vm0, %v4753_v38 }
 0x424   :  { %v1238_v51 = vmul.f32 %v4622_v49, %v4614_v10 }
 0x425   :  { %v1243_v58 = vadd.f32 %v1242_v50, %v1241_v48 }
 0x426   :  { %v1246_v60 = vsel %vm977_vm3, %v1238_v51, 0.0  ;;  %v1256_v63 = vpack.c.bf16 %v1238_v51, %v1238_v51 }
 0x427   :  { %v1244_v1 = vrot.slane %v1243_v58, 1  ;;  %v1247_v2 = vrot.slane %v1246_v60, 4 }
 0x428   :  { %4230 = vmatmul.mubr.msk.bf16.vlgmr.msra.gmra.mrb[12].mxu1 %vm977_vm3, %v1256_v63 }
 0x429   :  { %v1245_v11 = vadd.f32 %v1244_v1, %v1243_v58  ;;  %v1248_v13 = vadd.f32 %v1247_v2, %v1246_v60  ;;  %4241 = vmatprep.mubr.msk.bf16.mxu1 %vm4754_vm0, %v4753_v38 }
 0x42a   :  { %4240 = vmatpush3.bf16.xpose.msra.mxu1 %v1415_v4 }
 0x42b   :  { %v5021_v10 = vadd.f32 %v1245_v11, %v1006_v7  ;;  %v1249_v14 = vrot.slane %v1248_v13, 2  ;;  %4251 = vmatprep.subr.bf16.mxu1 %v4753_v38 }
 0x42d   :  { %v1250_v15 = vadd.f32 %v1249_v14, %v1248_v13 }
 0x42f   :  { %v1251_v17 = vrot.slane %v1250_v15, 1 }
 0x431   :  { %v1252_v19 = vadd.f32 %v1251_v17, %v1250_v15  ;;  %4242 = vmatmul.mubr.msk.bf16.vlgmr.msra.gmra.mrb[16].mxu1 %vm884_vm1, %v1408_v18 }
 0x432   :  { %4253 = vmatprep.mubr.msk.bf16.mxu1 %vm4754_vm0, %v4753_v38 }
 0x433   :  { %v5027_v20 = vadd.f32 %v1252_v19, %v1013_v5 }
 0x48a   :  { %v5029_v21 = vpop.f32.mrb[20].mxu0 }
 0x48b   :  { %v4201_v22 = vpop.f32.mrb[21].mxu0 }
 0x48c   :  { %v1062_v23 = vpop.f32.mrb[22].mxu0 }
 0x48d   :  { %v4202_v24 = vpop.f32.mrb[23].mxu0 }
 0x492   :  { %v5031_v25 = vpop.f32.mrb[24].mxu0 }
 0x493   :  { %v4113_v26 = vpack.c.bf16 %v5031_v25, %v5029_v21  ;;  %v4207_v27 = vpop.f32.mrb[25].mxu0 }
 0x494   :  { %v1108_v28 = vpop.f32.mrb[26].mxu0 }
 0x495   :  { %v4208_v29 = vpop.f32.mrb[27].mxu0 }
 0x4f3   :  { %v5035_v30 = vpop.f32.mrb[8].mxu1 }
 0x4f4   :  { %v4225_v31 = vpop.f32.mrb[9].mxu1  ;;  %v1401_v32 = vpop.f32.mrb[28].mxu0 }
 0x4f5   :  { %v1303_v33 = vpop.f32.mrb[10].mxu1  ;;  %v4237_v34 = vpop.f32.mrb[29].mxu0  ;;  %v1457_v35 = vsel %vm977_vm3, %v1401_v32, -inf }
 0x4f6   :  { %v4226_v36 = vpop.f32.mrb[11].mxu1  ;;  %1458 = vmax.xlane.f32.xlu0 %v1457_v35  ;;  %v1404_v37 = vpop.f32.mrb[30].mxu0 }
 0x4f7   :  { %v4238_v40 = vpop.f32.mrb[31].mxu0 }
 0x4fb   :  { %v5038_v42 = vpop.f32.mrb[12].mxu1 }
 0x4fc   :  { %v4114_v44 = vpack.c.bf16 %v5038_v42, %v5035_v30  ;;  %v4231_v48 = vpop.f32.mrb[13].mxu1 }
 0x4fd   :  { %v1352_v49 = vpop.f32.mrb[14].mxu1 }
 0x4fe   :  { %v4232_v50 = vpop.f32.mrb[15].mxu1 }
 0x504   :  { %v1451_v51 = vpop.f32.mrb[16].mxu1 }
 0x505   :  { %v4243_v53 = vpop.f32.mrb[17].mxu1  ;;  %v1460_v54 = vsel %vm977_vm3, %v1451_v51, -inf }
 0x506   :  { %1461 = vmax.xlane.f32.xlu1 %v1460_v54  ;;  %v1454_v56 = vpop.f32.mrb[18].mxu1 }
 0x507   :  { %v4244_v58 = vpop.f32.mrb[19].mxu1 }
 0x517   :  { %1497 = vrot.lane.b32.xlu1 %v4953_v8, %s4742_s14 }
 0x51b   :  { %1597 = vrot.lane.b32.xlu1 %v4911_v55, %s4756_s21 }
 0x51f   :  { %1647 = vrot.lane.b32.xlu1 %v4915_v59, %s4756_s21 }
 0x523   :  { %1645 = vrot.lane.b32.xlu1 %v4926_v62, %s4756_s21 }
 0x583   :  { %v1459_v60 = vpop.xlane.xlu0 %1458 }
 0x584   :  { %v1463_v63 = vsub.f32 %v1401_v32, %v1459_v60 }
 0x586   :  { %v1465_v1 = vmul.f32 1.442695, %v1463_v63 }
 0x588   :  { %4623 = vpow2.f32 %v1465_v1 }
 0x592   :  { %v4624_v2 = vpop.eup %4623 }
 0x593   :  { %v1462_v4 = vpop.xlane.xlu1 %1461  ;;  %v1469_v7 = vsel %vm977_vm3, %v4624_v2, 0.0 }
 0x594   :  { %v1464_v9 = vsub.f32 %v1451_v51, %v1462_v4  ;;  %1470 = vadd.xlane.f32.xlu0 %v1469_v7 }
 0x596   :  { %v1467_v11 = vmul.f32 1.442695, %v1464_v9 }
 0x597   :  { %v1498_v13 = vpop.permute.xlu1 %1497 }
 0x598   :  { %4625 = vpow2.f32 %v1467_v11  ;;  %v1503_v55 = vsel %vm1021_vm2, %v1498_v13, 0 }
 0x599   :  { %4246 = vmatpush3.bf16.msra.mxu0 %v1503_v55 }
 0x59a   :  { %4257 = vmatprep.subr.bf16.mxu0 %v4753_v38 }
 0x59b   :  { %v1598_v17 = vpop.permute.xlu1 %1597 }
 0x59c   :  { %v1603_v22 = vsel %vm884_vm1, %v1598_v17, 0 }
 0x59f   :  { %v1648_v37 = vpop.permute.xlu1 %1647 }
 0x5a0   :  { %v1653_v50 = vsel %vm884_vm1, %v1648_v37, 0 }
 0x5a2   :  { %v4626_v59 = vpop.eup %4625 }
 0x5a3   :  { %v1472_v62 = vsel %vm977_vm3, %v4626_v59, 0.0  ;;  %v1646_v54 = vpop.permute.xlu1 %1645 }
 0x5a4   :  { %1473 = vadd.xlane.f32.xlu0 %v1472_v62 }
 0x5ba   :  { %1545 = vrot.lane.b32.xlu0 %v4988_v12, %s4742_s14 }
 0x5be   :  { %1595 = vrot.lane.b32.xlu0 %v4921_v61, %s4756_s21 }
 0x621   :  { %v1471_v14 = vpop.xlane.xlu0 %1470 }
 0x622   :  { %4627 = vrcp.f32 %v1471_v14 }
 0x62c   :  { %v4628_v16 = vpop.eup %4627 }
 0x62d   :  { %v1476_v15 = vmul.f32 %v4628_v16, %v4624_v2 }
 0x62f   :  { %v1479_v18 = vsel %vm977_vm3, %v1476_v15, 0.0  ;;  %v1495_v5 = vpack.c.bf16 %v1476_v15, %v1476_v15 }
 0x630   :  { %v1480_v19 = vrot.slane %v1479_v18, 4 }
 0x631   :  { %v1474_v23 = vpop.xlane.xlu0 %1473  ;;  %4248 = vmatmul.mubr.msk.bf16.vlgmr.msra.gmra.mrb[32].mxu0 %vm977_vm3, %v1495_v5 }
 0x632   :  { %v1481_v24 = vadd.f32 %v1480_v19, %v1479_v18  ;;  %4629 = vrcp.f32 %v1474_v23  ;;  %4258 = vmatpush3.bf16.xpose.msra.mxu0 %v1603_v22  ;;  %4259 = vmatprep.mubr.msk.bf16.mxu0 %vm4754_vm0, %v4753_v38 }
 0x633   :  { %4269 = vmatprep.subr.bf16.mxu0 %v4753_v38 }
 0x634   :  { %v1482_v61 = vrot.slane %v1481_v24, 2 }
 0x635   :  { %v1546_v27 = vpop.permute.xlu0 %1545 }
 0x636   :  { %v1483_v28 = vadd.f32 %v1482_v61, %v1481_v24  ;;  %v1551_v29 = vsel %vm1021_vm2, %v1546_v27, 0 }
 0x637   :  { %4252 = vmatpush3.bf16.msra.mxu1 %v1551_v29 }
 0x638   :  { %v1484_v31 = vrot.slane %v1483_v28, 1  ;;  %4263 = vmatprep.subr.bf16.mxu1 %v4753_v38 }
 0x639   :  { %v1596_v32 = vpop.permute.xlu0 %1595 }
 0x63a   :  { %v1485_v33 = vadd.f32 %v1484_v31, %v1483_v28  ;;  %4260 = vmatmul.mubr.msk.bf16.vlgmr.msra.gmra.mrb[36].mxu0 %vm884_vm1, %v1596_v32 }
 0x63b   :  { %4271 = vmatprep.mubr.msk.bf16.mxu0 %vm4754_vm0, %v4753_v38 }
 0x63c   :  { %v4630_v34 = vpop.eup %4629  ;;  %v5071_v35 = vadd.f32 %v1485_v33, %v5021_v10 }
 0x63d   :  { %v1478_v36 = vmul.f32 %v4630_v34, %v4626_v59 }
 0x63f   :  { %v1486_v40 = vsel %vm977_vm3, %v1478_v36, 0.0  ;;  %v1496_v48 = vpack.c.bf16 %v1478_v36, %v1478_v36  ;;  %v253_v36 = vsub.s32 3, %v4893_v39 }
 0x640   :  { %v1487_v49 = vrot.slane %v1486_v40, 4 }
 0x641   :  { %4254 = vmatmul.mubr.msk.bf16.vlgmr.msra.gmra.mrb[20].mxu1 %vm977_vm3, %v1496_v48 }
 0x642   :  { %v1488_v51 = vadd.f32 %v1487_v49, %v1486_v40  ;;  %4264 = vmatpush3.bf16.xpose.msra.mxu1 %v1653_v50  ;;  %4265 = vmatprep.mubr.msk.bf16.mxu1 %vm4754_vm0, %v4753_v38  ;;  %v254_v40 = vrot.slane %v4902_v47, %v253_v36  ;;  %v261_v49 = vsub.s32 5, %v4893_v39  ;;  %v5108_v50 = vsub.s32 1, %v4893_v39 }
 0x643   :  { %4275 = vmatprep.subr.bf16.mxu1 %v4753_v38 }
 0x644   :  { %v1489_v53 = vrot.slane %v1488_v51, 2  ;;  %v829_v48 = vadd.f32 %v4909_v52, %v254_v40 }
 0x646   :  { %v1490_v10 = vadd.f32 %v1489_v53, %v1488_v51  ;;  %v5110_v53 = vpack.c.bf16 %v829_v48, %v829_v48 }
 0x648   :  { %v1491_v56 = vrot.slane %v1490_v10, 1 }
 0x649   :  { %4266 = vmatmul.mubr.msk.bf16.vlgmr.msra.gmra.mrb[24].mxu1 %vm884_vm1, %v1646_v54  ;;  %v246_v54 = vrot.slane %v4902_v47, %v5108_v50 }
 0x64a   :  { %v1492_v58 = vadd.f32 %v1491_v56, %v1490_v10  ;;  %4277 = vmatprep.mubr.msk.bf16.mxu1 %vm4754_vm0, %v4753_v38 }
 0x64c   :  { %v5083_v60 = vadd.f32 %v1492_v58, %v5027_v20 }
 0x704   :  { %v5085_v63 = vpop.f32.mrb[32].mxu0 }
 0x705   :  { %v4249_v1 = vpop.f32.mrb[33].mxu0 }
 0x706   :  { %v1542_v2 = vpop.f32.mrb[34].mxu0 }
 0x707   :  { %v4250_v4 = vpop.f32.mrb[35].mxu0 }
 0x708   :  { %v1843_v4 = vsel %vm884_vm1, %v5110_v53, 0 }
 0x70d   :  { %v1639_v7 = vpop.f32.mrb[36].mxu0 }
 0x70e   :  { %v4261_v9 = vpop.f32.mrb[37].mxu0  ;;  %v1695_v11 = vsel %vm977_vm3, %v1639_v7, -inf }
 0x70f   :  { %1696 = vmax.xlane.f32.xlu0 %v1695_v11  ;;  %v1642_v13 = vpop.f32.mrb[38].mxu0 }
 0x710   :  { %v4262_v55 = vpop.f32.mrb[39].mxu0 }
 0x714   :  { %v5088_v59 = vpop.f32.mrb[20].mxu1 }
 0x715   :  { %v4115_v62 = vpack.c.bf16 %v5088_v59, %v5085_v63  ;;  %v4255_v14 = vpop.f32.mrb[21].mxu1 }
 0x716   :  { %v1590_v20 = vpop.f32.mrb[22].mxu1 }
 0x717   :  { %v4256_v16 = vpop.f32.mrb[23].mxu1  ;;  %v833_v20 = vadd.f32 %v4913_v57, %v254_v40 }
 0x71c   :  { %v1689_v15 = vpop.f32.mrb[24].mxu1 }
 0x71d   :  { %v4267_v17 = vpop.f32.mrb[25].mxu1  ;;  %v1698_v18 = vsel %vm977_vm3, %v1689_v15, -inf }
 0x71e   :  { %1699 = vmax.xlane.f32.xlu1 %v1698_v18  ;;  %v1692_v5 = vpop.f32.mrb[26].mxu1  ;;  %v5140_v18 = vpack.c.bf16 %v833_v20, %v833_v20 }
 0x71f   :  { %v4268_v19 = vpop.f32.mrb[27].mxu1 }
 0x72f   :  { %1735 = vrot.lane.b32.xlu1 %v4953_v8, %s4756_s21 }
 0x79c   :  { %v1697_v22 = vpop.xlane.xlu0 %1696 }
 0x79d   :  { %v1701_v23 = vsub.f32 %v1639_v7, %v1697_v22 }
 0x79f   :  { %v1703_v24 = vmul.f32 1.442695, %v1701_v23 }
 0x7a1   :  { %4631 = vpow2.f32 %v1703_v24 }
 0x7ab   :  { %v4632_v61 = vpop.eup %4631  ;;  %v1700_v27 = vpop.xlane.xlu1 %1699 }
 0x7ac   :  { %v1702_v28 = vsub.f32 %v1689_v15, %v1700_v27  ;;  %v1707_v29 = vsel %vm977_vm3, %v4632_v61, 0.0 }
 0x7ad   :  { %1708 = vadd.xlane.f32.xlu0 %v1707_v29 }
 0x7ae   :  { %v1705_v31 = vmul.f32 1.442695, %v1702_v28 }
 0x7af   :  { %v1736_v32 = vpop.permute.xlu1 %1735 }
 0x7b0   :  { %4633 = vpow2.f32 %v1705_v31  ;;  %v1741_v33 = vsel %vm1021_vm2, %v1736_v32, 0 }
 0x7b1   :  { %4270 = vmatpush3.bf16.msra.mxu0 %v1741_v33 }
 0x7b2   :  { %4281 = vmatprep.subr.bf16.mxu0 %v4753_v38 }
 0x7ba   :  { %v4634_v34 = vpop.eup %4633 }
 0x7bb   :  { %v1710_v8 = vsel %vm977_vm3, %v4634_v34, 0.0 }
 0x7bc   :  { %1711 = vadd.xlane.f32.xlu0 %v1710_v8 }
 0x7d2   :  { %1783 = vrot.lane.b32.xlu0 %v4988_v12, %s4756_s21  ;;  %v262_v12 = vrot.slane %v4902_v47, %v261_v49  ;;  %v786_v47 = vadd.f32 %v4889_v41, %v246_v54 }
 0x7d4   :  { %v872_v2 = vadd.f32 %v4947_v3, %v262_v12  ;;  %v5129_v14 = vpack.c.bf16 %v786_v47, %v786_v47  ;;  %v876_v24 = vadd.f32 %v4951_v6, %v262_v12 }
 0x7d6   :  { %v5126_v13 = vpack.c.bf16 %v872_v2, %v872_v2  ;;  %v5154_v29 = vpack.c.bf16 %v876_v24, %v876_v24 }
 0x7d8   :  { %v1975_v41 = vsel %vm1021_vm2, %v5126_v13, 0  ;;  %v2021_v33 = vsel %vm1021_vm2, %v5154_v29, 0 }
 0x83a   :  { %v1709_v37 = vpop.xlane.xlu0 %1708 }
 0x83b   :  { %4635 = vrcp.f32 %v1709_v37 }
 0x845   :  { %v4636_v51 = vpop.eup %4635 }
 0x846   :  { %v1714_v10 = vmul.f32 %v4636_v51, %v4632_v61  ;;  %v1889_v61 = vsel %vm884_vm1, %v5140_v18, 0 }
 0x848   :  { %v1717_v56 = vsel %vm977_vm3, %v1714_v10, 0.0  ;;  %v1733_v58 = vpack.c.bf16 %v1714_v10, %v1714_v10 }
 0x849   :  { %v1718_v52 = vrot.slane %v1717_v56, 4  ;;  %v1712_v1 = vpop.xlane.xlu0 %1711 }
 0x84a   :  { %4637 = vrcp.f32 %v1712_v1  ;;  %4272 = vmatmul.mubr.msk.bf16.vlgmr.msra.gmra.mrb[40].mxu0 %vm977_vm3, %v1733_v58 }
 0x84b   :  { %v1719_v7 = vadd.f32 %v1718_v52, %v1717_v56  ;;  %4282 = vmatpush3.bf16.xpose.msra.mxu0 %v1843_v4  ;;  %4283 = vmatprep.mubr.msk.bf16.mxu0 %vm4754_vm0, %v4753_v38 }
 0x84c   :  { %4293 = vmatprep.subr.bf16.mxu0 %v4753_v38 }
 0x84d   :  { %v1720_v9 = vrot.slane %v1719_v7, 2  ;;  %v1784_v11 = vpop.permute.xlu0 %1783 }
 0x84e   :  { %v1789_v3 = vsel %vm1021_vm2, %v1784_v11, 0 }
 0x84f   :  { %v1721_v55 = vadd.f32 %v1720_v9, %v1719_v7  ;;  %4276 = vmatpush3.bf16.msra.mxu1 %v1789_v3 }
 0x850   :  { %4287 = vmatprep.subr.bf16.mxu1 %v4753_v38 }
 0x851   :  { %v1722_v16 = vrot.slane %v1721_v55, 1 }
 0x852   :  { %4284 = vmatmul.mubr.msk.bf16.vlgmr.msra.gmra.mrb[44].mxu0 %vm884_vm1, %v5129_v14 }
 0x853   :  { %v1723_v15 = vadd.f32 %v1722_v16, %v1721_v55  ;;  %4294 = vmatpush3.bf16.msra.mxu0 %v1975_v41  ;;  %4295 = vmatprep.mubr.msk.bf16.mxu0 %vm4754_vm0, %v4753_v38 }
 0x854   :  { %v4638_v17 = vpop.eup %4637  ;;  %4305 = vmatprep.subr.bf16.mxu0 %v4753_v38 }
 0x855   :  { %v5143_v5 = vadd.f32 %v1723_v15, %v5071_v35  ;;  %v1716_v57 = vmul.f32 %v4638_v17, %v4634_v34  ;;  %v790_v35 = vadd.f32 %v4891_v43, %v246_v54 }
 0x857   :  { %v1724_v19 = vsel %vm977_vm3, %v1716_v57, 0.0  ;;  %v1734_v22 = vpack.c.bf16 %v1716_v57, %v1716_v57  ;;  %v5156_v32 = vpack.c.bf16 %v790_v35, %v790_v35 }
 0x858   :  { %v1725_v23 = vrot.slane %v1724_v19, 4 }
 0x859   :  { %4278 = vmatmul.mubr.msk.bf16.vlgmr.msra.gmra.mrb[28].mxu1 %vm977_vm3, %v1734_v22 }
 0x85a   :  { %v1726_v27 = vadd.f32 %v1725_v23, %v1724_v19  ;;  %4288 = vmatpush3.bf16.xpose.msra.mxu1 %v1889_v61  ;;  %4289 = vmatprep.mubr.msk.bf16.mxu1 %vm4754_vm0, %v4753_v38 }
 0x85b   :  { %4299 = vmatprep.subr.bf16.mxu1 %v4753_v38 }
 0x85c   :  { %v1727_v28 = vrot.slane %v1726_v27, 2 }
 0x85e   :  { %v1728_v31 = vadd.f32 %v1727_v28, %v1726_v27 }
 0x860   :  { %v1729_v6 = vrot.slane %v1728_v31, 1 }
 0x861   :  { %4290 = vmatmul.mubr.msk.bf16.vlgmr.msra.gmra.mrb[32].mxu1 %vm884_vm1, %v5156_v32 }
 0x862   :  { %v1730_v34 = vadd.f32 %v1729_v6, %v1728_v31  ;;  %4300 = vmatpush3.bf16.msra.mxu1 %v2021_v33  ;;  %4301 = vmatprep.mubr.msk.bf16.mxu1 %vm4754_vm0, %v4753_v38 }
 0x863   :  { %4311 = vmatprep.subr.bf16.mxu1 %v4753_v38 }
 0x864   :  { %v5166_v43 = vadd.f32 %v1730_v34, %v5083_v60 }
 0x91d   :  { %v5168_v8 = vpop.f32.mrb[40].mxu0 }
 0x91e   :  { %v4273_v37 = vpop.f32.mrb[41].mxu0 }
 0x91f   :  { %v1780_v40 = vpop.f32.mrb[42].mxu0 }
 0x920   :  { %v4274_v48 = vpop.f32.mrb[43].mxu0 }
 0x925   :  { %v1879_v51 = vpop.f32.mrb[44].mxu0 }
 0x926   :  { %v4285_v12 = vpop.f32.mrb[45].mxu0  ;;  %v1931_v10 = vsel %vm977_vm3, %v1879_v51, -inf }
 0x927   :  { %1932 = vmax.xlane.f32.xlu1 %v1931_v10  ;;  %v1882_v54 = vpop.f32.mrb[46].mxu0 }
 0x928   :  { %v4286_v56 = vpop.f32.mrb[47].mxu0 }
 0x92c   :  { %v5171_v58 = vpop.f32.mrb[28].mxu1 }
 0x92d   :  { %v4116_v52 = vpack.c.bf16 %v5171_v58, %v5168_v8  ;;  %v4279_v1 = vpop.f32.mrb[29].mxu1 }
 0x92e   :  { %v1828_v60 = vpop.f32.mrb[30].mxu1 }
 0x92f   :  { %v4280_v2 = vpop.f32.mrb[31].mxu1 }
 0x934   :  { %v1925_v4 = vpop.f32.mrb[32].mxu1 }
 0x935   :  { %v4291_v7 = vpop.f32.mrb[33].mxu1  ;;  %v1934_v47 = vsel %vm977_vm3, %v1925_v4, -inf }
 0x936   :  { %1935 = vmax.xlane.f32.xlu0 %v1934_v47  ;;  %v1928_v9 = vpop.f32.mrb[34].mxu1 }
 0x937   :  { %v4292_v11 = vpop.f32.mrb[35].mxu1 }
 0x938   :  { %2069 = vrot.lane.b32.xlu1 %v5110_v53, %s4755_s2 }
 0x9b4   :  { %v1933_v3 = vpop.xlane.xlu1 %1932 }
 0x9b5   :  { %v1937_v55 = vsub.f32 %v1879_v51, %v1933_v3 }
 0x9b7   :  { %v1939_v20 = vmul.f32 1.442695, %v1937_v55 }
 0x9b8   :  { %v2070_v23 = vpop.permute.xlu1 %2069 }
 0x9b9   :  { %4639 = vpow2.f32 %v1939_v20  ;;  %v2075_v33 = vsel %vm884_vm1, %v2070_v23, 0 }
 0x9c3   :  { %v4640_v16 = vpop.eup %4639  ;;  %v1936_v41 = vpop.xlane.xlu0 %1935 }
 0x9c4   :  { %v1938_v15 = vsub.f32 %v1925_v4, %v1936_v41  ;;  %v1943_v17 = vsel %vm977_vm3, %v4640_v16, 0.0 }
 0x9c5   :  { %1944 = vadd.xlane.f32.xlu1 %v1943_v17 }
 0x9c6   :  { %v1941_v57 = vmul.f32 1.442695, %v1938_v15 }
 0x9c8   :  { %4641 = vpow2.f32 %v1941_v57 }
 0x9d2   :  { %v4642_v19 = vpop.eup %4641 }
 0x9d3   :  { %v1946_v22 = vsel %vm977_vm3, %v4642_v19, 0.0 }
 0x9d4   :  { %1947 = vadd.xlane.f32.xlu0 %v1946_v22 }
 0x9d6   :  { %2066 = vrot.lane.b32.xlu1 %v5129_v14, %s4755_s2 }
 0x9da   :  { %2118 = vrot.lane.b32.xlu1 %v5156_v32, %s4755_s2 }
 0x9ea   :  { %2121 = vrot.lane.b32.xlu0 %v5140_v18, %s4755_s2 }
 0xa52   :  { %v1945_v24 = vpop.xlane.xlu1 %1944 }
 0xa53   :  { %4643 = vrcp.f32 %v1945_v24 }
 0xa56   :  { %v2067_v51 = vpop.permute.xlu1 %2066 }
 0xa5a   :  { %v2119_v11 = vpop.permute.xlu1 %2118 }
 0xa5d   :  { %v4644_v61 = vpop.eup %4643 }
 0xa5e   :  { %v1950_v27 = vmul.f32 %v4644_v61, %v4640_v16 }
 0xa60   :  { %v1953_v35 = vsel %vm977_vm3, %v1950_v27, 0.0  ;;  %v1969_v28 = vpack.c.bf16 %v1950_v27, %v1950_v27 }
 0xa61   :  { %v1954_v31 = vrot.slane %v1953_v35, 4  ;;  %v1948_v6 = vpop.xlane.xlu0 %1947 }
 0xa62   :  { %4645 = vrcp.f32 %v1948_v6  ;;  %4296 = vmatmul.mubr.msk.bf16.vlgmr.msra.gmra.mrb[48].mxu0 %vm977_vm3, %v1969_v28 }
 0xa63   :  { %v1955_v34 = vadd.f32 %v1954_v31, %v1953_v35  ;;  %4306 = vmatpush3.bf16.xpose.msra.mxu0 %v2075_v33  ;;  %4307 = vmatprep.mubr.msk.bf16.mxu0 %vm4754_vm0, %v4753_v38 }
 0xa64   :  { %4317 = vmatprep.subr.bf16.mxu0 %v4753_v38 }
 0xa65   :  { %v1956_v37 = vrot.slane %v1955_v34, 2  ;;  %v2122_v1 = vpop.permute.xlu0 %2121 }
 0xa66   :  { %v2127_v7 = vsel %vm884_vm1, %v2122_v1, 0 }
 0xa67   :  { %v1957_v40 = vadd.f32 %v1956_v37, %v1955_v34 }
 0xa69   :  { %v1958_v48 = vrot.slane %v1957_v40, 1 }
 0xa6a   :  { %4308 = vmatmul.mubr.msk.bf16.vlgmr.msra.gmra.mrb[52].mxu0 %vm884_vm1, %v2067_v51 }
 0xa6b   :  { %v1959_v12 = vadd.f32 %v1958_v48, %v1957_v40  ;;  %4319 = vmatprep.mubr.msk.bf16.mxu0 %vm4754_vm0, %v4753_v38 }
 0xa6c   :  { %v4646_v10 = vpop.eup %4645 }
 0xa6d   :  { %v5196_v54 = vadd.f32 %v1959_v12, %v5143_v5  ;;  %v1952_v56 = vmul.f32 %v4646_v10, %v4642_v19 }
 0xa6f   :  { %v1960_v60 = vsel %vm977_vm3, %v1952_v56, 0.0  ;;  %v1970_v2 = vpack.c.bf16 %v1952_v56, %v1952_v56 }
 0xa70   :  { %v1961_v4 = vrot.slane %v1960_v60, 4 }
 0xa71   :  { %4302 = vmatmul.mubr.msk.bf16.vlgmr.msra.gmra.mrb[36].mxu1 %vm977_vm3, %v1970_v2 }
 0xa72   :  { %v1962_v47 = vadd.f32 %v1961_v4, %v1960_v60  ;;  %4312 = vmatpush3.bf16.xpose.msra.mxu1 %v2127_v7  ;;  %4313 = vmatprep.mubr.msk.bf16.mxu1 %vm4754_vm0, %v4753_v38 }
 0xa73   :  { %4323 = vmatprep.subr.bf16.mxu1 %v4753_v38 }
 0xa74   :  { %v1963_v9 = vrot.slane %v1962_v47, 2 }
 0xa76   :  { %v1964_v5 = vadd.f32 %v1963_v9, %v1962_v47 }
 0xa78   :  { %v1965_v3 = vrot.slane %v1964_v5, 1 }
 0xa79   :  { %4314 = vmatmul.mubr.msk.bf16.vlgmr.msra.gmra.mrb[40].mxu1 %vm884_vm1, %v2119_v11 }
 0xa7a   :  { %v1966_v55 = vadd.f32 %v1965_v3, %v1964_v5  ;;  %4325 = vmatprep.mubr.msk.bf16.mxu1 %vm4754_vm0, %v4753_v38 }
 0xa7c   :  { %v5208_v20 = vadd.f32 %v1966_v55, %v5166_v43 }
 0xb35   :  { %v5210_v16 = vpop.f32.mrb[48].mxu0 }
 0xb36   :  { %v4297_v41 = vpop.f32.mrb[49].mxu0 }
 0xb37   :  { %v2014_v15 = vpop.f32.mrb[50].mxu0 }
 0xb38   :  { %v4298_v17 = vpop.f32.mrb[51].mxu0 }
 0xb3d   :  { %v2111_v57 = vpop.f32.mrb[52].mxu0 }
 0xb3e   :  { %v4309_v19 = vpop.f32.mrb[53].mxu0  ;;  %v2169_v22 = vsel %vm977_vm3, %v2111_v57, -inf }
 0xb3f   :  { %2170 = vmax.xlane.f32.xlu0 %v2169_v22  ;;  %v2114_v23 = vpop.f32.mrb[54].mxu0 }
 0xb40   :  { %v4310_v24 = vpop.f32.mrb[55].mxu0 }
 0xb44   :  { %v5213_v61 = vpop.f32.mrb[36].mxu1 }
 0xb45   :  { %v4117_v27 = vpack.c.bf16 %v5213_v61, %v5210_v16  ;;  %v4303_v35 = vpop.f32.mrb[37].mxu1  ;;  %v2896_v16 = vld [vmem:[%s5540_s4] sm:$0x3] }
 0xb46   :  { %v2060_v43 = vpop.f32.mrb[38].mxu1  ;;  %v2901_v61 = vrot.slane %v2896_v16, %v4897_v46 }
 0xb47   :  { %v4304_v28 = vpop.f32.mrb[39].mxu1 }
 0xb4c   :  { %v2163_v31 = vpop.f32.mrb[40].mxu1 }
 0xb4d   :  { %v4315_v6 = vpop.f32.mrb[41].mxu1  ;;  %v2172_v33 = vsel %vm977_vm3, %v2163_v31, -inf }
 0xb4e   :  { %2173 = vmax.xlane.f32.xlu1 %v2172_v33  ;;  %v2166_v34 = vpop.f32.mrb[42].mxu1 }
 0xb4f   :  { %v4316_v37 = vpop.f32.mrb[43].mxu1 }
 0xb5f   :  { %2210 = vrot.lane.b32.xlu1 %v5126_v13, %s4755_s2 }
 0xb63   :  { %2311 = vrot.lane.b32.xlu1 %v5110_v53, %s4742_s14 }
 0xb67   :  { %2361 = vrot.lane.b32.xlu1 %v5140_v18, %s4742_s14 }
 0xb6b   :  { %2359 = vrot.lane.b32.xlu1 %v5156_v32, %s4742_s14 }
 0xbcc   :  { %v2171_v40 = vpop.xlane.xlu0 %2170 }
 0xbcd   :  { %v2175_v48 = vsub.f32 %v2111_v57, %v2171_v40 }
 0xbcf   :  { %v2177_v51 = vmul.f32 1.442695, %v2175_v48 }
 0xbd1   :  { %4647 = vpow2.f32 %v2177_v51 }
 0xbdb   :  { %v4648_v12 = vpop.eup %4647  ;;  %v2174_v10 = vpop.xlane.xlu1 %2173 }
 0xbdc   :  { %v2176_v56 = vsub.f32 %v2163_v31, %v2174_v10  ;;  %v2181_v1 = vsel %vm977_vm3, %v4648_v12, 0.0 }
 0xbdd   :  { %2182 = vadd.xlane.f32.xlu0 %v2181_v1 }
 0xbde   :  { %v2179_v60 = vmul.f32 1.442695, %v2176_v56 }
 0xbdf   :  { %v2211_v2 = vpop.permute.xlu1 %2210 }
 0xbe0   :  { %4649 = vpow2.f32 %v2179_v60  ;;  %v2216_v4 = vsel %vm1021_vm2, %v2211_v2, 0 }
 0xbe1   :  { %4318 = vmatpush3.bf16.msra.mxu0 %v2216_v4 }
 0xbe2   :  { %4329 = vmatprep.subr.bf16.mxu0 %v4753_v38 }
 0xbe3   :  { %v2312_v3 = vpop.permute.xlu1 %2311 }
 0xbe4   :  { %v2317_v57 = vsel %vm884_vm1, %v2312_v3, 0 }
 0xbe7   :  { %v2362_v37 = vpop.permute.xlu1 %2361 }
 0xbea   :  { %v4650_v7 = vpop.eup %4649 }
 0xbeb   :  { %v2184_v47 = vsel %vm977_vm3, %v4650_v7, 0.0  ;;  %v2360_v1 = vpop.permute.xlu1 %2359 }
 0xbec   :  { %2185 = vadd.xlane.f32.xlu0 %v2184_v47 }
 0xc02   :  { %2259 = vrot.lane.b32.xlu0 %v5154_v29, %s4755_s2 }
 0xc06   :  { %2309 = vrot.lane.b32.xlu0 %v5129_v14, %s4742_s14 }
 0xc6a   :  { %v2183_v9 = vpop.xlane.xlu0 %2182 }
 0xc6b   :  { %4651 = vrcp.f32 %v2183_v9 }
 0xc75   :  { %v4652_v5 = vpop.eup %4651 }
 0xc76   :  { %v2188_v11 = vmul.f32 %v4652_v5, %v4648_v12  ;;  %v2367_v12 = vsel %vm884_vm1, %v2362_v37, 0 }
 0xc78   :  { %v2191_v55 = vsel %vm977_vm3, %v2188_v11, 0.0  ;;  %v2207_v41 = vpack.c.bf16 %v2188_v11, %v2188_v11 }
 0xc79   :  { %v2192_v15 = vrot.slane %v2191_v55, 4  ;;  %v2186_v17 = vpop.xlane.xlu0 %2185 }
 0xc7a   :  { %4653 = vrcp.f32 %v2186_v17  ;;  %4320 = vmatmul.mubr.msk.bf16.vlgmr.msra.gmra.mrb[56].mxu0 %vm977_vm3, %v2207_v41 }
 0xc7b   :  { %v2193_v19 = vadd.f32 %v2192_v15, %v2191_v55  ;;  %4330 = vmatpush3.bf16.xpose.msra.mxu0 %v2317_v57  ;;  %4331 = vmatprep.mubr.msk.bf16.mxu0 %vm4754_vm0, %v4753_v38 }
 0xc7c   :  { %4341 = vmatprep.subr.bf16.mxu0 %v4753_v38 }
 0xc7d   :  { %v2194_v22 = vrot.slane %v2193_v19, 2  ;;  %v2260_v23 = vpop.permute.xlu0 %2259 }
 0xc7e   :  { %v2265_v24 = vsel %vm1021_vm2, %v2260_v23, 0 }
 0xc7f   :  { %v2195_v35 = vadd.f32 %v2194_v22, %v2193_v19  ;;  %4324 = vmatpush3.bf16.msra.mxu1 %v2265_v24 }
 0xc80   :  { %4335 = vmatprep.subr.bf16.mxu1 %v4753_v38 }
 0xc81   :  { %v2196_v43 = vrot.slane %v2195_v35, 1  ;;  %v2310_v28 = vpop.permute.xlu0 %2309 }
 0xc82   :  { %4332 = vmatmul.mubr.msk.bf16.vlgmr.msra.gmra.mrb[60].mxu0 %vm884_vm1, %v2310_v28 }
 0xc83   :  { %v2197_v31 = vadd.f32 %v2196_v43, %v2195_v35  ;;  %4343 = vmatprep.mubr.msk.bf16.mxu0 %vm4754_vm0, %v4753_v38 }
 0xc84   :  { %v4654_v6 = vpop.eup %4653 }
 0xc85   :  { %v5246_v33 = vadd.f32 %v2197_v31, %v5196_v54  ;;  %v2190_v34 = vmul.f32 %v4654_v6, %v4650_v7 }
 0xc87   :  { %v2198_v40 = vsel %vm977_vm3, %v2190_v34, 0.0  ;;  %v2208_v48 = vpack.c.bf16 %v2190_v34, %v2190_v34 }
 0xc88   :  { %v2199_v51 = vrot.slane %v2198_v40, 4 }
 0xc89   :  { %4326 = vmatmul.mubr.msk.bf16.vlgmr.msra.gmra.mrb[44].mxu1 %vm977_vm3, %v2208_v48 }
 0xc8a   :  { %v2200_v10 = vadd.f32 %v2199_v51, %v2198_v40  ;;  %4336 = vmatpush3.bf16.xpose.msra.mxu1 %v2367_v12  ;;  %4337 = vmatprep.mubr.msk.bf16.mxu1 %vm4754_vm0, %v4753_v38 }
 0xc8b   :  { %4347 = vmatprep.subr.bf16.mxu1 %v4753_v38 }
 0xc8c   :  { %v2201_v56 = vrot.slane %v2200_v10, 2 }
 0xc8e   :  { %v2202_v54 = vadd.f32 %v2201_v56, %v2200_v10 }
 0xc90   :  { %v2203_v60 = vrot.slane %v2202_v54, 1 }
 0xc91   :  { %4338 = vmatmul.mubr.msk.bf16.vlgmr.msra.gmra.mrb[48].mxu1 %vm884_vm1, %v2360_v1 }
 0xc92   :  { %v2204_v2 = vadd.f32 %v2203_v60, %v2202_v54  ;;  %4349 = vmatprep.mubr.msk.bf16.mxu1 %vm4754_vm0, %v4753_v38 }
 0xc94   :  { %v5258_v4 = vadd.f32 %v2204_v2, %v5208_v20 }
 0xd4d   :  { %v5260_v7 = vpop.f32.mrb[56].mxu0 }
 0xd4e   :  { %v4321_v47 = vpop.f32.mrb[57].mxu0 }
 0xd4f   :  { %v2255_v9 = vpop.f32.mrb[58].mxu0 }
 0xd50   :  { %v4322_v5 = vpop.f32.mrb[59].mxu0 }
 0xd55   :  { %v2353_v11 = vpop.f32.mrb[60].mxu0 }
 0xd56   :  { %v4333_v3 = vpop.f32.mrb[61].mxu0  ;;  %v2409_v55 = vsel %vm977_vm3, %v2353_v11, -inf }
 0xd57   :  { %2410 = vmax.xlane.f32.xlu0 %v2409_v55  ;;  %v2356_v41 = vpop.f32.mrb[62].mxu0 }
 0xd58   :  { %v4334_v15 = vpop.f32.mrb[63].mxu0 }
 0xd5c   :  { %v5263_v17 = vpop.f32.mrb[44].mxu1 }
 0xd5d   :  { %v4118_v57 = vpack.c.bf16 %v5263_v17, %v5260_v7  ;;  %v4327_v19 = vpop.f32.mrb[45].mxu1 }
 0xd5e   :  { %v2304_v20 = vpop.f32.mrb[46].mxu1 }
 0xd5f   :  { %v4328_v22 = vpop.f32.mrb[47].mxu1 }
 0xd64   :  { %v2403_v23 = vpop.f32.mrb[48].mxu1 }
 0xd65   :  { %v4339_v24 = vpop.f32.mrb[49].mxu1  ;;  %v2412_v35 = vsel %vm977_vm3, %v2403_v23, -inf }
 0xd66   :  { %2413 = vmax.xlane.f32.xlu1 %v2412_v35  ;;  %v2406_v43 = vpop.f32.mrb[50].mxu1 }
 0xd67   :  { %v4340_v28 = vpop.f32.mrb[51].mxu1 }
 0xd77   :  { %2449 = vrot.lane.b32.xlu1 %v5126_v13, %s4742_s14 }
 0xd7b   :  { %2549 = vrot.lane.b32.xlu1 %v5110_v53, %s4756_s21 }
 0xd7f   :  { %2599 = vrot.lane.b32.xlu1 %v5140_v18, %s4756_s21 }
 0xd83   :  { %2597 = vrot.lane.b32.xlu1 %v5156_v32, %s4756_s21 }
 0xde4   :  { %v2411_v31 = vpop.xlane.xlu0 %2410 }
 0xde5   :  { %v2415_v6 = vsub.f32 %v2353_v11, %v2411_v31 }
 0xde7   :  { %v2417_v34 = vmul.f32 1.442695, %v2415_v6 }
 0xde9   :  { %4655 = vpow2.f32 %v2417_v34 }
 0xdf3   :  { %v4656_v37 = vpop.eup %4655  ;;  %v2414_v40 = vpop.xlane.xlu1 %2413 }
 0xdf4   :  { %v2416_v48 = vsub.f32 %v2403_v23, %v2414_v40  ;;  %v2421_v51 = vsel %vm977_vm3, %v4656_v37, 0.0 }
 0xdf5   :  { %2422 = vadd.xlane.f32.xlu0 %v2421_v51 }
 0xdf6   :  { %v2419_v12 = vmul.f32 1.442695, %v2416_v48 }
 0xdf7   :  { %v2450_v10 = vpop.permute.xlu1 %2449 }
 0xdf8   :  { %4657 = vpow2.f32 %v2419_v12  ;;  %v2455_v53 = vsel %vm1021_vm2, %v2450_v10, 0 }
 0xdf9   :  { %4342 = vmatpush3.bf16.msra.mxu0 %v2455_v53 }
 0xdfa   :  { %4353 = vmatprep.subr.bf16.mxu0 %v4753_v38 }
 0xdfb   :  { %v2550_v60 = vpop.permute.xlu1 %2549 }
 0xdfc   :  { %v2555_v11 = vsel %vm884_vm1, %v2550_v60, 0 }
 0xdff   :  { %v2600_v43 = vpop.permute.xlu1 %2599 }
 0xe00   :  { %v2605_v34 = vsel %vm884_vm1, %v2600_v43, 0 }
 0xe02   :  { %v4658_v18 = vpop.eup %4657 }
 0xe03   :  { %v2424_v32 = vsel %vm977_vm3, %v4658_v18, 0.0  ;;  %v2598_v48 = vpop.permute.xlu1 %2597 }
 0xe04   :  { %2425 = vadd.xlane.f32.xlu0 %v2424_v32 }
 0xe1a   :  { %2497 = vrot.lane.b32.xlu0 %v5154_v29, %s4742_s14 }
 0xe1e   :  { %2547 = vrot.lane.b32.xlu0 %v5129_v14, %s4756_s21 }
 0xe82   :  { %v2423_v56 = vpop.xlane.xlu0 %2422 }
 0xe83   :  { %4659 = vrcp.f32 %v2423_v56 }
 0xe8d   :  { %v4660_v54 = vpop.eup %4659 }
 0xe8e   :  { %v2428_v1 = vmul.f32 %v4660_v54, %v4656_v37 }
 0xe90   :  { %v2431_v2 = vsel %vm977_vm3, %v2428_v1, 0.0  ;;  %v2447_v47 = vpack.c.bf16 %v2428_v1, %v2428_v1 }
 0xe91   :  { %v2432_v9 = vrot.slane %v2431_v2, 4  ;;  %v2426_v5 = vpop.xlane.xlu0 %2425 }
 0xe92   :  { %4661 = vrcp.f32 %v2426_v5  ;;  %4344 = vmatmul.mubr.msk.bf16.vlgmr.msra.gmra.mrb[64].mxu0 %vm977_vm3, %v2447_v47 }
 0xe93   :  { %v2433_v3 = vadd.f32 %v2432_v9, %v2431_v2  ;;  %4354 = vmatpush3.bf16.xpose.msra.mxu0 %v2555_v11  ;;  %4355 = vmatprep.mubr.msk.bf16.mxu0 %vm4754_vm0, %v4753_v38 }
 0xe94   :  { %4365 = vmatprep.subr.bf16.mxu0 %v4753_v38 }
 0xe95   :  { %v2434_v14 = vrot.slane %v2433_v3, 2  ;;  %v2498_v55 = vpop.permute.xlu0 %2497 }
 0xe96   :  { %v2503_v41 = vsel %vm1021_vm2, %v2498_v55, 0 }
 0xe97   :  { %v2435_v15 = vadd.f32 %v2434_v14, %v2433_v3  ;;  %4348 = vmatpush3.bf16.msra.mxu1 %v2503_v41 }
 0xe98   :  { %4359 = vmatprep.subr.bf16.mxu1 %v4753_v38 }
 0xe99   :  { %v2436_v19 = vrot.slane %v2435_v15, 1  ;;  %v2548_v20 = vpop.permute.xlu0 %2547 }
 0xe9a   :  { %4356 = vmatmul.mubr.msk.bf16.vlgmr.msra.gmra.mrb[68].mxu0 %vm884_vm1, %v2548_v20 }
 0xe9b   :  { %v2437_v22 = vadd.f32 %v2436_v19, %v2435_v15  ;;  %4367 = vmatprep.mubr.msk.bf16.mxu0 %vm4754_vm0, %v4753_v38 }
 0xe9c   :  { %v4662_v23 = vpop.eup %4661 }
 0xe9d   :  { %v5296_v24 = vadd.f32 %v2437_v22, %v5246_v33  ;;  %v2430_v35 = vmul.f32 %v4662_v23, %v4658_v18 }
 0xe9f   :  { %v2438_v28 = vsel %vm977_vm3, %v2430_v35, 0.0  ;;  %v2448_v31 = vpack.c.bf16 %v2430_v35, %v2430_v35 }
 0xea0   :  { %v2439_v6 = vrot.slane %v2438_v28, 4 }
 0xea1   :  { %4350 = vmatmul.mubr.msk.bf16.vlgmr.msra.gmra.mrb[52].mxu1 %vm977_vm3, %v2448_v31 }
 0xea2   :  { %v2440_v37 = vadd.f32 %v2439_v6, %v2438_v28  ;;  %4360 = vmatpush3.bf16.xpose.msra.mxu1 %v2605_v34  ;;  %4361 = vmatprep.mubr.msk.bf16.mxu1 %vm4754_vm0, %v4753_v38 }
 0xea3   :  { %4371 = vmatprep.subr.bf16.mxu1 %v4753_v38 }
 0xea4   :  { %v2441_v40 = vrot.slane %v2440_v37, 2 }
 0xea6   :  { %v2442_v33 = vadd.f32 %v2441_v40, %v2440_v37 }
 0xea8   :  { %v2443_v51 = vrot.slane %v2442_v33, 1 }
 0xea9   :  { %4362 = vmatmul.mubr.msk.bf16.vlgmr.msra.gmra.mrb[56].mxu1 %vm884_vm1, %v2598_v48 }
 0xeaa   :  { %v2444_v12 = vadd.f32 %v2443_v51, %v2442_v33  ;;  %4373 = vmatprep.mubr.msk.bf16.mxu1 %vm4754_vm0, %v4753_v38 }
 0xeac   :  { %v5308_v10 = vadd.f32 %v2444_v12, %v5258_v4 }
 0xf65   :  { %v2491_v53 = vpop.f32.mrb[64].mxu0 }
 0xf66   :  { %v4345_v18 = vpop.f32.mrb[65].mxu0 }
 0xf67   :  { %v2494_v32 = vpop.f32.mrb[66].mxu0 }
 0xf68   :  { %v4346_v56 = vpop.f32.mrb[67].mxu0 }
 0xf6d   :  { %v2591_v54 = vpop.f32.mrb[68].mxu0 }
 0xf6e   :  { %v4357_v1 = vpop.f32.mrb[69].mxu0  ;;  %v2647_v60 = vsel %vm977_vm3, %v2591_v54, -inf }
 0xf6f   :  { %2648 = vmax.xlane.f32.xlu0 %v2647_v60  ;;  %v2594_v2 = vpop.f32.mrb[70].mxu0 }
 0xf70   :  { %v4358_v47 = vpop.f32.mrb[71].mxu0 }
 0xf74   :  { %v2539_v9 = vpop.f32.mrb[52].mxu1 }
 0xf75   :  { %v4119_v5 = vpack.c.bf16 %v2539_v9, %v2491_v53  ;;  %v4351_v11 = vpop.f32.mrb[53].mxu1 }
 0xf76   :  { %v2542_v3 = vpop.f32.mrb[54].mxu1  ;;  %v4559_v11 = vld [vmem:[#allocation7] ss:$8 sps:$4 sm:$0xff]  }
 0xf77   :  { %v4352_v14 = vpop.f32.mrb[55].mxu1  ;;  %v4561_v3 = vld [vmem:[#allocation7 + $0x4] ss:$8 sps:$4 sm:$0xff]  }
 0xf78   :  { %v4564_v14 = vld [vmem:[#allocation7 + $0x14] ss:$8 sps:$4 sm:$0xff]  }
 0xf7c   :  { %v2641_v38 = vpop.f32.mrb[56].mxu1 }
 0xf7d   :  { %v4363_v55 = vpop.f32.mrb[57].mxu1  ;;  %v2650_v4 = vsel %vm977_vm3, %v2641_v38, -inf }
 0xf7e   :  { %2651 = vmax.xlane.f32.xlu1 %v2650_v4  ;;  %v2644_v41 = vpop.f32.mrb[58].mxu1  ;;  %v4565_v55 = vld [vmem:[#allocation7 + $0x20] ss:$8 sps:$4 sm:$0xff]   ;;  %v4568_v4 = vld [vmem:[#allocation7 + $0x30] ss:$8 sps:$4 sm:$0xff]  }
 0xf7f   :  { %v4364_v15 = vpop.f32.mrb[59].mxu1  ;;  %v4573_v41 = vld [vmem:[#allocation7 + $0x44] ss:$8 sps:$4 sm:$0xff]  }
 0xf80   :  { %v4571_v15 = vld [vmem:[#allocation7 + $0x40] ss:$8 sps:$4 sm:$0xff]  }
 0xf8f   :  { %2687 = vrot.lane.b32.xlu1 %v5126_v13, %s4756_s21 }
 0xf93   :  { %2830 = vrot.lane.b32.xlu1 %v4118_v57, %s4756_s21 }
 0xf97   :  { %2804 = vrot.lane.b32.xlu1 %v4114_v44, %s4756_s21 }
 0xf9b   :  { %2811 = vrot.lane.b32.xlu1 %v4115_v62, %s4742_s14 }
 0xf9f   :  { %2818 = vrot.lane.b32.xlu1 %v4116_v52, %s4755_s2 }
 0xffc   :  { %v2649_v13 = vpop.xlane.xlu0 %2648 }
 0xffd   :  { %v2653_v19 = vsub.f32 %v2591_v54, %v2649_v13  ;;  %v4576_v13 = vld [vmem:[#allocation7 + $0x54] ss:$8 sps:$4 sm:$0xff]  }
 0xfff   :  { %v2655_v20 = vmul.f32 1.442695, %v2653_v19  ;;  %v4574_v19 = vld [vmem:[#allocation7 + $0x50] ss:$8 sps:$4 sm:$0xff]  }
0x1001   :  { %4663 = vpow2.f32 %v2655_v20  ;;  %v4579_v20 = vld [vmem:[#allocation7 + $0x64] ss:$8 sps:$4 sm:$0xff]  }
0x100b   :  { %v4664_v7 = vpop.eup %4663  ;;  %v2652_v17 = vpop.xlane.xlu1 %2651 }
0x100c   :  { %v2654_v57 = vsub.f32 %v2641_v38, %v2652_v17  ;;  %v2659_v30 = vsel %vm977_vm3, %v4664_v7, 0.0  ;;  %v4562_v38 = vld [vmem:[#allocation7 + $0x10] ss:$8 sps:$4 sm:$0xff]   ;;  %v4582_v17 = vld [vmem:[#allocation7 + $0x74] ss:$8 sps:$4 sm:$0xff]  }
0x100d   :  { %2660 = vadd.xlane.f32.xlu0 %v2659_v30  ;;  %v4585_v30 = vld [vmem:[#allocation7 + $0x84] ss:$8 sps:$4 sm:$0xff]  }
0x100e   :  { %v2657_v42 = vmul.f32 1.442695, %v2654_v57  ;;  %v4580_v57 = vld [vmem:[#allocation7 + $0x70] ss:$8 sps:$4 sm:$0xff]  }
0x100f   :  { %v2688_v44 = vpop.permute.xlu1 %2687 }
0x1010   :  { %4665 = vpow2.f32 %v2657_v42  ;;  %v2693_v63 = vsel %vm1021_vm2, %v2688_v44, 0  ;;  %v4583_v42 = vld [vmem:[#allocation7 + $0x80] ss:$8 sps:$4 sm:$0xff]   ;;  %v4588_v44 = vld [vmem:[#allocation7 + $0x94] ss:$8 sps:$4 sm:$0xff]  }
0x1011   :  { %4366 = vmatpush3.bf16.msra.mxu0 %v2693_v63  ;;  %v4586_v63 = vld [vmem:[#allocation7 + $0x90] ss:$8 sps:$4 sm:$0xff]  }
0x1012   :  { %3068 = vmatprep.subr.bf16.mxu0 %v4561_v3 }
0x101a   :  { %v4666_v59 = vpop.eup %4665 }
0x101b   :  { %v2662_v62 = vsel %vm977_vm3, %v4666_v59, 0.0 }
0x101c   :  { %2663 = vadd.xlane.f32.xlu0 %v2662_v62  ;;  %v4589_v62 = vld [vmem:[#allocation7 + $0xa0] ss:$8 sps:$4 sm:$0xff]  }
0x1032   :  { %2735 = vrot.lane.b32.xlu0 %v5154_v29, %s4756_s21 }
0x1036   :  { %2837 = vrot.lane.b32.xlu0 %v4119_v5, %s4742_s14 }
0x109a   :  { %v2661_v8 = vpop.xlane.xlu0 %2660 }
0x109b   :  { %4667 = vrcp.f32 %v2661_v8  ;;  %v4594_v8 = vld [vmem:[#allocation7 + $0xb4] ss:$8 sps:$4 sm:$0xff]  }
0x10a5   :  { %v4668_v58 = vpop.eup %4667 }
0x10a6   :  { %v2666_v52 = vmul.f32 %v4668_v58, %v4664_v7  ;;  %v4577_v7 = vld [vmem:[#allocation7 + $0x60] ss:$8 sps:$4 sm:$0xff]   ;;  %v4592_v58 = vld [vmem:[#allocation7 + $0xb0] ss:$8 sps:$4 sm:$0xff]  }
0x10a8   :  { %v2669_v22 = vsel %vm977_vm3, %v2666_v52, 0.0  ;;  %v2685_v23 = vpack.c.bf16 %v2666_v52, %v2666_v52  ;;  %v4597_v52 = vld [vmem:[#allocation7 + $0xc4] ss:$8 sps:$4 sm:$0xff]  }
0x10a9   :  { %v2664_v35 = vpop.xlane.xlu0 %2663  ;;  %v2670_v43 = vrot.slane %v2669_v22, 4 }
0x10aa   :  { %4669 = vrcp.f32 %v2664_v35  ;;  %4368 = vmatmul.mubr.msk.bf16.vlgmr.msra.gmra.mrb[72].mxu0 %vm977_vm3, %v2685_v23  ;;  %v4600_v23 = vld [vmem:[#allocation7 + $0xd4] ss:$8 sps:$4 sm:$0xff]   ;;  %v4598_v35 = vld [vmem:[#allocation7 + $0xd0] ss:$8 sps:$4 sm:$0xff]  }
0x10ab   :  { %v2671_v31 = vadd.f32 %v2670_v43, %v2669_v22  ;;  %3069 = vmatpush1.bf16.msra.mxu0 %v4559_v11  ;;  %v4595_v22 = vld [vmem:[#allocation7 + $0xc0] ss:$8 sps:$4 sm:$0xff]   ;;  %v4603_v43 = vld [vmem:[#allocation7 + $0xe4] ss:$8 sps:$4 sm:$0xff]  }
0x10ac   :  { %3070 = vmatprep.subr.bf16.mxu0 %v4564_v14 }
0x10ad   :  { %v2736_v28 = vpop.permute.xlu0 %2735  ;;  %v2672_v29 = vrot.slane %v2671_v31, 2 }
0x10ae   :  { %v2741_v6 = vsel %vm1021_vm2, %v2736_v28, 0  ;;  %v4601_v28 = vld [vmem:[#allocation7 + $0xe0] ss:$8 sps:$4 sm:$0xff]  }
0x10af   :  { %4372 = vmatpush3.bf16.msra.mxu1 %v2741_v6  ;;  %v2673_v40 = vadd.f32 %v2672_v29, %v2671_v31  ;;  %3071 = vmatpush1.bf16.msra.mxu0 %v4562_v38  ;;  %v4606_v31 = vld [vmem:[#allocation7 + $0xf4] ss:$8 sps:$4 sm:$0xff]   ;;  %v4604_v6 = vld [vmem:[#allocation7 + $0xf0] ss:$8 sps:$4 sm:$0xff]  }
0x10b1   :  { %v2674_v12 = vrot.slane %v2673_v40, 1 }
0x10b3   :  { %v2675_v32 = vadd.f32 %v2674_v12, %v2673_v40 }
0x10b4   :  { %v4670_v34 = vpop.eup %4669 }
0x10b5   :  { %v2668_v37 = vmul.f32 %v4670_v34, %v4666_v59  ;;  %v2683_v1 = vadd.f32 %v2675_v32, %v5296_v24  ;;  %v4567_v24 = vld [vmem:[#allocation7 + $0x24] ss:$8 sps:$4 sm:$0xff]  }
0x10b6   :  { %3072 = vmatprep.subr.bf16.mxu0 %v4567_v24  ;;  %v4591_v59 = vld [vmem:[#allocation7 + $0xa4] ss:$8 sps:$4 sm:$0xff]  }
0x10b7   :  { %v2676_v33 = vsel %vm977_vm3, %v2668_v37, 0.0  ;;  %v2686_v48 = vpack.c.bf16 %v2668_v37, %v2668_v37  ;;  %v2785_v47 = vmul.f32 0.125, %v2683_v1  ;;  %3073 = vmatpush1.bf16.msra.mxu0 %v4565_v55  ;;  %v4675_v24 = vld [vmem:[%s5536_s0] sm:$0xff] }
0x10b8   :  { %v2677_v51 = vrot.slane %v2676_v33, 4 }
0x10b9   :  { %4374 = vmatmul.mubr.msk.bf16.vlgmr.msra.gmra.mrb[60].mxu1 %vm977_vm3, %v2686_v48 }
0x10ba   :  { %v2678_v53 = vadd.f32 %v2677_v51, %v2676_v33 }
0x10bc   :  { %v2679_v18 = vrot.slane %v2678_v53, 2 }
0x10be   :  { %v2680_v56 = vadd.f32 %v2679_v18, %v2678_v53  ;;  %v2831_v18 = vpop.permute.xlu1 %2830 }
0x10bf   :  { %v2858_v1 = vsel %vm884_vm1, %v4117_v27, %v2831_v18  ;;  %v2905_v27 = vrot.slane %v2896_v16, %v5108_v50 }
0x10c0   :  { %v2681_v54 = vrot.slane %v2680_v56, 1 }
0x10c2   :  { %v2682_v60 = vadd.f32 %v2681_v54, %v2680_v56  ;;  %v2805_v32 = vpop.permute.xlu1 %2804  ;;  %v2838_v54 = vpop.permute.xlu0 %2837 }
0x10c4   :  { %v2684_v2 = vadd.f32 %v2682_v60, %v5308_v10  ;;  %v4570_v10 = vld [vmem:[#allocation7 + $0x34] ss:$8 sps:$4 sm:$0xff]  }
0x10c5   :  { %3074 = vmatprep.subr.bf16.mxu0 %v4570_v10 }
0x10c6   :  { %v2786_v9 = vmul.f32 0.125, %v2684_v2  ;;  %3075 = vmatpush1.bf16.msra.mxu0 %v4568_v4  ;;  %v2812_v56 = vpop.permute.xlu1 %2811  ;;  %v2848_v2 = vsel %vm884_vm1, %v4113_v26, %v2805_v32 }
0x10c7   :  { %3076 = vmatprep.subr.bf16.mxu0 %v4573_v41  ;;  %v4676_v41 = vld [vmem:[%s5536_s0 + $0x8] sm:$0xff] }
0x10c8   :  { %v2790_v5 = vsel %vm2789_vm4, %v2786_v9, %v2785_v47  ;;  %v2860_v47 = vsel %vm2849_vm6, %v2858_v1, %v2838_v54 }
0x10c9   :  { %2793 = vst.msk [vmem:[%s5548_s12] sm:$0x3] %vm2792_vm5, %v2790_v5  ;;  %v2851_v5 = vsel %vm2849_vm6, %v2848_v2, %v2812_v56 }
0x10ca   :  { %3077 = vmatpush1.bf16.msra.mxu0 %v4571_v15  ;;  %v2819_v60 = vpop.permute.xlu1 %2818 }
0x10cb   :  { %3078 = vmatprep.subr.bf16.mxu0 %v4576_v13  ;;  %v2854_v3 = vsel %vm2852_vm7, %v2851_v5, %v2819_v60 }
0x10ce   :  { %3079 = vmatpush1.bf16.msra.mxu0 %v4574_v19  ;;  %v4677_v19 = vld [vmem:[%s5536_s0 + $0x10] sm:$0xff] }
0x10cf   :  { %3080 = vmatprep.subr.bf16.mxu0 %v4579_v20 }
0x10d2   :  { %3081 = vmatpush1.bf16.msra.mxu0 %v4577_v7  ;;  %v4678_v7 = vld [vmem:[%s5536_s0 + $0x18] sm:$0xff] }
0x10d3   :  { %3082 = vmatprep.subr.bf16.mxu0 %v4582_v17 }
0x10d6   :  { %3083 = vmatpush1.bf16.msra.mxu0 %v4580_v57 }
0x10d7   :  { %3084 = vmatprep.subr.bf16.mxu0 %v4585_v30 }
0x10da   :  { %3085 = vmatpush1.bf16.msra.mxu0 %v4583_v42 }
0x10db   :  { %3086 = vmatprep.subr.bf16.mxu0 %v4588_v44 }
0x10de   :  { %3087 = vmatpush1.bf16.msra.mxu0 %v4586_v63 }
0x10df   :  { %3088 = vmatprep.subr.bf16.mxu0 %v4591_v59 }
0x10e2   :  { %3089 = vmatpush1.bf16.msra.mxu0 %v4589_v62 }
0x10e3   :  { %3090 = vmatprep.subr.bf16.mxu0 %v4594_v8 }
0x10e6   :  { %3091 = vmatpush1.bf16.msra.mxu0 %v4592_v58 }
0x10e7   :  { %3092 = vmatprep.subr.bf16.mxu0 %v4597_v52 }
0x10ea   :  { %3093 = vmatpush1.bf16.msra.mxu0 %v4595_v22 }
0x10eb   :  { %3094 = vmatprep.subr.bf16.mxu0 %v4600_v23 }
0x10ee   :  { %3095 = vmatpush1.bf16.msra.mxu0 %v4598_v35 }
0x10ef   :  { %3096 = vmatprep.subr.bf16.mxu0 %v4603_v43 }
0x10f2   :  { %3097 = vmatpush1.bf16.msra.mxu0 %v4601_v28 }
0x10f3   :  { %3098 = vmatprep.subr.bf16.mxu0 %v4606_v31 }
0x10f6   :  { %3099 = vmatpush1.bf16.msra.mxu0 %v4604_v6 }
0x117d   :  { %v2729_v29 = vpop.f32.mrb[72].mxu0 }
0x117e   :  { %v4369_v34 = vpop.f32.mrb[73].mxu0 }
0x117f   :  { %v2732_v37 = vpop.f32.mrb[74].mxu0 }
0x1180   :  { %v4370_v40 = vpop.f32.mrb[75].mxu0 }
0x118c   :  { %v2777_v33 = vpop.f32.mrb[60].mxu1 }
0x118d   :  { %v4120_v48 = vpack.c.bf16 %v2777_v33, %v2729_v29  ;;  %v4375_v51 = vpop.f32.mrb[61].mxu1 }
0x118e   :  { %v2780_v12 = vpop.f32.mrb[62].mxu1  ;;  %v3112_v51 = vld [vmem:[%s5542_s6] sm:$0x3] }
0x118f   :  { %v4376_v53 = vpop.f32.mrb[63].mxu1  ;;  %2844 = vrot.lane.b32.xlu0 %v4120_v48, %s4755_s2  ;;  %v3111_v48 = vld [vmem:[%s5541_s5] sm:$0x3]  ;;  %v5385_v32 = vrot.slane %v3112_v51, %v4897_v46  ;;  %v5388_v56 = vrot.slane %v3112_v51, %v5108_v50 }
0x1190   :  { %v5379_v12 = vrot.slane %v3111_v48, %v4897_v46  ;;  %v5382_v53 = vrot.slane %v3111_v48, %v5108_v50 }
0x1201   :  { %v2845_v9 = vpop.permute.xlu0 %2844 }
0x1202   :  { %v2862_v11 = vsel %vm2852_vm7, %v2860_v47, %v2845_v9 }
0x1203   :  { %3100 = vmatprep.mubr.bf16.mxu0 %v2862_v11 }
0x1204   :  { %3101 = vmatmul.mubr.bf16.vlgmr.msra.gmra.mrb[76].mxu0 %v2854_v3 }
0x12d7   :  { %v3102_v14 = vpop.f32.mrb[76].mxu0 }
0x12d8   :  { %v3103_v38 = vadd.f32 %v3102_v14, %v2901_v61  ;;  %v3104_v21 = vpop.f32.mrb[77].mxu0 }
0x12d9   :  { %v3105_v25 = vadd.f32 %v3104_v21, %v2905_v27  ;;  %v3106_v26 = vpop.f32.mrb[78].mxu0 }
0x12da   :  { %v3113_v55 = vadd.f32 %v4675_v24, %v3103_v38  ;;  %v3107_v10 = vadd.f32 %v3106_v26, %v2901_v61  ;;  %v3108_v4 = vpop.f32.mrb[79].mxu0 }
0x12db   :  { %v3114_v15 = vadd.f32 %v4676_v41, %v3105_v25  ;;  %v3109_v13 = vadd.f32 %v3108_v4, %v2905_v27 }
0x12dc   :  { %v3115_v20 = vadd.f32 %v4677_v19, %v3107_v10 }
0x12dd   :  { %v3116_v17 = vadd.f32 %v4678_v7, %v3109_v13  ;;  %v3117_v57 = vadd.f32 %v3114_v15, %v3113_v55 }
0x12df   :  { %3118 = vadd.xlane.f32.xlu0 %v3117_v57  ;;  %v3120_v30 = vadd.f32 %v3116_v17, %v3115_v20 }
0x12e1   :  { %3121 = vadd.xlane.f32.xlu1 %v3120_v30 }
0x136c   :  { %v3119_v42 = vpop.xlane.xlu0 %3118 }
0x136d   :  { %v3124_v44 = vmul.f32 0.00390625, %v3119_v42 }
0x136e   :  { %v3122_v63 = vpop.xlane.xlu1 %3121 }
0x136f   :  { %v3126_v59 = vsub.f32 %v3113_v55, %v3124_v44  ;;  %v3127_v62 = vsub.f32 %v3114_v15, %v3124_v44  ;;  %v3125_v8 = vmul.f32 0.00390625, %v3122_v63 }
0x1371   :  { %v3128_v58 = vsub.f32 %v3115_v20, %v3125_v8  ;;  %v3129_v52 = vsub.f32 %v3116_v17, %v3125_v8  ;;  %v3130_v22 = vmul.f32 %v3126_v59, %v3126_v59  ;;  %v3131_v23 = vmul.f32 %v3127_v62, %v3127_v62 }
0x1373   :  { %v3134_v35 = vadd.f32 %v3131_v23, %v3130_v22  ;;  %v3132_v43 = vmul.f32 %v3128_v58, %v3128_v58  ;;  %v3133_v28 = vmul.f32 %v3129_v52, %v3129_v52 }
0x1375   :  { %3135 = vadd.xlane.f32.xlu0 %v3134_v35  ;;  %v3137_v31 = vadd.f32 %v3133_v28, %v3132_v43 }
0x1379   :  { %3138 = vadd.xlane.f32.xlu0 %v3137_v31 }
0x1402   :  { %v3136_v6 = vpop.xlane.xlu0 %3135 }
0x1403   :  { %v3140_v29 = vmul.f32 0.00390625, %v3136_v6 }
0x1405   :  { %v3142_v34 = vadd.f32 1e-05, %v3140_v29 }
0x1406   :  { %v3139_v37 = vpop.xlane.xlu0 %3138 }
0x1407   :  { %4671 = vrsqrt.f32 %v3142_v34  ;;  %v3141_v40 = vmul.f32 0.00390625, %v3139_v37 }
0x1409   :  { %v3143_v33 = vadd.f32 1e-05, %v3141_v40 }
0x140b   :  { %4673 = vrsqrt.f32 %v3143_v33 }
0x1411   :  { %v4672_v18 = vpop.eup %4671 }
0x1412   :  { %v3146_v54 = vmul.f32 %v4672_v18, %v3126_v59  ;;  %v3147_v1 = vmul.f32 %v4672_v18, %v3127_v62 }
0x1414   :  { %v3161_v60 = vmul.f32 %v5379_v12, %v3146_v54  ;;  %v3162_v2 = vmul.f32 %v5382_v53, %v3147_v1 }
0x1415   :  { %v4674_v47 = vpop.eup %4673 }
0x1416   :  { %v5393_v9 = vadd.f32 %v5385_v32, %v3161_v60  ;;  %v5396_v5 = vadd.f32 %v5388_v56, %v3162_v2  ;;  %v3148_v11 = vmul.f32 %v4674_v47, %v3128_v58  ;;  %v3149_v3 = vmul.f32 %v4674_v47, %v3129_v52 }
0x1418   :  { %v3163_v16 = vmul.f32 %v5379_v12, %v3148_v11  ;;  %v3164_v61 = vmul.f32 %v5382_v53, %v3149_v3 }
0x141a   :  { %v5401_v27 = vadd.f32 %v5385_v32, %v3163_v16  ;;  %v5404_v14 = vadd.f32 %v5388_v56, %v3164_v61 }
0x141b   :  { %4731 = dma.done.wait [#allocation4], 16384 }
0x141c   :  { %4732 = vsyncadd [#allocation4], 4294950912  ;;  %v5408_v38 = vpack.c.bf16 %v5404_v14, %v5396_v5  ;;  %v3187_v21 = vld [vmem:[#allocation2 + $0x8] sm:$0xff]  ;;  %v3189_v25 = vld [vmem:[#allocation2 + $0x18] sm:$0xff] }
0x141d   :  { %v3186_v26 = vld [vmem:[#allocation2] sm:$0xff]  ;;  %3356 = vmatprep.subr.bf16.mxu1 %v3187_v21  ;;  %3399 = vmatprep.subr.bf16.mxu0 %v3189_v25  ;;  %v3188_v24 = vld [vmem:[#allocation2 + $0x10] sm:$0xff]  ;;  %v3195_v55 = vld [vmem:[#allocation2 + $0x48] sm:$0xff] }
0x141e   :  { %3388 = vmatprep.mubr.bf16.mxu1 %v5408_v38  ;;  %3431 = vmatprep.mubr.bf16.mxu0 %v5408_v38  ;;  %v3197_v10 = vld [vmem:[#allocation2 + $0x58] sm:$0xff]  ;;  %v3194_v4 = vld [vmem:[#allocation2 + $0x40] sm:$0xff]  ;;  %v3196_v41 = vld [vmem:[#allocation2 + $0x50] sm:$0xff] }
0x141f   :  { %3357 = vmatpush1.bf16.msra.mxu1 %v3186_v26  ;;  %3400 = vmatpush1.bf16.msra.mxu0 %v3188_v24  ;;  %v3203_v15 = vld [vmem:[#allocation2 + $0x88] sm:$0xff]  ;;  %v3205_v13 = vld [vmem:[#allocation2 + $0x98] sm:$0xff]  ;;  %v3202_v19 = vld [vmem:[#allocation2 + $0x80] sm:$0xff] }
0x1420   :  { %3358 = vmatprep.subr.bf16.mxu1 %v3195_v55  ;;  %3401 = vmatprep.subr.bf16.mxu0 %v3197_v10  ;;  %v3204_v20 = vld [vmem:[#allocation2 + $0x90] sm:$0xff]  ;;  %v3211_v7 = vld [vmem:[#allocation2 + $0xc8] sm:$0xff]  ;;  %v3213_v17 = vld [vmem:[#allocation2 + $0xd8] sm:$0xff] }
0x1421   :  { %v3210_v57 = vld [vmem:[#allocation2 + $0xc0] sm:$0xff]  ;;  %v3212_v30 = vld [vmem:[#allocation2 + $0xd0] sm:$0xff]  ;;  %v3219_v42 = vld [vmem:[#allocation2 + $0x108] sm:$0xff] }
0x1422   :  { %v3221_v44 = vld [vmem:[#allocation2 + $0x118] sm:$0xff]  ;;  %v3218_v63 = vld [vmem:[#allocation2 + $0x100] sm:$0xff]  ;;  %v3220_v59 = vld [vmem:[#allocation2 + $0x110] sm:$0xff] }
0x1423   :  { %3359 = vmatpush1.bf16.msra.mxu1 %v3194_v4  ;;  %3402 = vmatpush1.bf16.msra.mxu0 %v3196_v41  ;;  %v3227_v62 = vld [vmem:[#allocation2 + $0x148] sm:$0xff]  ;;  %v3229_v8 = vld [vmem:[#allocation2 + $0x158] sm:$0xff]  ;;  %v3226_v58 = vld [vmem:[#allocation2 + $0x140] sm:$0xff] }
0x1424   :  { %3360 = vmatprep.subr.bf16.mxu1 %v3203_v15  ;;  %3403 = vmatprep.subr.bf16.mxu0 %v3205_v13  ;;  %v3228_v52 = vld [vmem:[#allocation2 + $0x150] sm:$0xff]  ;;  %v3235_v22 = vld [vmem:[#allocation2 + $0x188] sm:$0xff]  ;;  %v3237_v23 = vld [vmem:[#allocation2 + $0x198] sm:$0xff] }
0x1425   :  { %v3234_v35 = vld [vmem:[#allocation2 + $0x180] sm:$0xff]  ;;  %v3236_v43 = vld [vmem:[#allocation2 + $0x190] sm:$0xff]  ;;  %v3243_v28 = vld [vmem:[#allocation2 + $0x1c8] sm:$0xff] }
0x1426   :  { %v3245_v31 = vld [vmem:[#allocation2 + $0x1d8] sm:$0xff]  ;;  %v3242_v6 = vld [vmem:[#allocation2 + $0x1c0] sm:$0xff]  ;;  %v3244_v29 = vld [vmem:[#allocation2 + $0x1d0] sm:$0xff] }
0x1427   :  { %3361 = vmatpush1.bf16.msra.mxu1 %v3202_v19  ;;  %3404 = vmatpush1.bf16.msra.mxu0 %v3204_v20  ;;  %v3251_v34 = vld [vmem:[#allocation2 + $0x208] sm:$0xff]  ;;  %v3253_v37 = vld [vmem:[#allocation2 + $0x218] sm:$0xff]  ;;  %v3250_v40 = vld [vmem:[#allocation2 + $0x200] sm:$0xff] }
0x1428   :  { %3362 = vmatprep.subr.bf16.mxu1 %v3211_v7  ;;  %3405 = vmatprep.subr.bf16.mxu0 %v3213_v17  ;;  %v3252_v33 = vld [vmem:[#allocation2 + $0x210] sm:$0xff]  ;;  %v3259_v48 = vld [vmem:[#allocation2 + $0x248] sm:$0xff]  ;;  %v3261_v51 = vld [vmem:[#allocation2 + $0x258] sm:$0xff] }
0x1429   :  { %v3258_v18 = vld [vmem:[#allocation2 + $0x240] sm:$0xff]  ;;  %v3260_v54 = vld [vmem:[#allocation2 + $0x250] sm:$0xff]  ;;  %v3267_v1 = vld [vmem:[#allocation2 + $0x288] sm:$0xff] }
0x142a   :  { %v3269_v60 = vld [vmem:[#allocation2 + $0x298] sm:$0xff]  ;;  %v3266_v2 = vld [vmem:[#allocation2 + $0x280] sm:$0xff]  ;;  %v3268_v47 = vld [vmem:[#allocation2 + $0x290] sm:$0xff] }
0x142b   :  { %3363 = vmatpush1.bf16.msra.mxu1 %v3210_v57  ;;  %3406 = vmatpush1.bf16.msra.mxu0 %v3212_v30  ;;  %v3275_v11 = vld [vmem:[#allocation2 + $0x2c8] sm:$0xff]  ;;  %v3277_v3 = vld [vmem:[#allocation2 + $0x2d8] sm:$0xff]  ;;  %v3274_v16 = vld [vmem:[#allocation2 + $0x2c0] sm:$0xff] }
0x142c   :  { %3364 = vmatprep.subr.bf16.mxu1 %v3219_v42  ;;  %3407 = vmatprep.subr.bf16.mxu0 %v3221_v44  ;;  %v3276_v61 = vld [vmem:[#allocation2 + $0x2d0] sm:$0xff]  ;;  %v3283_v21 = vld [vmem:[#allocation2 + $0x308] sm:$0xff]  ;;  %v3285_v25 = vld [vmem:[#allocation2 + $0x318] sm:$0xff] }
0x142d   :  { %v3282_v26 = vld [vmem:[#allocation2 + $0x300] sm:$0xff]  ;;  %v3284_v24 = vld [vmem:[#allocation2 + $0x310] sm:$0xff]  ;;  %v3291_v55 = vld [vmem:[#allocation2 + $0x348] sm:$0xff] }
0x142e   :  { %v3293_v10 = vld [vmem:[#allocation2 + $0x358] sm:$0xff]  ;;  %v3290_v4 = vld [vmem:[#allocation2 + $0x340] sm:$0xff]  ;;  %v3292_v41 = vld [vmem:[#allocation2 + $0x350] sm:$0xff] }
0x142f   :  { %3365 = vmatpush1.bf16.msra.mxu1 %v3218_v63  ;;  %3408 = vmatpush1.bf16.msra.mxu0 %v3220_v59  ;;  %v3299_v15 = vld [vmem:[#allocation2 + $0x388] sm:$0xff]  ;;  %v3301_v13 = vld [vmem:[#allocation2 + $0x398] sm:$0xff]  ;;  %v3298_v19 = vld [vmem:[#allocation2 + $0x380] sm:$0xff]  ;;  %v5414_v63 = vpack.c.bf16 %v5401_v27, %v5393_v9 }
0x1430   :  { %3366 = vmatprep.subr.bf16.mxu1 %v3227_v62  ;;  %3409 = vmatprep.subr.bf16.mxu0 %v3229_v8  ;;  %v3300_v20 = vld [vmem:[#allocation2 + $0x390] sm:$0xff]  ;;  %v3307_v7 = vld [vmem:[#allocation2 + $0x3c8] sm:$0xff]  ;;  %v3309_v17 = vld [vmem:[#allocation2 + $0x3d8] sm:$0xff] }
0x1431   :  { %v3306_v57 = vld [vmem:[#allocation2 + $0x3c0] sm:$0xff]  ;;  %v3308_v30 = vld [vmem:[#allocation2 + $0x3d0] sm:$0xff]  ;;  %v3191_v42 = vld [vmem:[#allocation2 + $0x28] sm:$0xff] }
0x1432   :  { %v3193_v44 = vld [vmem:[#allocation2 + $0x38] sm:$0xff]  ;;  %v3190_v59 = vld [vmem:[#allocation2 + $0x20] sm:$0xff]  ;;  %v3192_v62 = vld [vmem:[#allocation2 + $0x30] sm:$0xff] }
0x1433   :  { %3367 = vmatpush1.bf16.msra.mxu1 %v3226_v58  ;;  %3410 = vmatpush1.bf16.msra.mxu0 %v3228_v52  ;;  %v3199_v8 = vld [vmem:[#allocation2 + $0x68] sm:$0xff]  ;;  %v3201_v58 = vld [vmem:[#allocation2 + $0x78] sm:$0xff]  ;;  %v3198_v52 = vld [vmem:[#allocation2 + $0x60] sm:$0xff] }
0x1434   :  { %3368 = vmatprep.subr.bf16.mxu1 %v3235_v22  ;;  %3411 = vmatprep.subr.bf16.mxu0 %v3237_v23  ;;  %v3200_v22 = vld [vmem:[#allocation2 + $0x70] sm:$0xff]  ;;  %v3207_v23 = vld [vmem:[#allocation2 + $0xa8] sm:$0xff] }
0x1437   :  { %3369 = vmatpush1.bf16.msra.mxu1 %v3234_v35  ;;  %3412 = vmatpush1.bf16.msra.mxu0 %v3236_v43  ;;  %v3209_v35 = vld [vmem:[#allocation2 + $0xb8] sm:$0xff]  ;;  %v3206_v43 = vld [vmem:[#allocation2 + $0xa0] sm:$0xff] }
0x1438   :  { %3370 = vmatprep.subr.bf16.mxu1 %v3243_v28  ;;  %3413 = vmatprep.subr.bf16.mxu0 %v3245_v31  ;;  %v3208_v28 = vld [vmem:[#allocation2 + $0xb0] sm:$0xff]  ;;  %v3215_v31 = vld [vmem:[#allocation2 + $0xe8] sm:$0xff] }
0x143b   :  { %3371 = vmatpush1.bf16.msra.mxu1 %v3242_v6  ;;  %3414 = vmatpush1.bf16.msra.mxu0 %v3244_v29  ;;  %v3217_v6 = vld [vmem:[#allocation2 + $0xf8] sm:$0xff]  ;;  %v3214_v29 = vld [vmem:[#allocation2 + $0xe0] sm:$0xff] }
0x143c   :  { %3372 = vmatprep.subr.bf16.mxu1 %v3251_v34  ;;  %3415 = vmatprep.subr.bf16.mxu0 %v3253_v37  ;;  %v3216_v34 = vld [vmem:[#allocation2 + $0xf0] sm:$0xff]  ;;  %v3223_v37 = vld [vmem:[#allocation2 + $0x128] sm:$0xff] }
0x143f   :  { %3373 = vmatpush1.bf16.msra.mxu1 %v3250_v40  ;;  %3416 = vmatpush1.bf16.msra.mxu0 %v3252_v33  ;;  %v3225_v40 = vld [vmem:[#allocation2 + $0x138] sm:$0xff]  ;;  %v3224_v33 = vld [vmem:[#allocation2 + $0x130] sm:$0xff] }
0x1440   :  { %3374 = vmatprep.subr.bf16.mxu1 %v3259_v48  ;;  %3417 = vmatprep.subr.bf16.mxu0 %v3261_v51  ;;  %v3231_v48 = vld [vmem:[#allocation2 + $0x168] sm:$0xff]  ;;  %v3233_v51 = vld [vmem:[#allocation2 + $0x178] sm:$0xff] }
0x1443   :  { %3375 = vmatpush1.bf16.msra.mxu1 %v3258_v18  ;;  %3418 = vmatpush1.bf16.msra.mxu0 %v3260_v54  ;;  %v3230_v18 = vld [vmem:[#allocation2 + $0x160] sm:$0xff]  ;;  %v3232_v54 = vld [vmem:[#allocation2 + $0x170] sm:$0xff] }
0x1444   :  { %3376 = vmatprep.subr.bf16.mxu1 %v3267_v1  ;;  %3419 = vmatprep.subr.bf16.mxu0 %v3269_v60  ;;  %v3239_v1 = vld [vmem:[#allocation2 + $0x1a8] sm:$0xff]  ;;  %v3241_v60 = vld [vmem:[#allocation2 + $0x1b8] sm:$0xff] }
0x1447   :  { %3377 = vmatpush1.bf16.msra.mxu1 %v3266_v2  ;;  %3420 = vmatpush1.bf16.msra.mxu0 %v3268_v47  ;;  %v3238_v2 = vld [vmem:[#allocation2 + $0x1a0] sm:$0xff]  ;;  %v3240_v47 = vld [vmem:[#allocation2 + $0x1b0] sm:$0xff] }
0x1448   :  { %3378 = vmatprep.subr.bf16.mxu1 %v3275_v11  ;;  %3421 = vmatprep.subr.bf16.mxu0 %v3277_v3  ;;  %v3247_v11 = vld [vmem:[#allocation2 + $0x1e8] sm:$0xff]  ;;  %v3249_v3 = vld [vmem:[#allocation2 + $0x1f8] sm:$0xff] }
0x144b   :  { %3379 = vmatpush1.bf16.msra.mxu1 %v3274_v16  ;;  %3422 = vmatpush1.bf16.msra.mxu0 %v3276_v61  ;;  %v3246_v16 = vld [vmem:[#allocation2 + $0x1e0] sm:$0xff]  ;;  %v3248_v61 = vld [vmem:[#allocation2 + $0x1f0] sm:$0xff] }
0x144c   :  { %3380 = vmatprep.subr.bf16.mxu1 %v3283_v21  ;;  %3423 = vmatprep.subr.bf16.mxu0 %v3285_v25  ;;  %v3255_v21 = vld [vmem:[#allocation2 + $0x228] sm:$0xff]  ;;  %v3257_v25 = vld [vmem:[#allocation2 + $0x238] sm:$0xff] }
0x144f   :  { %3381 = vmatpush1.bf16.msra.mxu1 %v3282_v26  ;;  %3424 = vmatpush1.bf16.msra.mxu0 %v3284_v24  ;;  %v3254_v26 = vld [vmem:[#allocation2 + $0x220] sm:$0xff]  ;;  %v3256_v24 = vld [vmem:[#allocation2 + $0x230] sm:$0xff] }
0x1450   :  { %3382 = vmatprep.subr.bf16.mxu1 %v3291_v55  ;;  %3425 = vmatprep.subr.bf16.mxu0 %v3293_v10  ;;  %v3263_v55 = vld [vmem:[#allocation2 + $0x268] sm:$0xff]  ;;  %v3265_v10 = vld [vmem:[#allocation2 + $0x278] sm:$0xff] }
0x1453   :  { %3383 = vmatpush1.bf16.msra.mxu1 %v3290_v4  ;;  %3426 = vmatpush1.bf16.msra.mxu0 %v3292_v41  ;;  %v3262_v4 = vld [vmem:[#allocation2 + $0x260] sm:$0xff]  ;;  %v3264_v41 = vld [vmem:[#allocation2 + $0x270] sm:$0xff] }
0x1454   :  { %3384 = vmatprep.subr.bf16.mxu1 %v3299_v15  ;;  %3427 = vmatprep.subr.bf16.mxu0 %v3301_v13  ;;  %v3271_v15 = vld [vmem:[#allocation2 + $0x2a8] sm:$0xff]  ;;  %v3273_v13 = vld [vmem:[#allocation2 + $0x2b8] sm:$0xff] }
0x1457   :  { %3385 = vmatpush1.bf16.msra.mxu1 %v3298_v19  ;;  %3428 = vmatpush1.bf16.msra.mxu0 %v3300_v20  ;;  %v3270_v19 = vld [vmem:[#allocation2 + $0x2a0] sm:$0xff]  ;;  %v3272_v20 = vld [vmem:[#allocation2 + $0x2b0] sm:$0xff] }
0x1458   :  { %3386 = vmatprep.subr.bf16.mxu1 %v3307_v7  ;;  %3429 = vmatprep.subr.bf16.mxu0 %v3309_v17  ;;  %v3279_v7 = vld [vmem:[#allocation2 + $0x2e8] sm:$0xff]  ;;  %v3281_v17 = vld [vmem:[#allocation2 + $0x2f8] sm:$0xff] }
0x145b   :  { %3387 = vmatpush1.bf16.msra.mxu1 %v3306_v57  ;;  %3430 = vmatpush1.bf16.msra.mxu0 %v3308_v30  ;;  %v3278_v57 = vld [vmem:[#allocation2 + $0x2e0] sm:$0xff]  ;;  %v3280_v30 = vld [vmem:[#allocation2 + $0x2f0] sm:$0xff] }
0x145c   :  { %3442 = vmatprep.subr.bf16.mxu1 %v3191_v42  ;;  %3485 = vmatprep.subr.bf16.mxu0 %v3193_v44  ;;  %v3287_v42 = vld [vmem:[#allocation2 + $0x328] sm:$0xff]  ;;  %v3289_v44 = vld [vmem:[#allocation2 + $0x338] sm:$0xff] }
0x145e   :  { %3389 = vmatmul.mubr.bf16.vlgmr.msra.gmra.mrb[64].mxu1 %v5414_v63  ;;  %3432 = vmatmul.mubr.bf16.vlgmr.msra.gmra.mrb[80].mxu0 %v5414_v63 }
0x145f   :  { %3443 = vmatpush1.bf16.msra.mxu1 %v3190_v59  ;;  %3486 = vmatpush1.bf16.msra.mxu0 %v3192_v62  ;;  %v3286_v59 = vld [vmem:[#allocation2 + $0x320] sm:$0xff]  ;;  %v3288_v62 = vld [vmem:[#allocation2 + $0x330] sm:$0xff] }
0x1460   :  { %3444 = vmatprep.subr.bf16.mxu1 %v3199_v8  ;;  %3487 = vmatprep.subr.bf16.mxu0 %v3201_v58  ;;  %v3295_v8 = vld [vmem:[#allocation2 + $0x368] sm:$0xff]  ;;  %v3297_v58 = vld [vmem:[#allocation2 + $0x378] sm:$0xff] }
0x1461   :  { %3474 = vmatprep.mubr.bf16.mxu1 %v5408_v38  ;;  %3517 = vmatprep.mubr.bf16.mxu0 %v5408_v38  ;;  %v3222_v38 = vld [vmem:[#allocation2 + $0x120] sm:$0xff] }
0x1463   :  { %3445 = vmatpush1.bf16.msra.mxu1 %v3198_v52  ;;  %3488 = vmatpush1.bf16.msra.mxu0 %v3200_v22  ;;  %v3294_v52 = vld [vmem:[#allocation2 + $0x360] sm:$0xff]  ;;  %v3296_v22 = vld [vmem:[#allocation2 + $0x370] sm:$0xff] }
0x1464   :  { %3446 = vmatprep.subr.bf16.mxu1 %v3207_v23  ;;  %3489 = vmatprep.subr.bf16.mxu0 %v3209_v35  ;;  %v3303_v23 = vld [vmem:[#allocation2 + $0x3a8] sm:$0xff]  ;;  %v3305_v35 = vld [vmem:[#allocation2 + $0x3b8] sm:$0xff] }
0x1467   :  { %3447 = vmatpush1.bf16.msra.mxu1 %v3206_v43  ;;  %3490 = vmatpush1.bf16.msra.mxu0 %v3208_v28  ;;  %v3302_v43 = vld [vmem:[#allocation2 + $0x3a0] sm:$0xff]  ;;  %v3304_v28 = vld [vmem:[#allocation2 + $0x3b0] sm:$0xff] }
0x1468   :  { %3448 = vmatprep.subr.bf16.mxu1 %v3215_v31  ;;  %3491 = vmatprep.subr.bf16.mxu0 %v3217_v6  ;;  %v3311_v31 = vld [vmem:[#allocation2 + $0x3e8] sm:$0xff]  ;;  %v3313_v6 = vld [vmem:[#allocation2 + $0x3f8] sm:$0xff] }
0x146b   :  { %3449 = vmatpush1.bf16.msra.mxu1 %v3214_v29  ;;  %3492 = vmatpush1.bf16.msra.mxu0 %v3216_v34  ;;  %v3310_v29 = vld [vmem:[#allocation2 + $0x3e0] sm:$0xff]  ;;  %v3312_v34 = vld [vmem:[#allocation2 + $0x3f0] sm:$0xff] }
0x146c   :  { %3450 = vmatprep.subr.bf16.mxu1 %v3223_v37  ;;  %3493 = vmatprep.subr.bf16.mxu0 %v3225_v40  ;;  %v3314_v37 = vld [vmem:[%s5543_s7] sm:$0xff] }
0x146d   :  { %v3319_v40 = vrot.slane %v3314_v37, %v4897_v46 }
0x146f   :  { %3451 = vmatpush1.bf16.msra.mxu1 %v3222_v38  ;;  %3494 = vmatpush1.bf16.msra.mxu0 %v3224_v33  ;;  %v3327_v38 = vrot.slane %v3314_v37, %v249_v45  ;;  %v3323_v33 = vrot.slane %v3314_v37, %v5108_v50 }
0x1470   :  { %3452 = vmatprep.subr.bf16.mxu1 %v3231_v48  ;;  %3495 = vmatprep.subr.bf16.mxu0 %v3233_v51  ;;  %v3331_v48 = vrot.slane %v3314_v37, %v253_v36 }
0x1473   :  { %3453 = vmatpush1.bf16.msra.mxu1 %v3230_v18  ;;  %3496 = vmatpush1.bf16.msra.mxu0 %v3232_v54 }
0x1474   :  { %3454 = vmatprep.subr.bf16.mxu1 %v3239_v1  ;;  %3497 = vmatprep.subr.bf16.mxu0 %v3241_v60 }
0x1477   :  { %3455 = vmatpush1.bf16.msra.mxu1 %v3238_v2  ;;  %3498 = vmatpush1.bf16.msra.mxu0 %v3240_v47 }
0x1478   :  { %3456 = vmatprep.subr.bf16.mxu1 %v3247_v11  ;;  %3499 = vmatprep.subr.bf16.mxu0 %v3249_v3 }
0x147b   :  { %3457 = vmatpush1.bf16.msra.mxu1 %v3246_v16  ;;  %3500 = vmatpush1.bf16.msra.mxu0 %v3248_v61 }
0x147c   :  { %3458 = vmatprep.subr.bf16.mxu1 %v3255_v21  ;;  %3501 = vmatprep.subr.bf16.mxu0 %v3257_v25 }
0x147f   :  { %3459 = vmatpush1.bf16.msra.mxu1 %v3254_v26  ;;  %3502 = vmatpush1.bf16.msra.mxu0 %v3256_v24 }
0x1480   :  { %3460 = vmatprep.subr.bf16.mxu1 %v3263_v55  ;;  %3503 = vmatprep.subr.bf16.mxu0 %v3265_v10 }
0x1483   :  { %3461 = vmatpush1.bf16.msra.mxu1 %v3262_v4  ;;  %3504 = vmatpush1.bf16.msra.mxu0 %v3264_v41 }
0x1484   :  { %3462 = vmatprep.subr.bf16.mxu1 %v3271_v15  ;;  %3505 = vmatprep.subr.bf16.mxu0 %v3273_v13 }
0x1487   :  { %3463 = vmatpush1.bf16.msra.mxu1 %v3270_v19  ;;  %3506 = vmatpush1.bf16.msra.mxu0 %v3272_v20  ;;  %v3342_v19 = vsub.s32 6, %v4893_v39  ;;  %v3346_v20 = vsub.s32 7, %v4893_v39 }
0x1488   :  { %3464 = vmatprep.subr.bf16.mxu1 %v3279_v7  ;;  %3507 = vmatprep.subr.bf16.mxu0 %v3281_v17  ;;  %v3335_v7 = vrot.slane %v3314_v37, %v257_v0 }
0x1489   :  { %v3343_v17 = vrot.slane %v3314_v37, %v3342_v19 }
0x148b   :  { %3465 = vmatpush1.bf16.msra.mxu1 %v3278_v57  ;;  %3508 = vmatpush1.bf16.msra.mxu0 %v3280_v30  ;;  %v3339_v57 = vrot.slane %v3314_v37, %v261_v49  ;;  %v3347_v30 = vrot.slane %v3314_v37, %v3346_v20 }
0x148c   :  { %3466 = vmatprep.subr.bf16.mxu1 %v3287_v42  ;;  %3509 = vmatprep.subr.bf16.mxu0 %v3289_v44 }
0x148f   :  { %3467 = vmatpush1.bf16.msra.mxu1 %v3286_v59  ;;  %3510 = vmatpush1.bf16.msra.mxu0 %v3288_v62 }
0x1490   :  { %3468 = vmatprep.subr.bf16.mxu1 %v3295_v8  ;;  %3511 = vmatprep.subr.bf16.mxu0 %v3297_v58 }
0x1493   :  { %3469 = vmatpush1.bf16.msra.mxu1 %v3294_v52  ;;  %3512 = vmatpush1.bf16.msra.mxu0 %v3296_v22 }
0x1494   :  { %3470 = vmatprep.subr.bf16.mxu1 %v3303_v23  ;;  %3513 = vmatprep.subr.bf16.mxu0 %v3305_v35 }
0x1497   :  { %3471 = vmatpush1.bf16.msra.mxu1 %v3302_v43  ;;  %3514 = vmatpush1.bf16.msra.mxu0 %v3304_v28 }
0x1498   :  { %3472 = vmatprep.subr.bf16.mxu1 %v3311_v31  ;;  %3515 = vmatprep.subr.bf16.mxu0 %v3313_v6 }
0x149b   :  { %3473 = vmatpush1.bf16.msra.mxu1 %v3310_v29  ;;  %3516 = vmatpush1.bf16.msra.mxu0 %v3312_v34 }
0x149e   :  { %3475 = vmatmul.mubr.bf16.vlgmr.msra.gmra.mrb[68].mxu1 %v5414_v63  ;;  %3518 = vmatmul.mubr.bf16.vlgmr.msra.gmra.mrb[84].mxu0 %v5414_v63 }
0x1531   :  { %v3390_v51 = vpop.f32.mrb[64].mxu1  ;;  %v3433_v18 = vpop.f32.mrb[80].mxu0 }
0x1532   :  { %v5431_v54 = vadd.f32 %v3390_v51, %v3319_v40  ;;  %v5433_v1 = vadd.f32 %v3433_v18, %v3327_v38  ;;  %v3392_v63 = vpop.f32.mrb[65].mxu1  ;;  %v3435_v60 = vpop.f32.mrb[81].mxu0 }
0x1533   :  { %v3393_v2 = vadd.f32 %v3392_v63, %v3323_v33  ;;  %v5435_v47 = vadd.f32 %v3435_v60, %v3331_v48  ;;  %v3394_v11 = vpop.f32.mrb[66].mxu1  ;;  %v3437_v3 = vpop.f32.mrb[82].mxu0 }
0x1534   :  { %v3528_v45 = vmax.f32 %v5431_v54, 0.0  ;;  %v3530_v16 = vmax.f32 %v5433_v1, 0.0  ;;  %v5439_v61 = vadd.f32 %v3394_v11, %v3319_v40  ;;  %v5441_v36 = vadd.f32 %v3437_v3, %v3327_v38  ;;  %v3396_v21 = vpop.f32.mrb[67].mxu1  ;;  %v3439_v25 = vpop.f32.mrb[83].mxu0 }
0x1535   :  { %v3529_v26 = vmax.f32 %v3393_v2, 0.0  ;;  %v3531_v24 = vmax.f32 %v5435_v47, 0.0  ;;  %v3397_v55 = vadd.f32 %v3396_v21, %v3323_v33  ;;  %v5444_v10 = vadd.f32 %v3439_v25, %v3331_v48 }
0x1536   :  { %v3536_v4 = vmax.f32 %v5439_v61, 0.0  ;;  %v3538_v41 = vmax.f32 %v5441_v36, 0.0 }
0x1537   :  { %v3537_v15 = vmax.f32 %v3397_v55, 0.0  ;;  %v3539_v13 = vmax.f32 %v5444_v10, 0.0 }
0x1571   :  { %v3476_v42 = vpop.f32.mrb[68].mxu1  ;;  %v3519_v44 = vpop.f32.mrb[84].mxu0 }
0x1572   :  { %v5455_v59 = vadd.f32 %v3476_v42, %v3335_v7  ;;  %v5457_v62 = vadd.f32 %v3519_v44, %v3343_v17  ;;  %v3478_v8 = vpop.f32.mrb[69].mxu1  ;;  %v3521_v58 = vpop.f32.mrb[85].mxu0 }
0x1573   :  { %v5459_v52 = vadd.f32 %v3478_v8, %v3339_v57  ;;  %v5461_v22 = vadd.f32 %v3521_v58, %v3347_v30  ;;  %v3480_v23 = vpop.f32.mrb[70].mxu1  ;;  %v3523_v35 = vpop.f32.mrb[86].mxu0 }
0x1574   :  { %v3532_v0 = vmax.f32 %v5455_v59, 0.0  ;;  %v3534_v39 = vmax.f32 %v5457_v62, 0.0  ;;  %v5465_v49 = vadd.f32 %v3480_v23, %v3335_v7  ;;  %v5467_v43 = vadd.f32 %v3523_v35, %v3343_v17  ;;  %v3482_v28 = vpop.f32.mrb[71].mxu1  ;;  %v3525_v31 = vpop.f32.mrb[87].mxu0 }
0x1575   :  { %v3533_v6 = vmax.f32 %v5459_v52, 0.0  ;;  %v3535_v29 = vmax.f32 %v5461_v22, 0.0  ;;  %v5471_v34 = vadd.f32 %v3482_v28, %v3339_v57  ;;  %v5473_v37 = vadd.f32 %v3525_v31, %v3347_v30 }
0x1576   :  { %v3540_v40 = vmax.f32 %v5465_v49, 0.0  ;;  %v3542_v38 = vmax.f32 %v5467_v43, 0.0 }
0x1577   :  { %v3541_v33 = vmax.f32 %v5471_v34, 0.0  ;;  %v3543_v48 = vmax.f32 %v5473_v37, 0.0 }
0x1578   :  { %4733 = dma.done.wait [#allocation4 + $0x1], 16384 }
0x1579   :  { %4734 = vsyncadd [#allocation4 + $0x1], 4294950912  ;;  %v3549_v51 = vpack.c.bf16 %v3537_v15, %v3529_v26  ;;  %v3557_v18 = vld [vmem:[#allocation3 + $0x8] sm:$0xff]  ;;  %v3556_v63 = vld [vmem:[#allocation3] sm:$0xff] }
0x157a   :  { %v3559_v60 = vld [vmem:[#allocation3 + $0x18] sm:$0xff]  ;;  %3696 = vmatprep.subr.bf16.mxu1 %v3557_v18  ;;  %v3558_v2 = vld [vmem:[#allocation3 + $0x10] sm:$0xff]  ;;  %v3561_v11 = vld [vmem:[#allocation3 + $0x28] sm:$0xff] }
0x157b   :  { %3728 = vmatprep.mubr.bf16.mxu1 %v3549_v51  ;;  %3697 = vmatpush1.bf16.msra.mxu1 %v3556_v63  ;;  %v3560_v3 = vld [vmem:[#allocation3 + $0x20] sm:$0xff]  ;;  %v3563_v21 = vld [vmem:[#allocation3 + $0x38] sm:$0xff]  ;;  %v3562_v25 = vld [vmem:[#allocation3 + $0x30] sm:$0xff] }
0x157c   :  { %3698 = vmatprep.subr.bf16.mxu1 %v3559_v60  ;;  %v3565_v55 = vld [vmem:[#allocation3 + $0x48] sm:$0xff]  ;;  %v3564_v26 = vld [vmem:[#allocation3 + $0x40] sm:$0xff]  ;;  %v3567_v15 = vld [vmem:[#allocation3 + $0x58] sm:$0xff] }
0x157d   :  { %v3566_v19 = vld [vmem:[#allocation3 + $0x50] sm:$0xff]  ;;  %v3569_v20 = vld [vmem:[#allocation3 + $0x68] sm:$0xff]  ;;  %v3568_v7 = vld [vmem:[#allocation3 + $0x60] sm:$0xff] }
0x157e   :  { %v3571_v17 = vld [vmem:[#allocation3 + $0x78] sm:$0xff]  ;;  %v3570_v57 = vld [vmem:[#allocation3 + $0x70] sm:$0xff]  ;;  %v3573_v30 = vld [vmem:[#allocation3 + $0x88] sm:$0xff] }
0x157f   :  { %3699 = vmatpush1.bf16.msra.mxu1 %v3558_v2  ;;  %v3572_v42 = vld [vmem:[#allocation3 + $0x80] sm:$0xff]  ;;  %v3575_v44 = vld [vmem:[#allocation3 + $0x98] sm:$0xff]  ;;  %v3574_v8 = vld [vmem:[#allocation3 + $0x90] sm:$0xff] }
0x1580   :  { %3700 = vmatprep.subr.bf16.mxu1 %v3561_v11  ;;  %v3577_v58 = vld [vmem:[#allocation3 + $0xa8] sm:$0xff]  ;;  %v3576_v23 = vld [vmem:[#allocation3 + $0xa0] sm:$0xff]  ;;  %v3579_v35 = vld [vmem:[#allocation3 + $0xb8] sm:$0xff] }
0x1581   :  { %v3578_v28 = vld [vmem:[#allocation3 + $0xb0] sm:$0xff]  ;;  %v3581_v31 = vld [vmem:[#allocation3 + $0xc8] sm:$0xff]  ;;  %v3580_v51 = vld [vmem:[#allocation3 + $0xc0] sm:$0xff] }
0x1582   :  { %v3583_v18 = vld [vmem:[#allocation3 + $0xd8] sm:$0xff]  ;;  %v3582_v63 = vld [vmem:[#allocation3 + $0xd0] sm:$0xff]  ;;  %v3585_v60 = vld [vmem:[#allocation3 + $0xe8] sm:$0xff] }
0x1583   :  { %3701 = vmatpush1.bf16.msra.mxu1 %v3560_v3  ;;  %v3584_v2 = vld [vmem:[#allocation3 + $0xe0] sm:$0xff]  ;;  %v3587_v11 = vld [vmem:[#allocation3 + $0xf8] sm:$0xff]  ;;  %v3586_v3 = vld [vmem:[#allocation3 + $0xf0] sm:$0xff] }
0x1584   :  { %3702 = vmatprep.subr.bf16.mxu1 %v3563_v21  ;;  %v3589_v21 = vld [vmem:[#allocation3 + $0x108] sm:$0xff]  ;;  %v3592_v54 = vld [vmem:[#allocation3 + $0x120] sm:$0xff]  ;;  %v3595_v61 = vld [vmem:[#allocation3 + $0x138] sm:$0xff] }
0x1585   :  { %v3597_v47 = vld [vmem:[#allocation3 + $0x148] sm:$0xff]  ;;  %v3599_v10 = vld [vmem:[#allocation3 + $0x158] sm:$0xff]  ;;  %v3624_v1 = vld [vmem:[#allocation3 + $0x220] sm:$0xff] }
0x1586   :  { %v3627_v36 = vld [vmem:[#allocation3 + $0x238] sm:$0xff]  ;;  %v3628_v52 = vld [vmem:[#allocation3 + $0x240] sm:$0xff]  ;;  %v3630_v34 = vld [vmem:[#allocation3 + $0x250] sm:$0xff] }
0x1587   :  { %3703 = vmatpush1.bf16.msra.mxu1 %v3562_v25  ;;  %v3548_v25 = vpack.c.bf16 %v3536_v4, %v3528_v45  ;;  %v3594_v45 = vld [vmem:[#allocation3 + $0x130] sm:$0xff]  ;;  %v3656_v59 = vld [vmem:[#allocation3 + $0x320] sm:$0xff]  ;;  %v3659_v49 = vld [vmem:[#allocation3 + $0x338] sm:$0xff] }
0x1588   :  { %3704 = vmatprep.subr.bf16.mxu1 %v3565_v55  ;;  %v3551_v55 = vpack.c.bf16 %v3539_v13, %v3531_v24  ;;  %v3596_v24 = vld [vmem:[#allocation3 + $0x140] sm:$0xff]  ;;  %v3598_v4 = vld [vmem:[#allocation3 + $0x150] sm:$0xff]  ;;  %v3601_v13 = vld [vmem:[#allocation3 + $0x168] sm:$0xff] }
0x1589   :  { %v3661_v22 = vld [vmem:[#allocation3 + $0x348] sm:$0xff]  ;;  %v3663_v37 = vld [vmem:[#allocation3 + $0x358] sm:$0xff] }
0x158b   :  { %3705 = vmatpush1.bf16.msra.mxu1 %v3564_v26  ;;  %v3588_v26 = vld [vmem:[#allocation3 + $0x100] sm:$0xff] }
0x158c   :  { %3706 = vmatprep.subr.bf16.mxu1 %v3567_v15  ;;  %v3591_v15 = vld [vmem:[#allocation3 + $0x118] sm:$0xff] }
0x158f   :  { %3707 = vmatpush1.bf16.msra.mxu1 %v3566_v19  ;;  %v3590_v19 = vld [vmem:[#allocation3 + $0x110] sm:$0xff] }
0x1590   :  { %3708 = vmatprep.subr.bf16.mxu1 %v3569_v20  ;;  %v3593_v20 = vld [vmem:[#allocation3 + $0x128] sm:$0xff] }
0x1593   :  { %3709 = vmatpush1.bf16.msra.mxu1 %v3568_v7  ;;  %v3600_v7 = vld [vmem:[#allocation3 + $0x160] sm:$0xff] }
0x1594   :  { %3710 = vmatprep.subr.bf16.mxu1 %v3571_v17  ;;  %v3603_v17 = vld [vmem:[#allocation3 + $0x178] sm:$0xff] }
0x1597   :  { %3711 = vmatpush1.bf16.msra.mxu1 %v3570_v57  ;;  %v3602_v57 = vld [vmem:[#allocation3 + $0x170] sm:$0xff] }
0x1598   :  { %3712 = vmatprep.subr.bf16.mxu1 %v3573_v30  ;;  %v3605_v30 = vld [vmem:[#allocation3 + $0x188] sm:$0xff] }
0x159b   :  { %3713 = vmatpush1.bf16.msra.mxu1 %v3572_v42  ;;  %v3604_v42 = vld [vmem:[#allocation3 + $0x180] sm:$0xff] }
0x159c   :  { %3714 = vmatprep.subr.bf16.mxu1 %v3575_v44  ;;  %v3607_v44 = vld [vmem:[#allocation3 + $0x198] sm:$0xff] }
0x159f   :  { %3715 = vmatpush1.bf16.msra.mxu1 %v3574_v8  ;;  %v3606_v8 = vld [vmem:[#allocation3 + $0x190] sm:$0xff] }
0x15a0   :  { %3716 = vmatprep.subr.bf16.mxu1 %v3577_v58  ;;  %v3609_v58 = vld [vmem:[#allocation3 + $0x1a8] sm:$0xff] }
0x15a3   :  { %3717 = vmatpush1.bf16.msra.mxu1 %v3576_v23  ;;  %v3608_v23 = vld [vmem:[#allocation3 + $0x1a0] sm:$0xff] }
0x15a4   :  { %3718 = vmatprep.subr.bf16.mxu1 %v3579_v35  ;;  %v3611_v35 = vld [vmem:[#allocation3 + $0x1b8] sm:$0xff] }
0x15a7   :  { %3719 = vmatpush1.bf16.msra.mxu1 %v3578_v28  ;;  %v3610_v28 = vld [vmem:[#allocation3 + $0x1b0] sm:$0xff] }
0x15a8   :  { %3720 = vmatprep.subr.bf16.mxu1 %v3581_v31  ;;  %v3613_v31 = vld [vmem:[#allocation3 + $0x1c8] sm:$0xff] }
0x15ab   :  { %3721 = vmatpush1.bf16.msra.mxu1 %v3580_v51  ;;  %v3612_v51 = vld [vmem:[#allocation3 + $0x1c0] sm:$0xff] }
0x15ac   :  { %3722 = vmatprep.subr.bf16.mxu1 %v3583_v18  ;;  %v3615_v18 = vld [vmem:[#allocation3 + $0x1d8] sm:$0xff] }
0x15af   :  { %3723 = vmatpush1.bf16.msra.mxu1 %v3582_v63  ;;  %v3614_v63 = vld [vmem:[#allocation3 + $0x1d0] sm:$0xff] }
0x15b0   :  { %3724 = vmatprep.subr.bf16.mxu1 %v3585_v60  ;;  %v3617_v60 = vld [vmem:[#allocation3 + $0x1e8] sm:$0xff] }
0x15b3   :  { %3725 = vmatpush1.bf16.msra.mxu1 %v3584_v2  ;;  %v3616_v2 = vld [vmem:[#allocation3 + $0x1e0] sm:$0xff] }
0x15b4   :  { %3726 = vmatprep.subr.bf16.mxu1 %v3587_v11  ;;  %v3619_v11 = vld [vmem:[#allocation3 + $0x1f8] sm:$0xff] }
0x15b7   :  { %3727 = vmatpush1.bf16.msra.mxu1 %v3586_v3  ;;  %v3618_v3 = vld [vmem:[#allocation3 + $0x1f0] sm:$0xff] }
0x15b8   :  { %3739 = vmatprep.subr.bf16.mxu1 %v3589_v21  ;;  %v3621_v21 = vld [vmem:[#allocation3 + $0x208] sm:$0xff] }
0x15ba   :  { %3729 = vmatmul.mubr.bf16.vlgmr.msra.gmra.mrb[72].mxu1 %v3548_v25  ;;  %v3550_v25 = vpack.c.bf16 %v3538_v41, %v3530_v16  ;;  %v3626_v16 = vld [vmem:[#allocation3 + $0x230] sm:$0xff]  ;;  %v3629_v41 = vld [vmem:[#allocation3 + $0x248] sm:$0xff] }
0x15bb   :  { %3740 = vmatpush1.bf16.msra.mxu1 %v3588_v26  ;;  %3771 = vmatprep.mubr.bf16.mxu1 %v3551_v55  ;;  %v3553_v55 = vpack.c.bf16 %v3541_v33, %v3533_v6  ;;  %v3620_v26 = vld [vmem:[#allocation3 + $0x200] sm:$0xff]  ;;  %v3631_v6 = vld [vmem:[#allocation3 + $0x258] sm:$0xff]  ;;  %v3633_v33 = vld [vmem:[#allocation3 + $0x268] sm:$0xff] }
0x15bc   :  { %3741 = vmatprep.subr.bf16.mxu1 %v3591_v15  ;;  %v3623_v15 = vld [vmem:[#allocation3 + $0x218] sm:$0xff] }
0x15bf   :  { %3742 = vmatpush1.bf16.msra.mxu1 %v3590_v19  ;;  %v3622_v19 = vld [vmem:[#allocation3 + $0x210] sm:$0xff] }
0x15c0   :  { %3743 = vmatprep.subr.bf16.mxu1 %v3593_v20  ;;  %v3625_v20 = vld [vmem:[#allocation3 + $0x228] sm:$0xff] }
0x15c3   :  { %3744 = vmatpush1.bf16.msra.mxu1 %v3592_v54  ;;  %v3632_v54 = vld [vmem:[#allocation3 + $0x260] sm:$0xff] }
0x15c4   :  { %3745 = vmatprep.subr.bf16.mxu1 %v3595_v61  ;;  %v3635_v61 = vld [vmem:[#allocation3 + $0x278] sm:$0xff] }
0x15c7   :  { %3746 = vmatpush1.bf16.msra.mxu1 %v3594_v45  ;;  %v3634_v45 = vld [vmem:[#allocation3 + $0x270] sm:$0xff] }
0x15c8   :  { %3747 = vmatprep.subr.bf16.mxu1 %v3597_v47  ;;  %v3637_v47 = vld [vmem:[#allocation3 + $0x288] sm:$0xff] }
0x15cb   :  { %3748 = vmatpush1.bf16.msra.mxu1 %v3596_v24  ;;  %v3636_v24 = vld [vmem:[#allocation3 + $0x280] sm:$0xff] }
0x15cc   :  { %3749 = vmatprep.subr.bf16.mxu1 %v3599_v10  ;;  %v3639_v10 = vld [vmem:[#allocation3 + $0x298] sm:$0xff] }
0x15cf   :  { %3750 = vmatpush1.bf16.msra.mxu1 %v3598_v4  ;;  %v3638_v4 = vld [vmem:[#allocation3 + $0x290] sm:$0xff] }
0x15d0   :  { %3751 = vmatprep.subr.bf16.mxu1 %v3601_v13  ;;  %v3641_v13 = vld [vmem:[#allocation3 + $0x2a8] sm:$0xff] }
0x15d3   :  { %3752 = vmatpush1.bf16.msra.mxu1 %v3600_v7  ;;  %v3640_v7 = vld [vmem:[#allocation3 + $0x2a0] sm:$0xff] }
0x15d4   :  { %3753 = vmatprep.subr.bf16.mxu1 %v3603_v17  ;;  %v3643_v17 = vld [vmem:[#allocation3 + $0x2b8] sm:$0xff] }
0x15d7   :  { %3754 = vmatpush1.bf16.msra.mxu1 %v3602_v57  ;;  %v3642_v57 = vld [vmem:[#allocation3 + $0x2b0] sm:$0xff] }
0x15d8   :  { %3755 = vmatprep.subr.bf16.mxu1 %v3605_v30  ;;  %v3645_v30 = vld [vmem:[#allocation3 + $0x2c8] sm:$0xff] }
0x15db   :  { %3756 = vmatpush1.bf16.msra.mxu1 %v3604_v42  ;;  %v3644_v42 = vld [vmem:[#allocation3 + $0x2c0] sm:$0xff] }
0x15dc   :  { %3757 = vmatprep.subr.bf16.mxu1 %v3607_v44  ;;  %v3647_v44 = vld [vmem:[#allocation3 + $0x2d8] sm:$0xff] }
0x15df   :  { %3758 = vmatpush1.bf16.msra.mxu1 %v3606_v8  ;;  %v3646_v8 = vld [vmem:[#allocation3 + $0x2d0] sm:$0xff] }
0x15e0   :  { %3759 = vmatprep.subr.bf16.mxu1 %v3609_v58  ;;  %v3649_v58 = vld [vmem:[#allocation3 + $0x2e8] sm:$0xff] }
0x15e3   :  { %3760 = vmatpush1.bf16.msra.mxu1 %v3608_v23  ;;  %v3648_v23 = vld [vmem:[#allocation3 + $0x2e0] sm:$0xff] }
0x15e4   :  { %3761 = vmatprep.subr.bf16.mxu1 %v3611_v35  ;;  %v3651_v35 = vld [vmem:[#allocation3 + $0x2f8] sm:$0xff] }
0x15e7   :  { %3762 = vmatpush1.bf16.msra.mxu1 %v3610_v28  ;;  %v3650_v28 = vld [vmem:[#allocation3 + $0x2f0] sm:$0xff] }
0x15e8   :  { %3763 = vmatprep.subr.bf16.mxu1 %v3613_v31  ;;  %v3653_v31 = vld [vmem:[#allocation3 + $0x308] sm:$0xff] }
0x15eb   :  { %3764 = vmatpush1.bf16.msra.mxu1 %v3612_v51  ;;  %v3552_v51 = vpack.c.bf16 %v3540_v40, %v3532_v0  ;;  %v3658_v0 = vld [vmem:[#allocation3 + $0x330] sm:$0xff] }
0x15ec   :  { %3765 = vmatprep.subr.bf16.mxu1 %v3615_v18  ;;  %v3555_v18 = vpack.c.bf16 %v3543_v48, %v3535_v29  ;;  %v3660_v29 = vld [vmem:[#allocation3 + $0x340] sm:$0xff]  ;;  %v3662_v40 = vld [vmem:[#allocation3 + $0x350] sm:$0xff]  ;;  %v3665_v48 = vld [vmem:[#allocation3 + $0x368] sm:$0xff] }
0x15ef   :  { %3766 = vmatpush1.bf16.msra.mxu1 %v3614_v63  ;;  %v3652_v63 = vld [vmem:[#allocation3 + $0x300] sm:$0xff] }
0x15f0   :  { %3767 = vmatprep.subr.bf16.mxu1 %v3617_v60  ;;  %v3655_v60 = vld [vmem:[#allocation3 + $0x318] sm:$0xff] }
0x15f3   :  { %3768 = vmatpush1.bf16.msra.mxu1 %v3616_v2  ;;  %v3654_v2 = vld [vmem:[#allocation3 + $0x310] sm:$0xff] }
0x15f4   :  { %3769 = vmatprep.subr.bf16.mxu1 %v3619_v11  ;;  %v3657_v11 = vld [vmem:[#allocation3 + $0x328] sm:$0xff] }
0x15f7   :  { %3770 = vmatpush1.bf16.msra.mxu1 %v3618_v3  ;;  %v3664_v3 = vld [vmem:[#allocation3 + $0x360] sm:$0xff] }
0x15f8   :  { %3782 = vmatprep.subr.bf16.mxu1 %v3621_v21  ;;  %v3667_v21 = vld [vmem:[#allocation3 + $0x378] sm:$0xff] }
0x15fa   :  { %3772 = vmatmul.mubr.bf16.vlgmr.msra.gmra.mrb[72].mxu1 %v3550_v25  ;;  %v3666_v25 = vld [vmem:[#allocation3 + $0x370] sm:$0xff] }
0x15fb   :  { %3783 = vmatpush1.bf16.msra.mxu1 %v3620_v26  ;;  %3814 = vmatprep.mubr.bf16.mxu1 %v3553_v55  ;;  %v3669_v55 = vld [vmem:[#allocation3 + $0x388] sm:$0xff]  ;;  %v3668_v26 = vld [vmem:[#allocation3 + $0x380] sm:$0xff] }
0x15fc   :  { %3784 = vmatprep.subr.bf16.mxu1 %v3623_v15  ;;  %v3671_v15 = vld [vmem:[#allocation3 + $0x398] sm:$0xff] }
0x15ff   :  { %3785 = vmatpush1.bf16.msra.mxu1 %v3622_v19  ;;  %v3670_v19 = vld [vmem:[#allocation3 + $0x390] sm:$0xff] }
0x1600   :  { %3786 = vmatprep.subr.bf16.mxu1 %v3625_v20  ;;  %v3673_v20 = vld [vmem:[#allocation3 + $0x3a8] sm:$0xff] }
0x1603   :  { %3787 = vmatpush1.bf16.msra.mxu1 %v3624_v1  ;;  %v3672_v1 = vld [vmem:[#allocation3 + $0x3a0] sm:$0xff] }
0x1604   :  { %3788 = vmatprep.subr.bf16.mxu1 %v3627_v36  ;;  %v3675_v36 = vld [vmem:[#allocation3 + $0x3b8] sm:$0xff] }
0x1607   :  { %3789 = vmatpush1.bf16.msra.mxu1 %v3626_v16  ;;  %v3674_v16 = vld [vmem:[#allocation3 + $0x3b0] sm:$0xff] }
0x1608   :  { %3790 = vmatprep.subr.bf16.mxu1 %v3629_v41  ;;  %v3677_v41 = vld [vmem:[#allocation3 + $0x3c8] sm:$0xff] }
0x160b   :  { %3791 = vmatpush1.bf16.msra.mxu1 %v3628_v52  ;;  %v3676_v52 = vld [vmem:[#allocation3 + $0x3c0] sm:$0xff] }
0x160c   :  { %3792 = vmatprep.subr.bf16.mxu1 %v3631_v6  ;;  %v3679_v6 = vld [vmem:[#allocation3 + $0x3d8] sm:$0xff] }
0x160f   :  { %3793 = vmatpush1.bf16.msra.mxu1 %v3630_v34  ;;  %v3678_v34 = vld [vmem:[#allocation3 + $0x3d0] sm:$0xff] }
0x1610   :  { %3794 = vmatprep.subr.bf16.mxu1 %v3633_v33  ;;  %v3681_v33 = vld [vmem:[#allocation3 + $0x3e8] sm:$0xff] }
0x1613   :  { %3795 = vmatpush1.bf16.msra.mxu1 %v3632_v54  ;;  %v3680_v54 = vld [vmem:[#allocation3 + $0x3e0] sm:$0xff] }
0x1614   :  { %3796 = vmatprep.subr.bf16.mxu1 %v3635_v61  ;;  %v3683_v61 = vld [vmem:[#allocation3 + $0x3f8] sm:$0xff] }
0x1617   :  { %3797 = vmatpush1.bf16.msra.mxu1 %v3634_v45  ;;  %v3682_v45 = vld [vmem:[#allocation3 + $0x3f0] sm:$0xff] }
0x1618   :  { %3798 = vmatprep.subr.bf16.mxu1 %v3637_v47  ;;  %v3554_v47 = vpack.c.bf16 %v3542_v38, %v3534_v39 }
0x161b   :  { %3799 = vmatpush1.bf16.msra.mxu1 %v3636_v24  ;;  %v3684_v24 = vld [vmem:[%s5544_s8] sm:$0x3] }
0x161c   :  { %3800 = vmatprep.subr.bf16.mxu1 %v3639_v10  ;;  %v3689_v10 = vrot.slane %v3684_v24, %v4897_v46 }
0x161f   :  { %3801 = vmatpush1.bf16.msra.mxu1 %v3638_v4  ;;  %v3693_v4 = vrot.slane %v3684_v24, %v5108_v50 }
0x1620   :  { %3802 = vmatprep.subr.bf16.mxu1 %v3641_v13 }
0x1623   :  { %3803 = vmatpush1.bf16.msra.mxu1 %v3640_v7 }
0x1624   :  { %3804 = vmatprep.subr.bf16.mxu1 %v3643_v17 }
0x1627   :  { %3805 = vmatpush1.bf16.msra.mxu1 %v3642_v57 }
0x1628   :  { %3806 = vmatprep.subr.bf16.mxu1 %v3645_v30 }
0x162b   :  { %3807 = vmatpush1.bf16.msra.mxu1 %v3644_v42 }
0x162c   :  { %3808 = vmatprep.subr.bf16.mxu1 %v3647_v44 }
0x162f   :  { %3809 = vmatpush1.bf16.msra.mxu1 %v3646_v8 }
0x1630   :  { %3810 = vmatprep.subr.bf16.mxu1 %v3649_v58 }
0x1633   :  { %3811 = vmatpush1.bf16.msra.mxu1 %v3648_v23 }
0x1634   :  { %3812 = vmatprep.subr.bf16.mxu1 %v3651_v35 }
0x1637   :  { %3813 = vmatpush1.bf16.msra.mxu1 %v3650_v28 }
0x1638   :  { %3825 = vmatprep.subr.bf16.mxu1 %v3653_v31 }
0x163a   :  { %3815 = vmatmul.mubr.bf16.vlgmr.msra.gmra.mrb[72].mxu1 %v3552_v51 }
0x163b   :  { %3826 = vmatpush1.bf16.msra.mxu1 %v3652_v63  ;;  %3857 = vmatprep.mubr.bf16.mxu1 %v3555_v18 }
0x163c   :  { %3827 = vmatprep.subr.bf16.mxu1 %v3655_v60 }
0x163f   :  { %3828 = vmatpush1.bf16.msra.mxu1 %v3654_v2 }
0x1640   :  { %3829 = vmatprep.subr.bf16.mxu1 %v3657_v11 }
0x1643   :  { %3830 = vmatpush1.bf16.msra.mxu1 %v3656_v59 }
0x1644   :  { %3831 = vmatprep.subr.bf16.mxu1 %v3659_v49 }
0x1647   :  { %3832 = vmatpush1.bf16.msra.mxu1 %v3658_v0 }
0x1648   :  { %3833 = vmatprep.subr.bf16.mxu1 %v3661_v22 }
0x164b   :  { %3834 = vmatpush1.bf16.msra.mxu1 %v3660_v29 }
0x164c   :  { %3835 = vmatprep.subr.bf16.mxu1 %v3663_v37 }
0x164f   :  { %3836 = vmatpush1.bf16.msra.mxu1 %v3662_v40 }
0x1650   :  { %3837 = vmatprep.subr.bf16.mxu1 %v3665_v48 }
0x1653   :  { %3838 = vmatpush1.bf16.msra.mxu1 %v3664_v3 }
0x1654   :  { %3839 = vmatprep.subr.bf16.mxu1 %v3667_v21 }
0x1657   :  { %3840 = vmatpush1.bf16.msra.mxu1 %v3666_v25 }
0x1658   :  { %3841 = vmatprep.subr.bf16.mxu1 %v3669_v55 }
0x165b   :  { %3842 = vmatpush1.bf16.msra.mxu1 %v3668_v26 }
0x165c   :  { %3843 = vmatprep.subr.bf16.mxu1 %v3671_v15 }
0x165f   :  { %3844 = vmatpush1.bf16.msra.mxu1 %v3670_v19 }
0x1660   :  { %3845 = vmatprep.subr.bf16.mxu1 %v3673_v20 }
0x1663   :  { %3846 = vmatpush1.bf16.msra.mxu1 %v3672_v1 }
0x1664   :  { %3847 = vmatprep.subr.bf16.mxu1 %v3675_v36 }
0x1667   :  { %3848 = vmatpush1.bf16.msra.mxu1 %v3674_v16 }
0x1668   :  { %3849 = vmatprep.subr.bf16.mxu1 %v3677_v41 }
0x166b   :  { %3850 = vmatpush1.bf16.msra.mxu1 %v3676_v52 }
0x166c   :  { %3851 = vmatprep.subr.bf16.mxu1 %v3679_v6 }
0x166f   :  { %3852 = vmatpush1.bf16.msra.mxu1 %v3678_v34 }
0x1670   :  { %3853 = vmatprep.subr.bf16.mxu1 %v3681_v33 }
0x1673   :  { %3854 = vmatpush1.bf16.msra.mxu1 %v3680_v54 }
0x1674   :  { %3855 = vmatprep.subr.bf16.mxu1 %v3683_v61 }
0x1677   :  { %3856 = vmatpush1.bf16.msra.mxu1 %v3682_v45 }
0x167a   :  { %3858 = vmatmul.mubr.bf16.vlgmr.msra.gmra.mrb[72].mxu1 %v3554_v47 }
0x174d   :  { %v3859_v13 = vpop.f32.mrb[72].mxu1 }
0x174e   :  { %v4377_v7 = vadd.f32 %v3859_v13, %v3689_v10  ;;  %v3861_v17 = vpop.f32.mrb[73].mxu1 }
0x174f   :  { %v4378_v57 = vadd.f32 %v3861_v17, %v3693_v4  ;;  %v3863_v30 = vpop.f32.mrb[74].mxu1 }
0x1750   :  { %v3868_v62 = vadd.f32 %v4377_v7, %v5393_v9  ;;  %v4379_v42 = vadd.f32 %v3863_v30, %v3689_v10  ;;  %v3865_v43 = vpop.f32.mrb[75].mxu1 }
0x1751   :  { %v3869_v39 = vadd.f32 %v4378_v57, %v5396_v5  ;;  %v4380_v38 = vadd.f32 %v3865_v43, %v3693_v4 }
0x1752   :  { %v3870_v44 = vadd.f32 %v4379_v42, %v5401_v27 }
0x1753   :  { %v3871_v8 = vadd.f32 %v4380_v38, %v5404_v14  ;;  %v3872_v58 = vadd.f32 %v3869_v39, %v3868_v62 }
0x1755   :  { %3873 = vadd.xlane.f32.xlu0 %v3872_v58  ;;  %v3875_v46 = vadd.f32 %v3871_v8, %v3870_v44 }
0x1759   :  { %3876 = vadd.xlane.f32.xlu0 %v3875_v46 }
0x17e2   :  { %v3874_v50 = vpop.xlane.xlu0 %3873 }
0x17e3   :  { %v3878_v23 = vmul.f32 0.00390625, %v3874_v50 }
0x17e5   :  { %v3880_v35 = vsub.f32 %v3868_v62, %v3878_v23  ;;  %v3881_v28 = vsub.f32 %v3869_v39, %v3878_v23 }
0x17e6   :  { %v3877_v31 = vpop.xlane.xlu0 %3876 }
0x17e7   :  { %v3879_v51 = vmul.f32 0.00390625, %v3877_v31  ;;  %v3884_v9 = vmul.f32 %v3880_v35, %v3880_v35  ;;  %v3885_v18 = vmul.f32 %v3881_v28, %v3881_v28 }
0x17e9   :  { %v3882_v63 = vsub.f32 %v3870_v44, %v3879_v51  ;;  %v3883_v60 = vsub.f32 %v3871_v8, %v3879_v51  ;;  %v3888_v5 = vadd.f32 %v3885_v18, %v3884_v9 }
0x17eb   :  { %3889 = vadd.xlane.f32.xlu1 %v3888_v5  ;;  %v3886_v2 = vmul.f32 %v3882_v63, %v3882_v63  ;;  %v3887_v27 = vmul.f32 %v3883_v60, %v3883_v60 }
0x17ed   :  { %v3891_v11 = vadd.f32 %v3887_v27, %v3886_v2 }
0x17ef   :  { %3892 = vadd.xlane.f32.xlu1 %v3891_v11 }
0x1878   :  { %v3890_v14 = vpop.xlane.xlu1 %3889 }
0x1879   :  { %v3894_v59 = vmul.f32 0.00390625, %v3890_v14 }
0x187b   :  { %v3896_v49 = vadd.f32 1e-05, %v3894_v59 }
0x187c   :  { %v3893_v0 = vpop.xlane.xlu1 %3892 }
0x187d   :  { %4679 = vrsqrt.f32 %v3896_v49  ;;  %v3895_v22 = vmul.f32 0.00390625, %v3893_v0 }
0x187f   :  { %v3897_v29 = vadd.f32 1e-05, %v3895_v22 }
0x1881   :  { %4681 = vrsqrt.f32 %v3897_v29 }
0x1887   :  { %v4680_v37 = vpop.eup %4679 }
0x1888   :  { %v3900_v40 = vmul.f32 %v4680_v37, %v3880_v35  ;;  %v3901_v48 = vmul.f32 %v4680_v37, %v3881_v28 }
0x188a   :  { %v3904_v3 = vmul.f32 %v3900_v40, %v5379_v12  ;;  %v3905_v21 = vmul.f32 %v3901_v48, %v5382_v53 }
0x188b   :  { %v4682_v25 = vpop.eup %4681 }
0x188c   :  { %v3908_v55 = vadd.f32 %v3904_v3, %v5385_v32  ;;  %v3909_v26 = vadd.f32 %v3905_v21, %v5388_v56  ;;  %v3902_v15 = vmul.f32 %v4682_v25, %v3882_v63  ;;  %v3903_v19 = vmul.f32 %v4682_v25, %v3883_v60 }
0x188e   :  { %3912 = vst [vmem:[%s5547_s11] sm:$0xff] %v3908_v55  ;;  %3913 = vst [vmem:[%s5547_s11 + $0x8] sm:$0xff] %v3909_v26  ;;  %v3906_v20 = vmul.f32 %v3902_v15, %v5379_v12  ;;  %v3907_v1 = vmul.f32 %v3903_v19, %v5382_v53 }
0x1890   :  { %v3910_v36 = vadd.f32 %v3906_v20, %v5385_v32  ;;  %v3911_v16 = vadd.f32 %v3907_v1, %v5388_v56 }
0x1892   :  { %3914 = vst [vmem:[%s5547_s11 + $0x10] sm:$0xff] %v3910_v36  ;;  %3915 = vst [vmem:[%s5547_s11 + $0x18] sm:$0xff] %v3911_v16 }
0x1893   :  { %3924 = vsyncpa [#allocation6], 1 }
0x1894   :  { %3925 = vsyncpa [#allocation8], 1 }
0x1895   :  { %3926 = vsyncmov [#allocation4] }
0x1898   :  { %s3927_s2 = vpop.sfrf %3926 }
0x1899   :  { %p4111_p2 = scmp.ne.s32.totalorder %s3927_s2, 0 }
0x189b   :  { %3931 = shalt.err (%p4111_p2)  }
0x189c   :  { %3933 = vsyncmov [#allocation4 + $0x1] }
0x189f   :  { %s3934_s21 = vpop.sfrf %3933 }
0x18a0   :  { %p4112_p3 = scmp.ne.s32.totalorder %s3934_s21, 0 }
0x18a2   :  { %3938 = shalt.err (%p4112_p3)  }

</bundles_post_ra>
